<compile_context>
chip_gen: v7x
topology: tpu7x:2x2x1
jax: 0.10.0
libtpu: 0.0.40
codegen_flags: <defaults>
</compile_context>

<pallas_src>
import math

import numpy as np
import jax
import jax.numpy as jnp
from jax import lax
from jax.experimental import pallas as pl
from jax.experimental.pallas import tpu as pltpu

NR = 16          # rel_cfg.Nr
DK = 64          # rel_cfg.d_k
DG = 64          # rel_cfg.d_g
DA = 2048        # appearance feature size (fc_K / fc_Q input)
DV = DA // NR    # 128, per-head value dim
THRESH = 1e-6    # nn.Threshold(1e-6, 1e-6)


# --------------------------------------------------------------------------
# Kernel 1: K / Q projections, tiled over output columns (lane-dense MXU work)
# --------------------------------------------------------------------------
def kq_proj_kernel(a_ref, wk_ref, bk_ref, wq_ref, bq_ref, k_ref, q_ref):
    a = a_ref[...]                                            # (P, 2048)
    k_ref[...] = (jnp.dot(a, wk_ref[...],
                          preferred_element_type=jnp.float32) + bk_ref[...])
    q_ref[...] = (jnp.dot(a, wq_ref[...],
                          preferred_element_type=jnp.float32) + bq_ref[...])


# --------------------------------------------------------------------------
# Kernel 2: fc_g -> threshold -> log   (small: SUM(N_i^2) x 64 -> x 16)
# --------------------------------------------------------------------------
def g_proj_kernel(g_ref, wg_ref, bg_ref, o_ref):
    y = (jnp.dot(g_ref[...], wg_ref[...],
                 preferred_element_type=jnp.float32) + bg_ref[...])
    y = jnp.where(y > THRESH, y, jnp.float32(THRESH))         # nn.Threshold
    o_ref[...] = jnp.log(y)


# --------------------------------------------------------------------------
# Kernel 3: per-image relation attention (+ fused conv_s scalar affine)
#   grid = (B,)   one image per grid step, "parallel" (megacore-friendly)
#   layouts are transposed so softmax reduces over the lane axis and both
#   batched matmuls are in standard (A @ B^T / A @ B) form.
# --------------------------------------------------------------------------
def relation_attn_kernel(n_ref, cs_ref, k_ref, q_ref, v_ref, lg_ref, o_ref):
    nr, npad, dk = k_ref.shape            # (16, Np, 64)
    dv = v_ref.shape[-1]                  # 128
    b = pl.program_id(0)
    n = n_ref[b]                          # actual object count of this image
    cw = cs_ref[0]                        # conv_s weight (scalar)
    cb = cs_ref[1]                        # conv_s bias   (scalar)

    k = k_ref[...]                        # (16, Np, 64)
    q = q_ref[...]                        # (16, Np, 64)
    v = v_ref[...]                        # (16, Np, 128)
    lg = lg_ref[...]                      # (16, Np, Np)  == log(g)[h, query, key]

    # attention scores: s[h, c, r] = <q[h, c, :], k[h, r, :]> / sqrt(dk)
    s = jnp.einsum('hck,hrk->hcr', q, k,
                   preferred_element_type=jnp.float32) * (1.0 / math.sqrt(dk))
    logits = lg + s

    # mask padded "key" objects (lane axis) before the softmax
    r_ids = lax.broadcasted_iota(jnp.int32, logits.shape, 2)
    logits = jnp.where(r_ids < n, logits, jnp.float32(-1e30))

    # stable softmax over the key axis (last / lane axis)
    m = jnp.max(logits, axis=-1, keepdims=True)
    e = jnp.exp(logits - m)
    p = e / jnp.sum(e, axis=-1, keepdims=True)                # (16, Np, Np)

    # r[h, c, d] = sum_r p[h, c, r] * v[h, r, d]
    r = jnp.einsum('hcr,hrd->hcd', p, v,
                   preferred_element_type=jnp.float32)        # (16, Np, 128)

    # per-head 128-aligned, full-lane stores; conv_s (scalar affine) fused in
    for h in range(nr):
        o_ref[:, h * dv:(h + 1) * dv] = cw * r[h] + cb


# --------------------------------------------------------------------------
# Wrapper
# --------------------------------------------------------------------------
def relation_net_forward(a_features, g_features, split, rel_pair_counts, params):
    """split / rel_pair_counts: host (numpy) metadata, as required by the
    PyTorch forward's Python loop over `split`."""
    wg, bg, wk, bk, wq, bq, conv_w, conv_b = params
    a = a_features.astype(jnp.float32)
    g = g_features.astype(jnp.float32)
    P = a.shape[0]
    pairs = g.shape[0]
    B = len(split)
    DOUT = NR * DK                                    # 1024
    TN = 256
    assert DOUT % TN == 0

    # ---- kernel 1: K / Q projections, tiled over output columns ------------
    k2d, q2d = pl.pallas_call(
        kq_proj_kernel,
        out_shape=(jax.ShapeDtypeStruct((P, DOUT), jnp.float32),
                   jax.ShapeDtypeStruct((P, DOUT), jnp.float32)),
        grid=(DOUT // TN,),
        in_specs=[
            pl.BlockSpec((P, DA), lambda j: (0, 0)),
            pl.BlockSpec((DA, TN), lambda j: (0, j)),
            pl.BlockSpec((1, TN), lambda j: (0, j)),
            pl.BlockSpec((DA, TN), lambda j: (0, j)),
            pl.BlockSpec((1, TN), lambda j: (0, j)),
        ],
        out_specs=(pl.BlockSpec((P, TN), lambda j: (0, j)),
                   pl.BlockSpec((P, TN), lambda j: (0, j))),
        compiler_params=pltpu.CompilerParams(
            dimension_semantics=("parallel",),
            vmem_limit_bytes=32 * 1024 * 1024),
    )(a, wk, bk.reshape(1, DOUT), wq, bq.reshape(1, DOUT))

    # ---- kernel 2: g projection + threshold + log --------------------------
    lg2d = pl.pallas_call(
        g_proj_kernel,
        out_shape=jax.ShapeDtypeStruct((pairs, NR), jnp.float32),
        grid=(1,),
        in_specs=[pl.BlockSpec((pairs, DG), lambda i: (0, 0)),
                  pl.BlockSpec((DG, NR), lambda i: (0, 0)),
                  pl.BlockSpec((1, NR), lambda i: (0, 0))],
        out_specs=pl.BlockSpec((pairs, NR), lambda i: (0, 0)),
        compiler_params=pltpu.CompilerParams(dimension_semantics=("arbitrary",)),
    )(g, wg, bg.reshape(1, NR))

    # ---- ragged -> padded per-image dense tensors (host-static shapes) -----
    ns = [int(split[i][1]) - int(split[i][0]) for i in range(B)]
    max_n = max(ns)
    Np = max(8, -(-max_n // 8) * 8)                   # pad objects to multiple of 8

    k3 = k2d.reshape(P, NR, DK)
    q3 = q2d.reshape(P, NR, DK)
    v3 = a.reshape(P, NR, DV)

    k_list, q_list, v_list, lg_list = [], [], [], []
    for i in range(B):
        s0, e0 = int(split[i][0]), int(split[i][1])
        n = e0 - s0
        rp0, rp1 = int(rel_pair_counts[i]), int(rel_pair_counts[i + 1])
        pad_n = Np - n
        kb = jnp.transpose(k3[s0:e0], (1, 0, 2))              # (16, n, 64)
        qb = jnp.transpose(q3[s0:e0], (1, 0, 2))
        vb = jnp.transpose(v3[s0:e0], (1, 0, 2))              # (16, n, 128)
        lgb = lg2d[rp0:rp1].T.reshape(NR, n, n)               # [h, key, query]
        lgb_t = jnp.transpose(lgb, (0, 2, 1))                 # [h, query, key]
        k_list.append(jnp.pad(kb, ((0, 0), (0, pad_n), (0, 0))))
        q_list.append(jnp.pad(qb, ((0, 0), (0, pad_n), (0, 0))))
        v_list.append(jnp.pad(vb, ((0, 0), (0, pad_n), (0, 0))))
        lg_list.append(jnp.pad(lgb_t, ((0, 0), (0, pad_n), (0, pad_n))))

    k_pad = jnp.stack(k_list)                                 # (B, 16, Np, 64)
    q_pad = jnp.stack(q_list)
    v_pad = jnp.stack(v_list)                                 # (B, 16, Np, 128)
    lg_pad = jnp.stack(lg_list)                               # (B, 16, Np, Np)

    n_arr = jnp.asarray(ns, dtype=jnp.int32)
    conv_sc = jnp.stack([conv_w, conv_b]).astype(jnp.float32)  # (2,)

    # ---- kernel 3: per-image relation attention ----------------------------
    grid_spec = pltpu.PrefetchScalarGridSpec(
        num_scalar_prefetch=1,
        grid=(B,),
        in_specs=[
            pl.BlockSpec(memory_space=pltpu.MemorySpace.SMEM),             # conv_s scalars
            pl.BlockSpec((None, NR, Np, DK), lambda b, n: (b, 0, 0, 0)),   # K
            pl.BlockSpec((None, NR, Np, DK), lambda b, n: (b, 0, 0, 0)),   # Q
            pl.BlockSpec((None, NR, Np, DV), lambda b, n: (b, 0, 0, 0)),   # V
            pl.BlockSpec((None, NR, Np, Np), lambda b, n: (b, 0, 0, 0)),   # log g
        ],
        out_specs=pl.BlockSpec((None, Np, NR * DV), lambda b, n: (b, 0, 0)),
    )
    out_pad = pl.pallas_call(
        relation_attn_kernel,
        out_shape=jax.ShapeDtypeStruct((B, Np, NR * DV), jnp.float32),
        grid_spec=grid_spec,
        compiler_params=pltpu.CompilerParams(dimension_semantics=("parallel",)),
    )(n_arr, conv_sc, k_pad, q_pad, v_pad, lg_pad)

    # ---- drop padded rows, concat back to (P, 2048) -------------------------
    out = jnp.concatenate([out_pad[i, :ns[i], :] for i in range(B)], axis=0)
    return out


# --------------------------------------------------------------------------
# Pure-JAX reference (mirrors the PyTorch forward) for the correctness check
# --------------------------------------------------------------------------
def ref_relation_net(a, g, split, rel_pair_counts, params):
    wg, bg, wk, bk, wq, bq, conv_w, conv_b = params
    hp = lax.Precision.HIGHEST
    a = a.astype(jnp.float32)
    g = g.astype(jnp.float32)

    gw = jnp.dot(g, wg, precision=hp) + bg                    # (pairs, 16)
    gw = jnp.where(gw > THRESH, gw, THRESH).T                 # (16, pairs)
    k = (jnp.dot(a, wk, precision=hp) + bk).reshape(-1, NR, DK).transpose(1, 0, 2)
    q = (jnp.dot(a, wq, precision=hp) + bq).reshape(-1, NR, DK).transpose(1, 0, 2)
    v = a.reshape(a.shape[0], NR, DV).transpose(1, 0, 2)      # (16, P, 128)

    outs = []
    for i in range(len(split)):
        s0, e0 = int(split[i][0]), int(split[i][1])
        n = e0 - s0
        rp0, rp1 = int(rel_pair_counts[i]), int(rel_pair_counts[i + 1])
        sk, sq, sv = k[:, s0:e0], q[:, s0:e0], v[:, s0:e0]
        aw = jnp.einsum('hik,hjk->hij', sk, sq, precision=hp) / math.sqrt(DK)
        sg = gw[:, rp0:rp1].reshape(NR, n, n)
        fin = jax.nn.softmax(jnp.log(sg) + aw, axis=1)
        r = jnp.einsum('hrd,hrc->hdc', sv, fin, precision=hp)  # (16, 128, n)
        outs.append(r.reshape(NR * DV, n).T)                   # (n, 2048)
    out = jnp.concatenate(outs, axis=0)
    return conv_w * out + conv_b                               # Conv1d(1,1,1)


if __name__ == "__main__":
    key = jax.random.PRNGKey(0)
    keys = jax.random.split(key, 10)

    # batch of 2 images with 5 and 3 objects -> P = 8 objects, 25 + 9 = 34 pairs
    split = np.array([[0, 5], [5, 8]], dtype=np.int32)
    rel_pair_counts = np.array([0, 25, 34], dtype=np.int32)
    P, pairs = 8, 34

    a = jax.random.normal(keys[0], (P, DA), jnp.float32)
    g = jax.random.normal(keys[1], (pairs, DG), jnp.float32)

    wg = 0.2 * jax.random.normal(keys[2], (DG, NR), jnp.float32)
    bg = 0.1 * jax.random.normal(keys[3], (NR,), jnp.float32)
    wk = 0.02 * jax.random.normal(keys[4], (DA, NR * DK), jnp.float32)
    bk = 0.05 * jax.random.normal(keys[5], (NR * DK,), jnp.float32)
    wq = 0.02 * jax.random.normal(keys[6], (DA, NR * DK), jnp.float32)
    bq = 0.05 * jax.random.normal(keys[7], (NR * DK,), jnp.float32)
    conv_w = 0.8 + 0.1 * jax.random.normal(keys[8], (), jnp.float32)
    conv_b = 0.1 * jax.random.normal(keys[9], (), jnp.float32)
    params = (wg, bg, wk, bk, wq, bq, conv_w, conv_b)

    out = relation_net_forward(a, g, split, rel_pair_counts, params)
    out = jax.block_until_ready(out)
    assert out.shape == (P, DA)

    ref = jax.block_until_ready(ref_relation_net(a, g, split, rel_pair_counts, params))
    np.testing.assert_allclose(np.asarray(out), np.asarray(ref), rtol=2e-3, atol=2e-3)
    print("KERNEL_OK")
</pallas_src>

<mosaic_0001>
module attributes {stable_mosaic.version = 11 : i64} {
  func.func @kq_proj_kernel(%arg0: i32, %arg1: memref<8x2048xf32, #tpu.memory_space<vmem>>, %arg2: memref<2048x256xf32, #tpu.memory_space<vmem>>, %arg3: memref<1x256xf32, #tpu.memory_space<vmem>>, %arg4: memref<2048x256xf32, #tpu.memory_space<vmem>>, %arg5: memref<1x256xf32, #tpu.memory_space<vmem>>, %arg6: memref<8x256xf32, #tpu.memory_space<vmem>>, %arg7: memref<8x256xf32, #tpu.memory_space<vmem>>) attributes {dimension_semantics = [#tpu.dimension_semantics<parallel>], iteration_bounds = array<i64: 4>, scalar_prefetch = 0 : i64, scratch_operands = 0 : i64, tpu.core_type = #tpu.core_type<tc>, window_params = [{pipeline_mode = #tpu.pipeline_mode<synchronous>, transform_indices = @transform_0, window_bounds = array<i64: 8, 2048>}, {transform_indices = @transform_1, window_bounds = array<i64: 2048, 256>}, {transform_indices = @transform_2, window_bounds = array<i64: 1, 256>}, {transform_indices = @transform_3, window_bounds = array<i64: 2048, 256>}, {transform_indices = @transform_4, window_bounds = array<i64: 1, 256>}, {transform_indices = @transform_5, window_bounds = array<i64: 8, 256>}, {transform_indices = @transform_6, window_bounds = array<i64: 8, 256>}]} {
    %c0 = arith.constant 0 : index
    %c0_0 = arith.constant 0 : index
    %0 = vector.load %arg1[%c0, %c0_0] : memref<8x2048xf32, #tpu.memory_space<vmem>>, vector<8x2048xf32>
    %c0_1 = arith.constant 0 : index
    %c0_2 = arith.constant 0 : index
    %1 = vector.load %arg2[%c0_1, %c0_2] : memref<2048x256xf32, #tpu.memory_space<vmem>>, vector<2048x256xf32>
    %cst = arith.constant dense<0.000000e+00> : vector<8x256xf32>
    %2 = tpu.matmul %0, %1, %cst {dimension_numbers = #tpu.dot_dimension_numbers<[1], [0], [0], [1], [0, 0, 1, 1], [], []>} : vector<8x2048xf32>, vector<2048x256xf32>, vector<8x256xf32> -> vector<8x256xf32>
    %c0_3 = arith.constant 0 : index
    %c0_4 = arith.constant 0 : index
    %3 = vector.load %arg3[%c0_3, %c0_4] : memref<1x256xf32, #tpu.memory_space<vmem>>, vector<1x256xf32>
    %4 = vector.broadcast %3 : vector<1x256xf32> to vector<8x256xf32>
    %5 = arith.addf %2, %4 : vector<8x256xf32>
    %c0_5 = arith.constant 0 : index
    %c0_6 = arith.constant 0 : index
    %6 = vector.load %arg6[%c0_5, %c0_6] : memref<8x256xf32, #tpu.memory_space<vmem>>, vector<8x256xf32>
    tpu.vector_store %arg6[%c0_5, %c0_6], %5 {strides = array<i32>} : memref<8x256xf32, #tpu.memory_space<vmem>>, vector<8x256xf32>,
    %c0_7 = arith.constant 0 : index
    %c0_8 = arith.constant 0 : index
    %7 = vector.load %arg4[%c0_7, %c0_8] : memref<2048x256xf32, #tpu.memory_space<vmem>>, vector<2048x256xf32>
    %cst_9 = arith.constant dense<0.000000e+00> : vector<8x256xf32>
    %8 = tpu.matmul %0, %7, %cst_9 {dimension_numbers = #tpu.dot_dimension_numbers<[1], [0], [0], [1], [0, 0, 1, 1], [], []>} : vector<8x2048xf32>, vector<2048x256xf32>, vector<8x256xf32> -> vector<8x256xf32>
    %c0_10 = arith.constant 0 : index
    %c0_11 = arith.constant 0 : index
    %9 = vector.load %arg5[%c0_10, %c0_11] : memref<1x256xf32, #tpu.memory_space<vmem>>, vector<1x256xf32>
    %10 = vector.broadcast %9 : vector<1x256xf32> to vector<8x256xf32>
    %11 = arith.addf %8, %10 : vector<8x256xf32>
    %c0_12 = arith.constant 0 : index
    %c0_13 = arith.constant 0 : index
    %12 = vector.load %arg7[%c0_12, %c0_13] : memref<8x256xf32, #tpu.memory_space<vmem>>, vector<8x256xf32>
    tpu.vector_store %arg7[%c0_12, %c0_13], %11 {strides = array<i32>} : memref<8x256xf32, #tpu.memory_space<vmem>>, vector<8x256xf32>,
    return
  }
  func.func @transform_0(%arg0: i32) -> (i32, i32) {
    %c0_i32 = arith.constant 0 : i32
    %c0_i32_0 = arith.constant 0 : i32
    %c0_i32_1 = arith.constant 0 : i32
    return %c0_i32, %c0_i32_0 : i32, i32
  }
  func.func @transform_1(%arg0: i32) -> (i32, i32) {
    %c0_i32 = arith.constant 0 : i32
    %c0_i32_0 = arith.constant 0 : i32
    return %c0_i32, %arg0 : i32, i32
  }
  func.func @transform_2(%arg0: i32) -> (i32, i32) {
    %c0_i32 = arith.constant 0 : i32
    %c0_i32_0 = arith.constant 0 : i32
    return %c0_i32, %arg0 : i32, i32
  }
  func.func @transform_3(%arg0: i32) -> (i32, i32) {
    %c0_i32 = arith.constant 0 : i32
    %c0_i32_0 = arith.constant 0 : i32
    return %c0_i32, %arg0 : i32, i32
  }
  func.func @transform_4(%arg0: i32) -> (i32, i32) {
    %c0_i32 = arith.constant 0 : i32
    %c0_i32_0 = arith.constant 0 : i32
    return %c0_i32, %arg0 : i32, i32
  }
  func.func @transform_5(%arg0: i32) -> (i32, i32) {
    %c0_i32 = arith.constant 0 : i32
    %c0_i32_0 = arith.constant 0 : i32
    return %c0_i32, %arg0 : i32, i32
  }
  func.func @transform_6(%arg0: i32) -> (i32, i32) {
    %c0_i32 = arith.constant 0 : i32
    %c0_i32_0 = arith.constant 0 : i32
    return %c0_i32, %arg0 : i32, i32
  }
}

</mosaic_0001>

<bundles_post_ra>
// kernel: tpu_custom_call.1
= control target key start
LH: loop header
LB: loop body
LE: loop exit
PB: predicated region body
PF: predicated region fallthrough
CT: control target
= control target key end

     0   :  { %s5682_s0 = inlined_call_operand.hbm [shape: f32[8,2048], index: 0, kind: input, shape index: {}]   ;;  %s5683_s1 = inlined_call_operand.hbm [shape: f32[2048,1024], index: 1, kind: input, shape index: {}]   ;;  %s5684_s2 = inlined_call_operand.hbm [shape: f32[1,1024], index: 2, kind: input, shape index: {}]   ;;  %s5685_s3 = inlined_call_operand.hbm [shape: f32[2048,1024], index: 3, kind: input, shape index: {}]   ;;  %s5686_s4 = inlined_call_operand.hbm [shape: f32[1,1024], index: 4, kind: input, shape index: {}]   ;;  %s5687_s5 = inlined_call_operand.hbm [shape: f32[8,1024], index: 5, kind: output, shape index: {0}]   ;;  %s5688_s6 = inlined_call_operand.hbm [shape: f32[8,1024], index: 6, kind: output, shape index: {1}]  }
   0x1   :  { %5704 = sst [smem:[#allocation22_spill]] %s5683_s1 }
   0x2   :  { %5705 = sst [smem:[#allocation23_spill]] %s5685_s3 }
   0x3   :  { %12 = vsyncpa [#allocation3], 0 }
   0x4   :  { %13 = vsyncpa [#allocation6], 0 }
   0x5   :  { %15 = vsyncpa [#allocation6 + $0x1], 0 }
   0x6   :  { %16 = vsyncpa [#allocation9], 0 }
   0x7   :  { %18 = vsyncpa [#allocation9 + $0x1], 0 }
   0x8   :  { %19 = vsyncpa [#allocation4], 0 }
   0x9   :  { %21 = vsyncpa [#allocation4 + $0x1], 0 }
   0xa   :  { %22 = vsyncpa [#allocation13], 0 }
   0xb   :  { %24 = vsyncpa [#allocation13 + $0x1], 0  ;;  %s4300_s21 = smov 0   ;;  %s4302_s22 = smov 0  }
   0xc   :  { %s4304_s23 = smov 0   ;;  %s4306_s24 = smov 0  }
   0xd LB: > { %5706 = sst [smem:[#allocation19_spill]] %s4249_s23  ;;  %s4321_s25 = sadd.s32 1, %s4253_s24   ;;  %s4253_s24 = sphi %s4306_s24, %s5731_s24   ;;  %s4249_s23 = sphi %s4304_s23, %s5733_s23   ;;  %s4245_s22 = sphi %s4302_s22, %s5735_s22   ;;  %s4241_s21 = sphi %s4300_s21, %s5734_s21  }
   0xe   : > { %5707 = sst [smem:[#allocation20_spill]] %s4321_s25  ;;  %s58_s26 = sadd.s32 1, %s4249_s23 }
   0xf   : > { %s55_s27 = ssub.s32 %s4253_s24, %s4321_s25  ;;  %p5689_p0 = scmp.ne.s32.totalorder %s4249_s23, %s4245_s22 }
  0x10   : > { %p56_p1 = scmp.eq.s32.totalorder %s55_s27, 0  ;;  %p66_p2 = scmp.eq.s32.totalorder %s4253_s24, 0 }
  0x11   : > { %p3960_p3 = scmp.lt.s32.totalorder %s4253_s24, 4  ;;  %s236_s29 = sand.u32 1, %s4253_s24  }
  0x12   : > { %s4331_s28 = scalar_select %p56_p1, %s4249_s23, %s58_s26  }
  0x13   : > { %p67_p4 = por %p66_p2, %p5689_p0  ;;  %s5690_s30 = sand.u32 1, %s4249_s23  }
  0x14   : > { %5708 = sst [smem:[#allocation21_spill]] %s4331_s28  ;;  %s4340_s7 = sshll.u32 %s5690_s30, 12 }
  0x15   : > { %s2857_s8 = sshll.u32 %s4253_s24, 8  ;;  %s5709_s1 = sld [smem:[#allocation22_spill]] }
  0x16   : > { %s240_s12 = scalar_lea.vmem [#allocation5], %s4340_s7  ;;  %p4351_p5 = pnand %p3960_p3, %p67_p4 }
  0x17   : > { %s247_s13 = sshll.u32 %s240_s12, 4  ;;  %s4359_s15 = scalar_lea.sflag [#allocation6], %s236_s29  ;;  %s4355_s13 = int_to_ptr.vmem [resolvable:$true] %s247_s13 }
  0x18   : > { %s5710_s14 = scalar_select %p4351_p5, 1, 0 }
  0x19   : > { %p4365_p7 = pneg %p4351_p5 }
  0x1b   : > { %s4348_s11 = scalar_lea.hbm %s5709_s1, %s2857_s8  ;;  %s4004_s20 = scalar_lea.hbm %s5709_s1, 262144 }
  0x1c   : > { %s3999_s16 = scalar_lea.hbm %s4348_s11, 65536  ;;  %p4005_p10 = scmp.lt.u32.totalorder %s4348_s11, %s5709_s1 }
  0x1d   : > { %p4000_p6 = scmp.ne.s32.totalorder %s4348_s11, %s3999_s16  ;;  %p4006_p11 = scmp.lt.u32.totalorder %s4004_s20, %s3999_s16 }
  0x1e   : > { %s5711_s17 = scalar_select %p4365_p7, 1, 0 }
  0x1f   : > { %p4002_p8 = pnand %p4365_p7, %p4000_p6  ;;  %p4007_p12 = por %p4006_p11, %p4005_p10 }
  0x20   : > { %p4008_p13 = scmp.lt.u32.totalorder %s3999_s16, %s4348_s11 }
  0x21   : > { %p4003_p9 = pneg %p4002_p8 }
  0x22   : > { %p4009_p1 = por %p4008_p13, %p4007_p12 }
  0x24   : > { %p4010_p2 = pnand %p4009_p1, %p4003_p9 }
  0x26   : > { %4013 = shalt.err (!%p4010_p2)
}
  0x27   : > { %s4014_s9 = scalar_lea.vmem %s4355_s13, 65536  ;;  %s4255_s10 = smov [#allocation5]  }
  0x28   : > { %p4015_p3 = scmp.ne.s32.totalorder %s4355_s13, %s4014_s9  ;;  %s4019_s12 = sshll.u32 %s4255_s10, 4  ;;  %s4020_s12 = int_to_ptr.vmem [resolvable:$false] %s4019_s12 }
  0x29   : > { %s4021_s18 = scalar_lea.vmem %s4020_s12, 131072  ;;  %p4022_p8 = scmp.lt.s32.totalorder %s4355_s13, %s4020_s12 }
  0x2a   : > { %p4017_p4 = pnand %p4015_p3, %p4365_p7  ;;  %p4023_p0 = scmp.lt.s32.totalorder %s4021_s18, %s4014_s9 }
  0x2c   : > { %p4018_p6 = pneg %p4017_p4  ;;  %p4024_p10 = por %p4023_p0, %p4022_p8 }
  0x2e   : > { %p4025_p11 = pnand %p4024_p10, %p4018_p6 }
  0x30   : > { %4028 = shalt.err (!%p4025_p11)
}
  0x31   : > { %s4256_s16 = smov 1024   ;;  %s4257_s19 = smov 256  }
  0x32   : > { %s4258_s20 = smov 16   ;;  %s5712_s3 = sld [smem:[#allocation23_spill]] }
  0x33   : > { %3942 = dma.hbm_to_vmem [thread:$0]  (!%p4351_p5), %s4348_s11, 65536, %s4355_s13, %s4359_s15, %s4256_s16, %s4257_s19, %s4258_s20  }
  0x34   : > { %s280_s10 = scalar_lea.vmem [#allocation8], %s4340_s7  ;;  %s4404_s18 = scalar_lea.sflag [#allocation9], %s236_s29 }
  0x35   : > { %s287_s12 = sshll.u32 %s280_s10, 4  ;;  %s4400_s12 = int_to_ptr.vmem [resolvable:$true] %s287_s12 }
  0x38   : > { %s4397_s9 = scalar_lea.hbm %s5712_s3, %s2857_s8  ;;  %s4034_s8 = scalar_lea.hbm %s5712_s3, 262144 }
  0x39   : > { %s4029_s30 = scalar_lea.hbm %s4397_s9, 65536  ;;  %p4035_p13 = scmp.lt.u32.totalorder %s4397_s9, %s5712_s3 }
  0x3a   : > { %p4030_p0 = scmp.ne.s32.totalorder %s4397_s9, %s4029_s30  ;;  %p4036_p1 = scmp.lt.u32.totalorder %s4034_s8, %s4029_s30 }
  0x3b   : > { %p4038_p3 = scmp.lt.u32.totalorder %s4029_s30, %s4397_s9 }
  0x3c   : > { %p4032_p9 = pnand %p4030_p0, %p4365_p7  ;;  %p4037_p2 = por %p4036_p1, %p4035_p13 }
  0x3e   : > { %p4033_p12 = pneg %p4032_p9  ;;  %p4039_p4 = por %p4038_p3, %p4037_p2 }
  0x40   : > { %p4040_p6 = pnand %p4039_p4, %p4033_p12 }
  0x42   : > { %4043 = shalt.err (!%p4040_p6)
}
  0x43   : > { %s4044_s29 = scalar_lea.vmem %s4400_s12, 65536  ;;  %s4259_s7 = smov [#allocation8]  }
  0x44   : > { %p4045_p8 = scmp.ne.s32.totalorder %s4400_s12, %s4044_s29  ;;  %s4049_s10 = sshll.u32 %s4259_s7, 4  ;;  %s4050_s10 = int_to_ptr.vmem [resolvable:$false] %s4049_s10 }
  0x45   : > { %s4051_s11 = scalar_lea.vmem %s4050_s10, 131072  ;;  %p4052_p0 = scmp.lt.s32.totalorder %s4400_s12, %s4050_s10 }
  0x46   : > { %p4047_p10 = pnand %p4045_p8, %p4365_p7  ;;  %p4053_p9 = scmp.lt.s32.totalorder %s4051_s11, %s4044_s29 }
  0x48   : > { %p4048_p11 = pneg %p4047_p10  ;;  %p4054_p13 = por %p4053_p9, %p4052_p0 }
  0x4a   : > { %p4055_p1 = pnand %p4054_p13, %p4048_p11 }
  0x4c   : > { %4058 = shalt.err (!%p4055_p1)
}
  0x4d   : > { %3948 = dma.hbm_to_vmem [thread:$0]  (!%p4351_p5), %s4397_s9, 65536, %s4400_s12, %s4404_s18, %s4256_s16, %s4257_s19, %s4258_s20  }
  0x4e   : > { %s4432_s30 = sadd.s32 4294967295, %s4253_s24   ;;  %s2825_s13 = sadd.s32 4294967294, %s4253_s24  }
  0x4f   : > { %p71_p12 = scmp.ne.s32.totalorder %s4245_s22, %s4241_s21  ;;  %p5692_p2 = scmp.eq.s32.totalorder %s4432_s30, 0 }
  0x50   : > { %p173_p3 = scmp.eq.s32.totalorder %s4432_s30, 3  ;;  %p179_p4 = scmp.eq.s32.totalorder %s2825_s13, 3 }
  0x51   : > { %p4441_p6 = por %p5692_p2, %p71_p12  ;;  %p2826_p8 = scmp.ge.s32.totalorder %s4253_s24, 1 }
  0x52   : > { %p5714_p10 = scmp.ne.s32.totalorder %s4249_s23, %s4245_s22  ;;  %p4453_p0 = por %p179_p4, %p71_p12 }
  0x53   : > { %s5713_s8 = scalar_select %p4441_p6, 1, 0 }
  0x54   : > { %p4449_p11 = por %p173_p3, %p5714_p10  ;;  %p212_p9 = scmp.lt.s32.totalorder %s4253_s24, 5 }
  0x55   : > { %s5716_s19 = scalar_select %p4453_p0, 1, 0 }
  0x56   : > { %s5715_s16 = scalar_select %p4449_p11, 1, 0 }
  0x57   : > { %s5717_s20 = sand.u32 1, %s4249_s23   ;;  %p4462_p13 = pnand %p2826_p8, %p212_p9 }
  0x58   : > { %s4460_s9 = sshll.u32 %s5717_s20, 1  ;;  %s4260_s26 = smov [#allocation2]  }
  0x59   : > { %s5718_s12 = scalar_select %p4462_p13, 1, 0 }
  0x5a   : > { %s225_s27 = sshll.u32 %s4260_s26, 4  ;;  %p3935_p1 = pneg %p4462_p13  ;;  %s4466_s27 = int_to_ptr.vmem [resolvable:$true] %s225_s27 }
  0x5b   : > { %s5691_s29 = sshll.u32 %s4253_s24, 5  ;;  %s261_s13 = scalar_lea.vmem [#allocation7], %s4460_s9 }
  0x5c   : > { %s4476_s11 = scalar_lea.hbm %s5684_s2, %s5691_s29  ;;  %s269_s20 = sshll.u32 %s261_s13, 4  ;;  %s270_s20 = int_to_ptr.vmem [resolvable:$true] %s269_s20 }
  0x5d   : > { %p4481_p12 = pnand %p3935_p1, %p5692_p2  ;;  %s4059_s1 = scalar_lea.hbm %s4476_s11, 32 }
  0x5e   : > { %p4060_p3 = scmp.ne.s32.totalorder %s4476_s11, %s4059_s1  ;;  %s4064_s29 = scalar_lea.hbm %s5684_s2, 128 }
  0x5f   : > { %s5719_s26 = scalar_select %p4481_p12, 1, 0 }
  0x60   : > { %p4062_p4 = pnand %p4060_p3, %p4365_p7  ;;  %p4065_p10 = scmp.lt.u32.totalorder %s4476_s11, %s5684_s2 }
  0x61   : > { %p4066_p9 = scmp.lt.u32.totalorder %s4064_s29, %s4059_s1  ;;  %p4068_p1 = scmp.lt.u32.totalorder %s4059_s1, %s4476_s11 }
  0x62   : > { %p4063_p8 = pneg %p4062_p4 }
  0x63   : > { %p4067_p0 = por %p4066_p9, %p4065_p10 }
  0x65   : > { %p4069_p2 = por %p4068_p1, %p4067_p0 }
  0x67   : > { %p4070_p11 = pnand %p4069_p2, %p4063_p8 }
  0x69   : > { %4073 = shalt.err (!%p4070_p11)
}
  0x6a   : > { %s4074_s13 = scalar_lea.vmem %s270_s20, 32  ;;  %s4261_s23 = smov [#allocation7]  }
  0x6b   : > { %p4075_p6 = scmp.ne.s32.totalorder %s270_s20, %s4074_s13  ;;  %s4079_s25 = sshll.u32 %s4261_s23, 4  ;;  %s4080_s25 = int_to_ptr.vmem [resolvable:$false] %s4079_s25 }
  0x6c   : > { %s4081_s7 = scalar_lea.vmem %s4080_s25, 64  ;;  %p4082_p13 = scmp.lt.s32.totalorder %s270_s20, %s4080_s25 }
  0x6d   : > { %p4077_p3 = pnand %p4075_p6, %p4365_p7  ;;  %p4083_p12 = scmp.lt.s32.totalorder %s4081_s7, %s4074_s13 }
  0x6f   : > { %p4078_p4 = pneg %p4077_p3  ;;  %p4084_p5 = por %p4083_p12, %p4082_p13 }
  0x71   : > { %p4085_p9 = pnand %p4084_p5, %p4078_p4 }
  0x73   : > { %4088 = shalt.err (!%p4085_p9)
}
  0x74   : > { %p5720_p10 = scmp.ne.s32.totalorder %s5710_s14, 0  ;;  %s4089_s28 = scalar_lea.hbm %s5682_s0, 2048 }
  0x75   : > { %p4090_p2 = scmp.ne.s32.totalorder %s5682_s0, %s4089_s28  ;;  %p5721_p6 = scmp.ne.s32.totalorder %s5719_s26, 0 }
  0x76   : > { %3945 = dma.hbm_to_vmem [thread:$0]  (!%p5720_p10), %s4476_s11, 32, %s270_s20, %s4359_s15  }
  0x77   : > { %p4091_p11 = pneg %p5721_p6  ;;  %p4096_p5 = scmp.lt.u32.totalorder %s4089_s28, %s5682_s0 }
  0x79   : > { %p4092_p0 = pnand %p4091_p11, %p4090_p2 }
  0x7b   : > { %p4093_p13 = pneg %p4092_p0 }
  0x7d   : > { %p4098_p12 = pnand %p4096_p5, %p4093_p13 }
  0x7f   : > { %4101 = shalt.err (!%p4098_p12)
}
  0x80   : > { %s4102_s15 = scalar_lea.vmem %s4466_s27, 2048  ;;  %p4110_p4 = scmp.lt.s32.totalorder %s4466_s27, %s4466_s27 }
  0x81   : > { %p4103_p8 = scmp.ne.s32.totalorder %s4466_s27, %s4102_s15  ;;  %p4111_p9 = scmp.lt.s32.totalorder %s4102_s15, %s4102_s15 }
  0x83   : > { %p4105_p1 = pnand %p4103_p8, %p4091_p11  ;;  %p4112_p10 = por %p4111_p9, %p4110_p4 }
  0x85   : > { %p4106_p3 = pneg %p4105_p1 }
  0x87   : > { %p4113_p7 = pnand %p4112_p10, %p4106_p3 }
  0x89   : > { %4116 = shalt.err (!%p4113_p7)
}
  0x8a   : > { %3938 = dma.hbm_to_vmem [thread:$0]  (!%p5721_p6), %s5682_s0, 2048, %s4466_s27, [#allocation3]  }
  0x8b   : > { %s5722_s13 = sshll.u32 %s4253_s24, 5  ;;  %s301_s28 = scalar_lea.vmem [#allocation10], %s4460_s9 }
  0x8c   : > { %s4529_s3 = scalar_lea.hbm %s5686_s4, %s5722_s13  ;;  %s309_s26 = sshll.u32 %s301_s28, 4  ;;  %s310_s26 = int_to_ptr.vmem [resolvable:$true] %s309_s26 }
  0x8d   : > { %s4117_s29 = scalar_lea.hbm %s4529_s3, 32  ;;  %p5723_p10 = scmp.ne.s32.totalorder %s5711_s17, 0 }
  0x8e   : > { %p4118_p7 = scmp.ne.s32.totalorder %s4529_s3, %s4117_s29  ;;  %s4122_s23 = scalar_lea.hbm %s5686_s4, 128 }
  0x8f   : > { %p4123_p6 = scmp.lt.u32.totalorder %s4529_s3, %s5686_s4  ;;  %p4124_p0 = scmp.lt.u32.totalorder %s4122_s23, %s4117_s29 }
  0x90   : > { %p4120_p2 = pnand %p4118_p7, %p5723_p10  ;;  %p4126_p5 = scmp.lt.u32.totalorder %s4117_s29, %s4529_s3 }
  0x91   : > { %p4125_p13 = por %p4124_p0, %p4123_p6 }
  0x92   : > { %p4121_p11 = pneg %p4120_p2 }
  0x93   : > { %p4127_p12 = por %p4126_p5, %p4125_p13 }
  0x95   : > { %p4128_p8 = pnand %p4127_p12, %p4121_p11 }
  0x97   : > { %4131 = shalt.err (!%p4128_p8)
}
  0x98   : > { %s4132_s9 = scalar_lea.vmem %s310_s26, 32  ;;  %s4262_s11 = smov [#allocation10]  }
  0x99   : > { %p4133_p1 = scmp.ne.s32.totalorder %s310_s26, %s4132_s9  ;;  %s4137_s20 = sshll.u32 %s4262_s11, 4  ;;  %s4138_s20 = int_to_ptr.vmem [resolvable:$false] %s4137_s20 }
  0x9a   : > { %s4139_s13 = scalar_lea.vmem %s4138_s20, 64  ;;  %p4140_p9 = scmp.lt.s32.totalorder %s310_s26, %s4138_s20 }
  0x9b   : > { %p4135_p3 = pnand %p4133_p1, %p5723_p10  ;;  %p4141_p7 = scmp.lt.s32.totalorder %s4139_s13, %s4132_s9 }
  0x9d   : > { %p4136_p4 = pneg %p4135_p3  ;;  %p4142_p2 = por %p4141_p7, %p4140_p9 }
  0x9f   : > { %p4143_p0 = pnand %p4142_p2, %p4136_p4 }
  0xa1   : > { %4146 = shalt.err (!%p4143_p0)
}
  0xa2   : > { %p5724_p6 = scmp.ne.s32.totalorder %s5710_s14, 0  ;;  %p5725_p11 = scmp.ne.s32.totalorder %s5718_s12, 0 }
  0xa3   : > { %p5726_p10 = scmp.eq.s32.totalorder (!%p5725_p11), %s4432_s30, 0 }
  0xa4   : > { %3951 = dma.hbm_to_vmem [thread:$0]  (!%p5724_p6), %s4529_s3, 32, %s310_s26, %s4404_s18  }
  0xa5   : > { %318 = sbr.rel (%p5725_p11) target bundleno = 950 (0x3b6), region = 40 }
  0xac   : > { %4220 = dma.done.wait (%p5726_p10), [#allocation3], 2048   ;;  %p5727_p13 = pmov %p5726_p10 }
  0xad   : > { %s324_s17 = sand.u32 1, %s4432_s30   ;;  %s4558_s7 = sand.u32 1, %s4245_s22  }
  0xae   : > { %4222 = vsyncadd (%p5727_p13), [#allocation3], 4294965248  ;;  %s2843_s14 = sshll.u32 %s4558_s7, 12  ;;  %s325_s1 = scalar_lea.sflag [#allocation6], %s324_s17 }
  0xaf   : > { %s4561_s28 = scalar_lea.vmem [#allocation5], %s2843_s14  ;;  %p5728_p5 = scmp.ne.s32.totalorder %s5713_s8, 0 }
  0xb1   : > { %4224 = dma.done.wait (%p5728_p5), %s325_s1, 65568  }
  0xb2   : > { %4226 = vsyncadd (%p5728_p5), %s325_s1, 4294901728  ;;  %s2844_s18 = sshll.u32 %s4558_s7, 1  ;;  %s343_s3 = scalar_lea.sflag [#allocation9], %s324_s17 }
  0xb3   : > { %s4570_s12 = scalar_lea.vmem [#allocation7], %s2844_s18  ;;  %s4572_s26 = scalar_lea.vmem [#allocation8], %s2843_s14 }
  0xb4   : > { %4228 = dma.done.wait (%p5728_p5), %s343_s3, 65568  }
  0xb5   : > { %4230 = vsyncadd (%p5728_p5), %s343_s3, 4294901728  ;;  %v427_v0 = vld [vmem:[%s4561_s28 + $0x8] sm:$0xff]  ;;  %v429_v1 = vld [vmem:[%s4561_s28 + $0x18] sm:$0xff]  ;;  %s2847_s8 = sshll.u32 %s4558_s7, 4  ;;  %s355_s29 = scalar_lea.vmem [#allocation10], %s2844_s18 }
  0xb6   : > { %v1521_v2 = vld [vmem:[%s4572_s26 + $0x8] sm:$0xff]  ;;  %v2863_v3 = vpack.c.bf16 %v429_v1, %v427_v0  ;;  %v1523_v4 = vld [vmem:[%s4572_s26 + $0x18] sm:$0xff]  ;;  %v1520_v9 = vld [vmem:[%s4572_s26] sm:$0xff]  ;;  %s2861_s10 = sshll.u32 %s4432_s30, 8  ;;  %s396_s27 = scalar_lea.vmem [#allocation11], %s2847_s8 }
  0xb7   : > { %v426_v5 = vld [vmem:[%s4561_s28] sm:$0xff]  ;;  %v428_v6 = vld [vmem:[%s4561_s28 + $0x10] sm:$0xff]  ;;  %v3375_v7 = vpack.c.bf16 %v1523_v4, %v1521_v2  ;;  %v431_v11 = vld [vmem:[%s4561_s28 + $0x28] sm:$0xff]  ;;  %s2634_s23 = sshll.u32 %s396_s27, 4  ;;  %s403_s25 = scalar_lea.vmem [#allocation12], %s2847_s8  ;;  %s5612_s23 = int_to_ptr.vmem [resolvable:$true] %s2634_s23 }
  0xb8   : > { %v2865_v8 = vpack.c.bf16 %v428_v6, %v426_v5  ;;  %v1522_v10 = vld [vmem:[%s4572_s26 + $0x10] sm:$0xff]  ;;  %2864 = vmatprep.subr.bf16.mxu0 %v2863_v3  ;;  %v1525_v14 = vld [vmem:[%s4572_s26 + $0x28] sm:$0xff]  ;;  %v1527_v15 = vld [vmem:[%s4572_s26 + $0x38] sm:$0xff]  ;;  %s2648_s15 = sshll.u32 %s403_s25, 4  ;;  %s5610_s20 = scalar_lea.hbm %s5687_s5, %s2861_s10  ;;  %s5619_s15 = int_to_ptr.vmem [resolvable:$true] %s2648_s15 }
  0xb9   : > { %v3377_v12 = vpack.c.bf16 %v1522_v10, %v1520_v9  ;;  %v433_v13 = vld [vmem:[%s4561_s28 + $0x38] sm:$0xff]  ;;  %3376 = vmatprep.subr.bf16.mxu1 %v3375_v7  ;;  %v3379_v17 = vpack.c.bf16 %v1527_v15, %v1525_v14  ;;  %v430_v18 = vld [vmem:[%s4561_s28 + $0x20] sm:$0xff]  ;;  %v432_v19 = vld [vmem:[%s4561_s28 + $0x30] sm:$0xff]  ;;  %s5617_s17 = scalar_lea.hbm %s5688_s6, %s2861_s10  ;;  %s2615_s14 = scalar_lea.sflag [#allocation4], %s4558_s7 }
  0xba   : > { %2866 = vmatpush1.bf16.msra.mxu0 %v2865_v8  ;;  %v2867_v16 = vpack.c.bf16 %v433_v13, %v431_v11  ;;  %v1524_v20 = vld [vmem:[%s4572_s26 + $0x20] sm:$0xff]  ;;  %v2869_v21 = vpack.c.bf16 %v432_v19, %v430_v18  ;;  %v1526_v22 = vld [vmem:[%s4572_s26 + $0x30] sm:$0xff]  ;;  %v1529_v27 = vld [vmem:[%s4572_s26 + $0x48] sm:$0xff]  ;;  %s4147_s1 = scalar_lea.vmem %s5612_s23, 256  ;;  %p5729_p8 = scmp.ne.s32.totalorder %s5715_s16, 0 }
  0xbb   : > { %3378 = vmatpush1.bf16.msra.mxu1 %v3377_v12  ;;  %v435_v23 = vld [vmem:[%s4561_s28 + $0x48] sm:$0xff]  ;;  %v437_v24 = vld [vmem:[%s4561_s28 + $0x58] sm:$0xff]  ;;  %v3381_v25 = vpack.c.bf16 %v1526_v22, %v1524_v20  ;;  %v434_v29 = vld [vmem:[%s4561_s28 + $0x40] sm:$0xff]  ;;  %p4148_p12 = scmp.ne.s32.totalorder %s5612_s23, %s4147_s1 }
  0xbc   : > { %2868 = vmatprep.subr.bf16.mxu0 %v2867_v16  ;;  %3380 = vmatprep.subr.bf16.mxu1 %v3379_v17  ;;  %v2871_v26 = vpack.c.bf16 %v437_v24, %v435_v23  ;;  %v1531_v28 = vld [vmem:[%s4572_s26 + $0x58] sm:$0xff]  ;;  %v436_v31 = vld [vmem:[%s4561_s28 + $0x50] sm:$0xff]  ;;  %v1528_v32 = vld [vmem:[%s4572_s26 + $0x40] sm:$0xff] }
  0xbd   : > { %v3383_v30 = vpack.c.bf16 %v1531_v28, %v1529_v27  ;;  %v1530_v33 = vld [vmem:[%s4572_s26 + $0x50] sm:$0xff]  ;;  %v2873_v34 = vpack.c.bf16 %v436_v31, %v434_v29  ;;  %v439_v35 = vld [vmem:[%s4561_s28 + $0x68] sm:$0xff]  ;;  %v1535_v40 = vld [vmem:[%s4572_s26 + $0x78] sm:$0xff]  ;;  %p4149_p1 = pnand %p4148_p12, %p5729_p8 }
  0xbe   : > { %2870 = vmatpush1.bf16.msra.mxu0 %v2869_v21  ;;  %v441_v36 = vld [vmem:[%s4561_s28 + $0x78] sm:$0xff]  ;;  %v1533_v37 = vld [vmem:[%s4572_s26 + $0x68] sm:$0xff]  ;;  %v3385_v38 = vpack.c.bf16 %v1530_v33, %v1528_v32  ;;  %v438_v41 = vld [vmem:[%s4561_s28 + $0x60] sm:$0xff] }
  0xbf   : > { %3382 = vmatpush1.bf16.msra.mxu1 %v3381_v25  ;;  %2872 = vmatprep.subr.bf16.mxu0 %v2871_v26  ;;  %v2875_v39 = vpack.c.bf16 %v441_v36, %v439_v35  ;;  %v440_v42 = vld [vmem:[%s4561_s28 + $0x70] sm:$0xff]  ;;  %v3387_v43 = vpack.c.bf16 %v1535_v40, %v1533_v37  ;;  %v1532_v44 = vld [vmem:[%s4572_s26 + $0x60] sm:$0xff]  ;;  %v445_v47 = vld [vmem:[%s4561_s28 + $0x98] sm:$0xff]  ;;  %p4150_p3 = pneg %p4149_p1 }
  0xc0   : > { %3384 = vmatprep.subr.bf16.mxu1 %v3383_v30  ;;  %v1534_v45 = vld [vmem:[%s4572_s26 + $0x70] sm:$0xff]  ;;  %v443_v46 = vld [vmem:[%s4561_s28 + $0x88] sm:$0xff]  ;;  %v1539_v49 = vld [vmem:[%s4572_s26 + $0x98] sm:$0xff]  ;;  %v2877_v50 = vpack.c.bf16 %v440_v42, %v438_v41 }
  0xc1   : > { %v1537_v48 = vld [vmem:[%s4572_s26 + $0x88] sm:$0xff]  ;;  %v3389_v51 = vpack.c.bf16 %v1534_v45, %v1532_v44  ;;  %v2879_v52 = vpack.c.bf16 %v445_v47, %v443_v46  ;;  %v442_v53 = vld [vmem:[%s4561_s28 + $0x80] sm:$0xff]  ;;  %v1538_v57 = vld [vmem:[%s4572_s26 + $0x90] sm:$0xff] }
  0xc2   : > { %2874 = vmatpush1.bf16.msra.mxu0 %v2873_v34  ;;  %v444_v54 = vld [vmem:[%s4561_s28 + $0x90] sm:$0xff]  ;;  %v1536_v55 = vld [vmem:[%s4572_s26 + $0x80] sm:$0xff]  ;;  %v3391_v56 = vpack.c.bf16 %v1539_v49, %v1537_v48  ;;  %v449_v59 = vld [vmem:[%s4561_s28 + $0xb8] sm:$0xff] }
  0xc3   : > { %3386 = vmatpush1.bf16.msra.mxu1 %v3385_v38  ;;  %2876 = vmatprep.subr.bf16.mxu0 %v2875_v39  ;;  %v447_v58 = vld [vmem:[%s4561_s28 + $0xa8] sm:$0xff]  ;;  %v1543_v61 = vld [vmem:[%s4572_s26 + $0xb8] sm:$0xff]  ;;  %v2881_v62 = vpack.c.bf16 %v444_v54, %v442_v53  ;;  %v3393_v63 = vpack.c.bf16 %v1538_v57, %v1536_v55  ;;  %v448_v2 = vld [vmem:[%s4561_s28 + $0xb0] sm:$0xff] }
  0xc4   : > { %3388 = vmatprep.subr.bf16.mxu1 %v3387_v43  ;;  %v1541_v60 = vld [vmem:[%s4572_s26 + $0xa8] sm:$0xff]  ;;  %v2883_v0 = vpack.c.bf16 %v449_v59, %v447_v58  ;;  %v446_v1 = vld [vmem:[%s4561_s28 + $0xa0] sm:$0xff]  ;;  %v1542_v5 = vld [vmem:[%s4572_s26 + $0xb0] sm:$0xff] }
  0xc5   : > { %v1540_v3 = vld [vmem:[%s4572_s26 + $0xa0] sm:$0xff]  ;;  %v3395_v4 = vpack.c.bf16 %v1543_v61, %v1541_v60  ;;  %v453_v7 = vld [vmem:[%s4561_s28 + $0xd8] sm:$0xff]  ;;  %v1545_v8 = vld [vmem:[%s4572_s26 + $0xc8] sm:$0xff]  ;;  %v2885_v10 = vpack.c.bf16 %v448_v2, %v446_v1 }
  0xc6   : > { %2878 = vmatpush1.bf16.msra.mxu0 %v2877_v50  ;;  %v451_v6 = vld [vmem:[%s4561_s28 + $0xc8] sm:$0xff]  ;;  %v1547_v9 = vld [vmem:[%s4572_s26 + $0xd8] sm:$0xff]  ;;  %v3397_v11 = vpack.c.bf16 %v1542_v5, %v1540_v3  ;;  %v452_v14 = vld [vmem:[%s4561_s28 + $0xd0] sm:$0xff] }
  0xc7   : > { %3390 = vmatpush1.bf16.msra.mxu1 %v3389_v51  ;;  %2880 = vmatprep.subr.bf16.mxu0 %v2879_v52  ;;  %v2887_v12 = vpack.c.bf16 %v453_v7, %v451_v6  ;;  %v450_v13 = vld [vmem:[%s4561_s28 + $0xc0] sm:$0xff]  ;;  %v3399_v16 = vpack.c.bf16 %v1547_v9, %v1545_v8  ;;  %v1546_v17 = vld [vmem:[%s4572_s26 + $0xd0] sm:$0xff]  ;;  %v455_v18 = vld [vmem:[%s4561_s28 + $0xe8] sm:$0xff] }
  0xc8   : > { %3392 = vmatprep.subr.bf16.mxu1 %v3391_v56  ;;  %v1544_v15 = vld [vmem:[%s4572_s26 + $0xc0] sm:$0xff]  ;;  %v457_v19 = vld [vmem:[%s4561_s28 + $0xf8] sm:$0xff]  ;;  %v1549_v20 = vld [vmem:[%s4572_s26 + $0xe8] sm:$0xff]  ;;  %v2889_v22 = vpack.c.bf16 %v452_v14, %v450_v13 }
  0xc9   : > { %v1551_v21 = vld [vmem:[%s4572_s26 + $0xf8] sm:$0xff]  ;;  %v3401_v23 = vpack.c.bf16 %v1546_v17, %v1544_v15  ;;  %v2891_v24 = vpack.c.bf16 %v457_v19, %v455_v18  ;;  %v456_v26 = vld [vmem:[%s4561_s28 + $0xf0] sm:$0xff]  ;;  %v1548_v27 = vld [vmem:[%s4572_s26 + $0xe0] sm:$0xff] }
  0xca   : > { %2882 = vmatpush1.bf16.msra.mxu0 %v2881_v62  ;;  %v454_v25 = vld [vmem:[%s4561_s28 + $0xe0] sm:$0xff]  ;;  %v3403_v28 = vpack.c.bf16 %v1551_v21, %v1549_v20  ;;  %v1550_v29 = vld [vmem:[%s4572_s26 + $0xf0] sm:$0xff]  ;;  %v459_v30 = vld [vmem:[%s4561_s28 + $0x108] sm:$0xff] }
  0xcb   : > { %3394 = vmatpush1.bf16.msra.mxu1 %v3393_v63  ;;  %2884 = vmatprep.subr.bf16.mxu0 %v2883_v0  ;;  %v461_v31 = vld [vmem:[%s4561_s28 + $0x118] sm:$0xff]  ;;  %v1553_v32 = vld [vmem:[%s4572_s26 + $0x108] sm:$0xff]  ;;  %v2893_v34 = vpack.c.bf16 %v456_v26, %v454_v25  ;;  %v3405_v35 = vpack.c.bf16 %v1550_v29, %v1548_v27  ;;  %v458_v37 = vld [vmem:[%s4561_s28 + $0x100] sm:$0xff] }
  0xcc   : > { %3396 = vmatprep.subr.bf16.mxu1 %v3395_v4  ;;  %v1555_v33 = vld [vmem:[%s4572_s26 + $0x118] sm:$0xff]  ;;  %v2895_v36 = vpack.c.bf16 %v461_v31, %v459_v30  ;;  %v460_v38 = vld [vmem:[%s4561_s28 + $0x110] sm:$0xff]  ;;  %v1552_v39 = vld [vmem:[%s4572_s26 + $0x100] sm:$0xff] }
  0xcd   : > { %v3407_v40 = vpack.c.bf16 %v1555_v33, %v1553_v32  ;;  %v1554_v41 = vld [vmem:[%s4572_s26 + $0x110] sm:$0xff]  ;;  %v463_v42 = vld [vmem:[%s4561_s28 + $0x128] sm:$0xff]  ;;  %v1559_v45 = vld [vmem:[%s4572_s26 + $0x138] sm:$0xff]  ;;  %v2897_v46 = vpack.c.bf16 %v460_v38, %v458_v37 }
  0xce   : > { %2886 = vmatpush1.bf16.msra.mxu0 %v2885_v10  ;;  %v465_v43 = vld [vmem:[%s4561_s28 + $0x138] sm:$0xff]  ;;  %v1557_v44 = vld [vmem:[%s4572_s26 + $0x128] sm:$0xff]  ;;  %v3409_v47 = vpack.c.bf16 %v1554_v41, %v1552_v39  ;;  %v462_v49 = vld [vmem:[%s4561_s28 + $0x120] sm:$0xff] }
  0xcf   : > { %3398 = vmatpush1.bf16.msra.mxu1 %v3397_v11  ;;  %2888 = vmatprep.subr.bf16.mxu0 %v2887_v12  ;;  %v2899_v48 = vpack.c.bf16 %v465_v43, %v463_v42  ;;  %v464_v50 = vld [vmem:[%s4561_s28 + $0x130] sm:$0xff]  ;;  %v1556_v51 = vld [vmem:[%s4572_s26 + $0x120] sm:$0xff]  ;;  %v3411_v52 = vpack.c.bf16 %v1559_v45, %v1557_v44  ;;  %v469_v55 = vld [vmem:[%s4561_s28 + $0x158] sm:$0xff] }
  0xd0   : > { %3400 = vmatprep.subr.bf16.mxu1 %v3399_v16  ;;  %v1558_v53 = vld [vmem:[%s4572_s26 + $0x130] sm:$0xff]  ;;  %v467_v54 = vld [vmem:[%s4561_s28 + $0x148] sm:$0xff]  ;;  %v1563_v57 = vld [vmem:[%s4572_s26 + $0x158] sm:$0xff]  ;;  %v2901_v58 = vpack.c.bf16 %v464_v50, %v462_v49 }
  0xd1   : > { %v1561_v56 = vld [vmem:[%s4572_s26 + $0x148] sm:$0xff]  ;;  %v3413_v59 = vpack.c.bf16 %v1558_v53, %v1556_v51  ;;  %v2903_v60 = vpack.c.bf16 %v469_v55, %v467_v54  ;;  %v466_v61 = vld [vmem:[%s4561_s28 + $0x140] sm:$0xff]  ;;  %v1562_v1 = vld [vmem:[%s4572_s26 + $0x150] sm:$0xff] }
  0xd2   : > { %2890 = vmatpush1.bf16.msra.mxu0 %v2889_v22  ;;  %v468_v62 = vld [vmem:[%s4561_s28 + $0x150] sm:$0xff]  ;;  %v1560_v63 = vld [vmem:[%s4572_s26 + $0x140] sm:$0xff]  ;;  %v3415_v0 = vpack.c.bf16 %v1563_v57, %v1561_v56  ;;  %v473_v3 = vld [vmem:[%s4561_s28 + $0x178] sm:$0xff] }
  0xd3   : > { %3402 = vmatpush1.bf16.msra.mxu1 %v3401_v23  ;;  %2892 = vmatprep.subr.bf16.mxu0 %v2891_v24  ;;  %v471_v2 = vld [vmem:[%s4561_s28 + $0x168] sm:$0xff]  ;;  %v1567_v5 = vld [vmem:[%s4572_s26 + $0x178] sm:$0xff]  ;;  %v2905_v6 = vpack.c.bf16 %v468_v62, %v466_v61  ;;  %v3417_v8 = vpack.c.bf16 %v1562_v1, %v1560_v63  ;;  %v472_v10 = vld [vmem:[%s4561_s28 + $0x170] sm:$0xff] }
  0xd4   : > { %3404 = vmatprep.subr.bf16.mxu1 %v3403_v28  ;;  %v1565_v4 = vld [vmem:[%s4572_s26 + $0x168] sm:$0xff]  ;;  %v470_v7 = vld [vmem:[%s4561_s28 + $0x160] sm:$0xff]  ;;  %v2907_v9 = vpack.c.bf16 %v473_v3, %v471_v2  ;;  %v1566_v12 = vld [vmem:[%s4572_s26 + $0x170] sm:$0xff] }
  0xd5   : > { %v1564_v11 = vld [vmem:[%s4572_s26 + $0x160] sm:$0xff]  ;;  %v3419_v13 = vpack.c.bf16 %v1567_v5, %v1565_v4  ;;  %v477_v15 = vld [vmem:[%s4561_s28 + $0x198] sm:$0xff]  ;;  %v1569_v17 = vld [vmem:[%s4572_s26 + $0x188] sm:$0xff]  ;;  %v2909_v19 = vpack.c.bf16 %v472_v10, %v470_v7 }
  0xd6   : > { %2894 = vmatpush1.bf16.msra.mxu0 %v2893_v34  ;;  %v475_v14 = vld [vmem:[%s4561_s28 + $0x188] sm:$0xff]  ;;  %v1571_v18 = vld [vmem:[%s4572_s26 + $0x198] sm:$0xff]  ;;  %v3421_v20 = vpack.c.bf16 %v1566_v12, %v1564_v11  ;;  %v476_v23 = vld [vmem:[%s4561_s28 + $0x190] sm:$0xff] }
  0xd7   : > { %3406 = vmatpush1.bf16.msra.mxu1 %v3405_v35  ;;  %2896 = vmatprep.subr.bf16.mxu0 %v2895_v36  ;;  %v411_v16 = vld [vmem:[#allocation2 + $0x8] sm:$0xff]  ;;  %v2911_v21 = vpack.c.bf16 %v477_v15, %v475_v14  ;;  %v474_v22 = vld [vmem:[%s4561_s28 + $0x180] sm:$0xff]  ;;  %v3423_v25 = vpack.c.bf16 %v1571_v18, %v1569_v17  ;;  %v1570_v26 = vld [vmem:[%s4572_s26 + $0x190] sm:$0xff] }
  0xd8   : > { %3408 = vmatprep.subr.bf16.mxu1 %v3407_v40  ;;  %1014 = vmatprep.mubr.f32.mxu0 %v411_v16  ;;  %v1568_v24 = vld [vmem:[%s4572_s26 + $0x180] sm:$0xff]  ;;  %v481_v28 = vld [vmem:[%s4561_s28 + $0x1b8] sm:$0xff]  ;;  %v1573_v29 = vld [vmem:[%s4572_s26 + $0x1a8] sm:$0xff]  ;;  %v2913_v31 = vpack.c.bf16 %v476_v23, %v474_v22 }
  0xd9   : > { %2108 = vmatprep.mubr.f32.mxu1 %v411_v16  ;;  %v479_v27 = vld [vmem:[%s4561_s28 + $0x1a8] sm:$0xff]  ;;  %v1575_v30 = vld [vmem:[%s4572_s26 + $0x1b8] sm:$0xff]  ;;  %v3425_v32 = vpack.c.bf16 %v1570_v26, %v1568_v24  ;;  %v480_v35 = vld [vmem:[%s4561_s28 + $0x1b0] sm:$0xff] }
  0xda   : > { %2898 = vmatpush1.bf16.msra.mxu0 %v2897_v46  ;;  %v2915_v33 = vpack.c.bf16 %v481_v28, %v479_v27  ;;  %v478_v34 = vld [vmem:[%s4561_s28 + $0x1a0] sm:$0xff]  ;;  %v3427_v37 = vpack.c.bf16 %v1575_v30, %v1573_v29  ;;  %v1574_v38 = vld [vmem:[%s4572_s26 + $0x1b0] sm:$0xff]  ;;  %v483_v39 = vld [vmem:[%s4561_s28 + $0x1c8] sm:$0xff] }
  0xdb   : > { %3410 = vmatpush1.bf16.msra.mxu1 %v3409_v47  ;;  %2900 = vmatprep.subr.bf16.mxu0 %v2899_v48  ;;  %v1572_v36 = vld [vmem:[%s4572_s26 + $0x1a0] sm:$0xff]  ;;  %v485_v40 = vld [vmem:[%s4561_s28 + $0x1d8] sm:$0xff]  ;;  %v1577_v41 = vld [vmem:[%s4572_s26 + $0x1c8] sm:$0xff]  ;;  %v2917_v43 = vpack.c.bf16 %v480_v35, %v478_v34 }
  0xdc   : > { %3412 = vmatprep.subr.bf16.mxu1 %v3411_v52  ;;  %v1579_v42 = vld [vmem:[%s4572_s26 + $0x1d8] sm:$0xff]  ;;  %v3429_v44 = vpack.c.bf16 %v1574_v38, %v1572_v36  ;;  %v2919_v45 = vpack.c.bf16 %v485_v40, %v483_v39  ;;  %v484_v47 = vld [vmem:[%s4561_s28 + $0x1d0] sm:$0xff]  ;;  %v1576_v48 = vld [vmem:[%s4572_s26 + $0x1c0] sm:$0xff] }
  0xdd   : > { %v482_v46 = vld [vmem:[%s4561_s28 + $0x1c0] sm:$0xff]  ;;  %v3431_v49 = vpack.c.bf16 %v1579_v42, %v1577_v41  ;;  %v1578_v50 = vld [vmem:[%s4572_s26 + $0x1d0] sm:$0xff]  ;;  %v487_v51 = vld [vmem:[%s4561_s28 + $0x1e8] sm:$0xff] }
  0xde   : > { %2902 = vmatpush1.bf16.msra.mxu0 %v2901_v58  ;;  %v489_v52 = vld [vmem:[%s4561_s28 + $0x1f8] sm:$0xff]  ;;  %v1581_v53 = vld [vmem:[%s4572_s26 + $0x1e8] sm:$0xff]  ;;  %v2921_v55 = vpack.c.bf16 %v484_v47, %v482_v46  ;;  %v3433_v56 = vpack.c.bf16 %v1578_v50, %v1576_v48  ;;  %v486_v58 = vld [vmem:[%s4561_s28 + $0x1e0] sm:$0xff] }
  0xdf   : > { %3414 = vmatpush1.bf16.msra.mxu1 %v3413_v59  ;;  %2904 = vmatprep.subr.bf16.mxu0 %v2903_v60  ;;  %v1583_v54 = vld [vmem:[%s4572_s26 + $0x1f8] sm:$0xff]  ;;  %v2923_v57 = vpack.c.bf16 %v489_v52, %v487_v51  ;;  %v488_v59 = vld [vmem:[%s4561_s28 + $0x1f0] sm:$0xff]  ;;  %v1580_v60 = vld [vmem:[%s4572_s26 + $0x1e0] sm:$0xff] }
  0xe0   : > { %3416 = vmatprep.subr.bf16.mxu1 %v3415_v0  ;;  %v3435_v61 = vpack.c.bf16 %v1583_v54, %v1581_v53  ;;  %v1582_v62 = vld [vmem:[%s4572_s26 + $0x1f0] sm:$0xff]  ;;  %v491_v63 = vld [vmem:[%s4561_s28 + $0x208] sm:$0xff]  ;;  %v1587_v2 = vld [vmem:[%s4572_s26 + $0x218] sm:$0xff]  ;;  %v2925_v3 = vpack.c.bf16 %v488_v59, %v486_v58 }
  0xe1   : > { %v493_v0 = vld [vmem:[%s4561_s28 + $0x218] sm:$0xff]  ;;  %v1585_v1 = vld [vmem:[%s4572_s26 + $0x208] sm:$0xff]  ;;  %v3437_v4 = vpack.c.bf16 %v1582_v62, %v1580_v60  ;;  %v410_v15 = vld [vmem:[#allocation2] sm:$0xff] }
  0xe2   : > { %2906 = vmatpush1.bf16.msra.mxu0 %v2905_v6  ;;  %v2927_v5 = vpack.c.bf16 %v493_v0, %v491_v63  ;;  %v490_v6 = vld [vmem:[%s4561_s28 + $0x200] sm:$0xff]  ;;  %v492_v7 = vld [vmem:[%s4561_s28 + $0x210] sm:$0xff]  ;;  %v495_v11 = vld [vmem:[%s4561_s28 + $0x228] sm:$0xff] }
  0xe3   : > { %3418 = vmatpush1.bf16.msra.mxu1 %v3417_v8  ;;  %2908 = vmatprep.subr.bf16.mxu0 %v2907_v9  ;;  %v1584_v8 = vld [vmem:[%s4572_s26 + $0x200] sm:$0xff]  ;;  %v3439_v9 = vpack.c.bf16 %v1587_v2, %v1585_v1  ;;  %v1586_v10 = vld [vmem:[%s4572_s26 + $0x210] sm:$0xff]  ;;  %v1591_v14 = vld [vmem:[%s4572_s26 + $0x238] sm:$0xff]  ;;  %v2929_v16 = vpack.c.bf16 %v492_v7, %v490_v6 }
  0xe4   : > { %3420 = vmatprep.subr.bf16.mxu1 %v3419_v13  ;;  %v497_v12 = vld [vmem:[%s4561_s28 + $0x238] sm:$0xff]  ;;  %v1589_v13 = vld [vmem:[%s4572_s26 + $0x228] sm:$0xff]  ;;  %v3441_v17 = vpack.c.bf16 %v1586_v10, %v1584_v8 }
  0xe5   : > { %v2931_v18 = vpack.c.bf16 %v497_v12, %v495_v11  ;;  %v3443_v22 = vpack.c.bf16 %v1591_v14, %v1589_v13  ;;  %v1590_v23 = vld [vmem:[%s4572_s26 + $0x230] sm:$0xff]  ;;  %v499_v24 = vld [vmem:[%s4561_s28 + $0x248] sm:$0xff]  ;;  %v1595_v27 = vld [vmem:[%s4572_s26 + $0x258] sm:$0xff] }
  0xe6   : > { %2910 = vmatpush1.bf16.msra.mxu0 %v2909_v19  ;;  %v494_v19 = vld [vmem:[%s4561_s28 + $0x220] sm:$0xff]  ;;  %v1593_v26 = vld [vmem:[%s4572_s26 + $0x248] sm:$0xff]  ;;  %v1594_v35 = vld [vmem:[%s4572_s26 + $0x250] sm:$0xff] }
  0xe7   : > { %3422 = vmatpush1.bf16.msra.mxu1 %v3421_v20  ;;  %2912 = vmatprep.subr.bf16.mxu0 %v2911_v21  ;;  %v496_v20 = vld [vmem:[%s4561_s28 + $0x230] sm:$0xff]  ;;  %v1588_v21 = vld [vmem:[%s4572_s26 + $0x220] sm:$0xff]  ;;  %v3447_v34 = vpack.c.bf16 %v1595_v27, %v1593_v26  ;;  %v1599_v39 = vld [vmem:[%s4572_s26 + $0x278] sm:$0xff] }
  0xe8   : > { %3424 = vmatprep.subr.bf16.mxu1 %v3423_v25  ;;  %v501_v25 = vld [vmem:[%s4561_s28 + $0x258] sm:$0xff]  ;;  %v2933_v28 = vpack.c.bf16 %v496_v20, %v494_v19  ;;  %v3445_v29 = vpack.c.bf16 %v1590_v23, %v1588_v21  ;;  %v503_v36 = vld [vmem:[%s4561_s28 + $0x268] sm:$0xff]  ;;  %v514_v13 = vld [vmem:[%s4561_s28 + $0x2c0] sm:$0xff] }
  0xe9   : > { %v2935_v30 = vpack.c.bf16 %v501_v25, %v499_v24  ;;  %v1597_v38 = vld [vmem:[%s4572_s26 + $0x268] sm:$0xff]  ;;  %v1598_v47 = vld [vmem:[%s4572_s26 + $0x270] sm:$0xff]  ;;  %v1603_v51 = vld [vmem:[%s4572_s26 + $0x298] sm:$0xff] }
  0xea   : > { %2914 = vmatpush1.bf16.msra.mxu0 %v2913_v31  ;;  %v498_v31 = vld [vmem:[%s4561_s28 + $0x240] sm:$0xff]  ;;  %v3451_v46 = vpack.c.bf16 %v1599_v39, %v1597_v38  ;;  %v507_v48 = vld [vmem:[%s4561_s28 + $0x288] sm:$0xff]  ;;  %v1602_v59 = vld [vmem:[%s4572_s26 + $0x290] sm:$0xff] }
  0xeb   : > { %3426 = vmatpush1.bf16.msra.mxu1 %v3425_v32  ;;  %2916 = vmatprep.subr.bf16.mxu0 %v2915_v33  ;;  %v500_v32 = vld [vmem:[%s4561_s28 + $0x250] sm:$0xff]  ;;  %v1592_v33 = vld [vmem:[%s4572_s26 + $0x240] sm:$0xff]  ;;  %v1607_v63 = vld [vmem:[%s4572_s26 + $0x2b8] sm:$0xff] }
  0xec   : > { %3428 = vmatprep.subr.bf16.mxu1 %v3427_v37  ;;  %v505_v37 = vld [vmem:[%s4561_s28 + $0x278] sm:$0xff]  ;;  %v2937_v40 = vpack.c.bf16 %v500_v32, %v498_v31  ;;  %v3449_v41 = vpack.c.bf16 %v1594_v35, %v1592_v33  ;;  %v1601_v50 = vld [vmem:[%s4572_s26 + $0x288] sm:$0xff] }
  0xed   : > { %v2939_v42 = vpack.c.bf16 %v505_v37, %v503_v36  ;;  %v3455_v58 = vpack.c.bf16 %v1603_v51, %v1601_v50  ;;  %v511_v60 = vld [vmem:[%s4561_s28 + $0x2a8] sm:$0xff]  ;;  %v1606_v7 = vld [vmem:[%s4572_s26 + $0x2b0] sm:$0xff]  ;;  %v1611_v11 = vld [vmem:[%s4572_s26 + $0x2d8] sm:$0xff] }
  0xee   : > { %2918 = vmatpush1.bf16.msra.mxu0 %v2917_v43  ;;  %v502_v43 = vld [vmem:[%s4561_s28 + $0x260] sm:$0xff]  ;;  %v1605_v62 = vld [vmem:[%s4572_s26 + $0x2a8] sm:$0xff]  ;;  %v521_v21 = vld [vmem:[%s4561_s28 + $0x2f8] sm:$0xff] }
  0xef   : > { %3430 = vmatpush1.bf16.msra.mxu1 %v3429_v44  ;;  %2920 = vmatprep.subr.bf16.mxu0 %v2919_v45  ;;  %v504_v44 = vld [vmem:[%s4561_s28 + $0x270] sm:$0xff]  ;;  %v1596_v45 = vld [vmem:[%s4572_s26 + $0x260] sm:$0xff]  ;;  %v3459_v6 = vpack.c.bf16 %v1607_v63, %v1605_v62  ;;  %v1615_v24 = vld [vmem:[%s4572_s26 + $0x2f8] sm:$0xff] }
  0xf0   : > { %3432 = vmatprep.subr.bf16.mxu1 %v3431_v49  ;;  %v509_v49 = vld [vmem:[%s4561_s28 + $0x298] sm:$0xff]  ;;  %v2941_v52 = vpack.c.bf16 %v504_v44, %v502_v43  ;;  %v3453_v53 = vpack.c.bf16 %v1598_v47, %v1596_v45  ;;  %v515_v8 = vld [vmem:[%s4561_s28 + $0x2c8] sm:$0xff] }
  0xf1   : > { %v2943_v54 = vpack.c.bf16 %v509_v49, %v507_v48  ;;  %v1609_v10 = vld [vmem:[%s4572_s26 + $0x2c8] sm:$0xff]  ;;  %v1614_v32 = vld [vmem:[%s4572_s26 + $0x2f0] sm:$0xff]  ;;  %v1619_v36 = vld [vmem:[%s4572_s26 + $0x318] sm:$0xff] }
  0xf2   : > { %2922 = vmatpush1.bf16.msra.mxu0 %v2921_v55  ;;  %v506_v55 = vld [vmem:[%s4561_s28 + $0x280] sm:$0xff]  ;;  %v3463_v19 = vpack.c.bf16 %v1611_v11, %v1609_v10  ;;  %v519_v20 = vld [vmem:[%s4561_s28 + $0x2e8] sm:$0xff]  ;;  %v1618_v44 = vld [vmem:[%s4572_s26 + $0x310] sm:$0xff] }
  0xf3   : > { %3434 = vmatpush1.bf16.msra.mxu1 %v3433_v56  ;;  %2924 = vmatprep.subr.bf16.mxu0 %v2923_v57  ;;  %v508_v56 = vld [vmem:[%s4561_s28 + $0x290] sm:$0xff]  ;;  %v1600_v57 = vld [vmem:[%s4572_s26 + $0x280] sm:$0xff]  ;;  %v2955_v27 = vpack.c.bf16 %v521_v21, %v519_v20  ;;  %v1623_v48 = vld [vmem:[%s4572_s26 + $0x338] sm:$0xff] }
  0xf4   : > { %3436 = vmatprep.subr.bf16.mxu1 %v3435_v61  ;;  %v513_v61 = vld [vmem:[%s4561_s28 + $0x2b8] sm:$0xff]  ;;  %v2945_v0 = vpack.c.bf16 %v508_v56, %v506_v55  ;;  %v3457_v1 = vpack.c.bf16 %v1602_v59, %v1600_v57  ;;  %v1613_v23 = vld [vmem:[%s4572_s26 + $0x2e8] sm:$0xff] }
  0xf5   : > { %v2947_v2 = vpack.c.bf16 %v513_v61, %v511_v60  ;;  %v3467_v31 = vpack.c.bf16 %v1615_v24, %v1613_v23  ;;  %v523_v33 = vld [vmem:[%s4561_s28 + $0x308] sm:$0xff]  ;;  %v1622_v56 = vld [vmem:[%s4572_s26 + $0x330] sm:$0xff]  ;;  %v1627_v60 = vld [vmem:[%s4572_s26 + $0x358] sm:$0xff] }
  0xf6   : > { %2926 = vmatpush1.bf16.msra.mxu0 %v2925_v3  ;;  %v510_v3 = vld [vmem:[%s4561_s28 + $0x2a0] sm:$0xff]  ;;  %v1617_v35 = vld [vmem:[%s4572_s26 + $0x308] sm:$0xff] }
  0xf7   : > { %3438 = vmatpush1.bf16.msra.mxu1 %v3437_v4  ;;  %2928 = vmatprep.subr.bf16.mxu0 %v2927_v5  ;;  %v512_v4 = vld [vmem:[%s4561_s28 + $0x2b0] sm:$0xff]  ;;  %v1604_v5 = vld [vmem:[%s4572_s26 + $0x2a0] sm:$0xff]  ;;  %v3471_v43 = vpack.c.bf16 %v1619_v36, %v1617_v35  ;;  %v1635_v20 = vld [vmem:[%s4572_s26 + $0x398] sm:$0xff] }
  0xf8   : > { %3440 = vmatprep.subr.bf16.mxu1 %v3439_v9  ;;  %v517_v9 = vld [vmem:[%s4561_s28 + $0x2d8] sm:$0xff]  ;;  %v2949_v12 = vpack.c.bf16 %v512_v4, %v510_v3  ;;  %v3461_v14 = vpack.c.bf16 %v1606_v7, %v1604_v5  ;;  %v527_v45 = vld [vmem:[%s4561_s28 + $0x328] sm:$0xff]  ;;  %v538_v24 = vld [vmem:[%s4561_s28 + $0x380] sm:$0xff] }
  0xf9   : > { %1015 = vmatmul.mubr.f32.vlgmr.msra.gmra.mrb[0].mxu0 %v410_v15  ;;  %v1621_v47 = vld [vmem:[%s4572_s26 + $0x328] sm:$0xff]  ;;  %v1626_v4 = vld [vmem:[%s4572_s26 + $0x350] sm:$0xff]  ;;  %v542_v36 = vld [vmem:[%s4561_s28 + $0x3a0] sm:$0xff] }
  0xfa   : > { %2930 = vmatpush1.bf16.msra.mxu0 %v2929_v16  ;;  %2109 = vmatmul.mubr.f32.vlgmr.msra.gmra.mrb[0].mxu1 %v410_v15  ;;  %v2951_v15 = vpack.c.bf16 %v517_v9, %v515_v8  ;;  %v516_v16 = vld [vmem:[%s4561_s28 + $0x2d0] sm:$0xff]  ;;  %v3475_v55 = vpack.c.bf16 %v1623_v48, %v1621_v47  ;;  %v531_v57 = vld [vmem:[%s4561_s28 + $0x348] sm:$0xff]  ;;  %v1631_v8 = vld [vmem:[%s4572_s26 + $0x378] sm:$0xff] }
  0xfb   : > { %3442 = vmatpush1.bf16.msra.mxu1 %v3441_v17  ;;  %2932 = vmatprep.subr.bf16.mxu0 %v2931_v18  ;;  %v1608_v17 = vld [vmem:[%s4572_s26 + $0x2c0] sm:$0xff]  ;;  %v1610_v18 = vld [vmem:[%s4572_s26 + $0x2d0] sm:$0xff]  ;;  %v2953_v25 = vpack.c.bf16 %v516_v16, %v514_v13  ;;  %v1625_v59 = vld [vmem:[%s4572_s26 + $0x348] sm:$0xff] }
  0xfc   : > { %3444 = vmatprep.subr.bf16.mxu1 %v3443_v22  ;;  %v413_v22 = vld [vmem:[#allocation2 + $0x18] sm:$0xff]  ;;  %v3465_v26 = vpack.c.bf16 %v1610_v18, %v1608_v17  ;;  %v3479_v3 = vpack.c.bf16 %v1627_v60, %v1625_v59  ;;  %v535_v5 = vld [vmem:[%s4561_s28 + $0x368] sm:$0xff]  ;;  %v536_v13 = vld [vmem:[%s4561_s28 + $0x370] sm:$0xff] }
  0xfd   : > { %1085 = vmatprep.mubr.f32.mxu0 %v413_v22  ;;  %2179 = vmatprep.mubr.f32.mxu1 %v413_v22  ;;  %v1629_v7 = vld [vmem:[%s4572_s26 + $0x368] sm:$0xff]  ;;  %v1630_v16 = vld [vmem:[%s4572_s26 + $0x370] sm:$0xff]  ;;  %v546_v48 = vld [vmem:[%s4561_s28 + $0x3c0] sm:$0xff] }
  0xfe   : > { %2934 = vmatpush1.bf16.msra.mxu0 %v2933_v28  ;;  %v518_v28 = vld [vmem:[%s4561_s28 + $0x2e0] sm:$0xff]  ;;  %v539_v17 = vld [vmem:[%s4561_s28 + $0x388] sm:$0xff]  ;;  %v541_v18 = vld [vmem:[%s4561_s28 + $0x398] sm:$0xff] }
  0xff   : > { %3446 = vmatpush1.bf16.msra.mxu1 %v3445_v29  ;;  %2936 = vmatprep.subr.bf16.mxu0 %v2935_v30  ;;  %v520_v29 = vld [vmem:[%s4561_s28 + $0x2f0] sm:$0xff]  ;;  %v1612_v30 = vld [vmem:[%s4572_s26 + $0x2e0] sm:$0xff]  ;;  %v2975_v23 = vpack.c.bf16 %v541_v18, %v539_v17 }
 0x100   : > { %3448 = vmatprep.subr.bf16.mxu1 %v3447_v34  ;;  %v525_v34 = vld [vmem:[%s4561_s28 + $0x318] sm:$0xff]  ;;  %v2957_v37 = vpack.c.bf16 %v520_v29, %v518_v28  ;;  %v3469_v38 = vpack.c.bf16 %v1614_v32, %v1612_v30  ;;  %v543_v29 = vld [vmem:[%s4561_s28 + $0x3a8] sm:$0xff]  ;;  %v550_v60 = vld [vmem:[%s4561_s28 + $0x3e0] sm:$0xff] }
 0x101   : > { %v2959_v39 = vpack.c.bf16 %v525_v34, %v523_v33  ;;  %v1634_v28 = vld [vmem:[%s4572_s26 + $0x390] sm:$0xff]  ;;  %v1639_v32 = vld [vmem:[%s4572_s26 + $0x3b8] sm:$0xff] }
 0x102   : > { %2938 = vmatpush1.bf16.msra.mxu0 %v2937_v40  ;;  %v522_v40 = vld [vmem:[%s4561_s28 + $0x300] sm:$0xff]  ;;  %v545_v30 = vld [vmem:[%s4561_s28 + $0x3b8] sm:$0xff]  ;;  %v412_v17 = vld [vmem:[#allocation2 + $0x10] sm:$0xff] }
 0x103   : > { %3450 = vmatpush1.bf16.msra.mxu1 %v3449_v41  ;;  %2940 = vmatprep.subr.bf16.mxu0 %v2939_v42  ;;  %v524_v41 = vld [vmem:[%s4561_s28 + $0x310] sm:$0xff]  ;;  %v1616_v42 = vld [vmem:[%s4572_s26 + $0x300] sm:$0xff]  ;;  %v2979_v35 = vpack.c.bf16 %v545_v30, %v543_v29  ;;  %v1659_v29 = vld [vmem:[%s4572_s26 + $0x458] sm:$0xff] }
 0x104   : > { %3452 = vmatprep.subr.bf16.mxu1 %v3451_v46  ;;  %v529_v46 = vld [vmem:[%s4561_s28 + $0x338] sm:$0xff]  ;;  %v2961_v49 = vpack.c.bf16 %v524_v41, %v522_v40  ;;  %v3473_v50 = vpack.c.bf16 %v1618_v44, %v1616_v42  ;;  %v547_v41 = vld [vmem:[%s4561_s28 + $0x3c8] sm:$0xff] }
 0x105   : > { %v2963_v51 = vpack.c.bf16 %v529_v46, %v527_v45  ;;  %v1638_v40 = vld [vmem:[%s4572_s26 + $0x3b0] sm:$0xff]  ;;  %v1643_v44 = vld [vmem:[%s4572_s26 + $0x3d8] sm:$0xff]  ;;  %v415_v30 = vld [vmem:[#allocation2 + $0x28] sm:$0xff] }
 0x106   : > { %2942 = vmatpush1.bf16.msra.mxu0 %v2941_v52  ;;  %v526_v52 = vld [vmem:[%s4561_s28 + $0x320] sm:$0xff]  ;;  %v549_v42 = vld [vmem:[%s4561_s28 + $0x3d8] sm:$0xff] }
 0x107   : > { %3454 = vmatpush1.bf16.msra.mxu1 %v3453_v53  ;;  %2944 = vmatprep.subr.bf16.mxu0 %v2943_v54  ;;  %v528_v53 = vld [vmem:[%s4561_s28 + $0x330] sm:$0xff]  ;;  %v1620_v54 = vld [vmem:[%s4572_s26 + $0x320] sm:$0xff]  ;;  %v2983_v47 = vpack.c.bf16 %v549_v42, %v547_v41  ;;  %v1663_v42 = vld [vmem:[%s4572_s26 + $0x478] sm:$0xff] }
 0x108   : > { %3456 = vmatprep.subr.bf16.mxu1 %v3455_v58  ;;  %v533_v58 = vld [vmem:[%s4561_s28 + $0x358] sm:$0xff]  ;;  %v2965_v61 = vpack.c.bf16 %v528_v53, %v526_v52  ;;  %v3477_v62 = vpack.c.bf16 %v1622_v56, %v1620_v54  ;;  %v551_v53 = vld [vmem:[%s4561_s28 + $0x3e8] sm:$0xff] }
 0x109   : > { %v2967_v63 = vpack.c.bf16 %v533_v58, %v531_v57  ;;  %v1642_v52 = vld [vmem:[%s4572_s26 + $0x3d0] sm:$0xff]  ;;  %v1647_v56 = vld [vmem:[%s4572_s26 + $0x3f8] sm:$0xff]  ;;  %v1661_v41 = vld [vmem:[%s4572_s26 + $0x468] sm:$0xff] }
 0x10a   : > { %2946 = vmatpush1.bf16.msra.mxu0 %v2945_v0  ;;  %v530_v0 = vld [vmem:[%s4561_s28 + $0x340] sm:$0xff]  ;;  %v553_v54 = vld [vmem:[%s4561_s28 + $0x3f8] sm:$0xff] }
 0x10b   : > { %3458 = vmatpush1.bf16.msra.mxu1 %v3457_v1  ;;  %2948 = vmatprep.subr.bf16.mxu0 %v2947_v2  ;;  %v532_v1 = vld [vmem:[%s4561_s28 + $0x350] sm:$0xff]  ;;  %v1624_v2 = vld [vmem:[%s4572_s26 + $0x340] sm:$0xff]  ;;  %v2987_v59 = vpack.c.bf16 %v553_v54, %v551_v53  ;;  %v1667_v54 = vld [vmem:[%s4572_s26 + $0x498] sm:$0xff] }
 0x10c   : > { %3460 = vmatprep.subr.bf16.mxu1 %v3459_v6  ;;  %v537_v6 = vld [vmem:[%s4561_s28 + $0x378] sm:$0xff]  ;;  %v2969_v9 = vpack.c.bf16 %v532_v1, %v530_v0  ;;  %v3481_v10 = vpack.c.bf16 %v1626_v4, %v1624_v2  ;;  %v555_v1 = vld [vmem:[%s4561_s28 + $0x408] sm:$0xff] }
 0x10d   : > { %v2971_v11 = vpack.c.bf16 %v537_v6, %v535_v5  ;;  %v1646_v0 = vld [vmem:[%s4572_s26 + $0x3f0] sm:$0xff]  ;;  %v1651_v4 = vld [vmem:[%s4572_s26 + $0x418] sm:$0xff]  ;;  %v1665_v53 = vld [vmem:[%s4572_s26 + $0x488] sm:$0xff] }
 0x10e   : > { %2950 = vmatpush1.bf16.msra.mxu0 %v2949_v12  ;;  %v534_v12 = vld [vmem:[%s4561_s28 + $0x360] sm:$0xff]  ;;  %v557_v2 = vld [vmem:[%s4561_s28 + $0x418] sm:$0xff] }
 0x10f   : > { %3462 = vmatpush1.bf16.msra.mxu1 %v3461_v14  ;;  %2952 = vmatprep.subr.bf16.mxu0 %v2951_v15  ;;  %v1628_v14 = vld [vmem:[%s4572_s26 + $0x360] sm:$0xff]  ;;  %v3483_v15 = vpack.c.bf16 %v1631_v8, %v1629_v7  ;;  %v2973_v21 = vpack.c.bf16 %v536_v13, %v534_v12  ;;  %v2991_v7 = vpack.c.bf16 %v557_v2, %v555_v1  ;;  %v1650_v12 = vld [vmem:[%s4572_s26 + $0x410] sm:$0xff]  ;;  %v1669_v1 = vld [vmem:[%s4572_s26 + $0x4a8] sm:$0xff] }
 0x110   : > { %3464 = vmatprep.subr.bf16.mxu1 %v3463_v19  ;;  %v1633_v19 = vld [vmem:[%s4572_s26 + $0x388] sm:$0xff]  ;;  %v3485_v22 = vpack.c.bf16 %v1630_v16, %v1628_v14  ;;  %v554_v8 = vld [vmem:[%s4561_s28 + $0x400] sm:$0xff]  ;;  %v561_v14 = vld [vmem:[%s4561_s28 + $0x438] sm:$0xff] }
 0x111   : > { %v559_v13 = vld [vmem:[%s4561_s28 + $0x428] sm:$0xff]  ;;  %v1655_v16 = vld [vmem:[%s4572_s26 + $0x438] sm:$0xff] }
 0x112   : > { %2954 = vmatpush1.bf16.msra.mxu0 %v2953_v25  ;;  %v540_v25 = vld [vmem:[%s4561_s28 + $0x390] sm:$0xff]  ;;  %v1671_v2 = vld [vmem:[%s4572_s26 + $0x4b8] sm:$0xff] }
 0x113   : > { %3466 = vmatpush1.bf16.msra.mxu1 %v3465_v26  ;;  %2956 = vmatprep.subr.bf16.mxu0 %v2955_v27  ;;  %v1632_v26 = vld [vmem:[%s4572_s26 + $0x380] sm:$0xff]  ;;  %v3487_v27 = vpack.c.bf16 %v1635_v20, %v1633_v19  ;;  %v2977_v33 = vpack.c.bf16 %v540_v25, %v538_v24  ;;  %v2995_v20 = vpack.c.bf16 %v561_v14, %v559_v13  ;;  %v1654_v25 = vld [vmem:[%s4572_s26 + $0x430] sm:$0xff]  ;;  %v1673_v13 = vld [vmem:[%s4572_s26 + $0x4c8] sm:$0xff] }
 0x114   : > { %3468 = vmatprep.subr.bf16.mxu1 %v3467_v31  ;;  %v1637_v31 = vld [vmem:[%s4572_s26 + $0x3a8] sm:$0xff]  ;;  %v3489_v34 = vpack.c.bf16 %v1634_v28, %v1632_v26  ;;  %v1675_v14 = vld [vmem:[%s4572_s26 + $0x4d8] sm:$0xff] }
 0x115   : > { %v563_v26 = vld [vmem:[%s4561_s28 + $0x448] sm:$0xff] }
 0x116   : > { %2958 = vmatpush1.bf16.msra.mxu0 %v2957_v37  ;;  %v544_v37 = vld [vmem:[%s4561_s28 + $0x3b0] sm:$0xff] }
 0x117   : > { %3470 = vmatpush1.bf16.msra.mxu1 %v3469_v38  ;;  %2960 = vmatprep.subr.bf16.mxu0 %v2959_v39  ;;  %v1636_v38 = vld [vmem:[%s4572_s26 + $0x3a0] sm:$0xff]  ;;  %v3491_v39 = vpack.c.bf16 %v1639_v32, %v1637_v31  ;;  %v2981_v45 = vpack.c.bf16 %v544_v37, %v542_v36  ;;  %v1657_v28 = vld [vmem:[%s4572_s26 + $0x448] sm:$0xff] }
 0x118   : > { %3472 = vmatprep.subr.bf16.mxu1 %v3471_v43  ;;  %v1641_v43 = vld [vmem:[%s4572_s26 + $0x3c8] sm:$0xff]  ;;  %v3493_v46 = vpack.c.bf16 %v1638_v40, %v1636_v38  ;;  %v1656_v36 = vld [vmem:[%s4572_s26 + $0x440] sm:$0xff]  ;;  %v3511_v37 = vpack.c.bf16 %v1659_v29, %v1657_v28  ;;  %v1658_v38 = vld [vmem:[%s4572_s26 + $0x450] sm:$0xff] }
 0x119   : > { %v569_v40 = vld [vmem:[%s4561_s28 + $0x478] sm:$0xff] }
 0x11a   : > { %2962 = vmatpush1.bf16.msra.mxu0 %v2961_v49  ;;  %v548_v49 = vld [vmem:[%s4561_s28 + $0x3d0] sm:$0xff] }
 0x11b   : > { %3474 = vmatpush1.bf16.msra.mxu1 %v3473_v50  ;;  %2964 = vmatprep.subr.bf16.mxu0 %v2963_v51  ;;  %v1640_v50 = vld [vmem:[%s4572_s26 + $0x3c0] sm:$0xff]  ;;  %v3495_v51 = vpack.c.bf16 %v1643_v44, %v1641_v43  ;;  %v2985_v57 = vpack.c.bf16 %v548_v49, %v546_v48  ;;  %v3513_v44 = vpack.c.bf16 %v1658_v38, %v1656_v36  ;;  %v589_v36 = vld [vmem:[%s4561_s28 + $0x518] sm:$0xff] }
 0x11c   : > { %3476 = vmatprep.subr.bf16.mxu1 %v3475_v55  ;;  %v1645_v55 = vld [vmem:[%s4572_s26 + $0x3e8] sm:$0xff]  ;;  %v3497_v58 = vpack.c.bf16 %v1642_v52, %v1640_v50  ;;  %v1660_v48 = vld [vmem:[%s4572_s26 + $0x460] sm:$0xff]  ;;  %v3515_v49 = vpack.c.bf16 %v1663_v42, %v1661_v41  ;;  %v1662_v50 = vld [vmem:[%s4572_s26 + $0x470] sm:$0xff] }
 0x11d   : > { %v573_v52 = vld [vmem:[%s4561_s28 + $0x498] sm:$0xff]  ;;  %v586_v42 = vld [vmem:[%s4561_s28 + $0x500] sm:$0xff] }
 0x11e   : > { %2966 = vmatpush1.bf16.msra.mxu0 %v2965_v61  ;;  %v552_v61 = vld [vmem:[%s4561_s28 + $0x3f0] sm:$0xff]  ;;  %v1683_v38 = vld [vmem:[%s4572_s26 + $0x518] sm:$0xff] }
 0x11f   : > { %3478 = vmatpush1.bf16.msra.mxu1 %v3477_v62  ;;  %2968 = vmatprep.subr.bf16.mxu0 %v2967_v63  ;;  %v1644_v62 = vld [vmem:[%s4572_s26 + $0x3e0] sm:$0xff]  ;;  %v3499_v63 = vpack.c.bf16 %v1647_v56, %v1645_v55  ;;  %v2989_v5 = vpack.c.bf16 %v552_v61, %v550_v60  ;;  %v3517_v56 = vpack.c.bf16 %v1662_v50, %v1660_v48  ;;  %v593_v48 = vld [vmem:[%s4561_s28 + $0x538] sm:$0xff] }
 0x120   : > { %3480 = vmatprep.subr.bf16.mxu1 %v3479_v3  ;;  %v1649_v3 = vld [vmem:[%s4572_s26 + $0x408] sm:$0xff]  ;;  %v3501_v6 = vpack.c.bf16 %v1646_v0, %v1644_v62  ;;  %v1664_v60 = vld [vmem:[%s4572_s26 + $0x480] sm:$0xff]  ;;  %v3519_v61 = vpack.c.bf16 %v1667_v54, %v1665_v53  ;;  %v1666_v62 = vld [vmem:[%s4572_s26 + $0x490] sm:$0xff] }
 0x121   : > { %v577_v0 = vld [vmem:[%s4561_s28 + $0x4b8] sm:$0xff]  ;;  %v590_v54 = vld [vmem:[%s4561_s28 + $0x520] sm:$0xff] }
 0x122   : > { %2970 = vmatpush1.bf16.msra.mxu0 %v2969_v9  ;;  %v556_v9 = vld [vmem:[%s4561_s28 + $0x410] sm:$0xff]  ;;  %v1687_v50 = vld [vmem:[%s4572_s26 + $0x538] sm:$0xff] }
 0x123   : > { %3482 = vmatpush1.bf16.msra.mxu1 %v3481_v10  ;;  %2972 = vmatprep.subr.bf16.mxu0 %v2971_v11  ;;  %v1648_v10 = vld [vmem:[%s4572_s26 + $0x400] sm:$0xff]  ;;  %v3503_v11 = vpack.c.bf16 %v1651_v4, %v1649_v3  ;;  %v2993_v18 = vpack.c.bf16 %v556_v9, %v554_v8  ;;  %v3521_v4 = vpack.c.bf16 %v1666_v62, %v1664_v60  ;;  %v597_v60 = vld [vmem:[%s4561_s28 + $0x558] sm:$0xff] }
 0x124   : > { %3484 = vmatprep.subr.bf16.mxu1 %v3483_v15  ;;  %v1653_v15 = vld [vmem:[%s4572_s26 + $0x428] sm:$0xff]  ;;  %v3505_v19 = vpack.c.bf16 %v1650_v12, %v1648_v10  ;;  %v1668_v8 = vld [vmem:[%s4572_s26 + $0x4a0] sm:$0xff]  ;;  %v3523_v9 = vpack.c.bf16 %v1671_v2, %v1669_v1  ;;  %v1670_v10 = vld [vmem:[%s4572_s26 + $0x4b0] sm:$0xff] }
 0x125   : > { %v3507_v24 = vpack.c.bf16 %v1655_v16, %v1653_v15  ;;  %v581_v12 = vld [vmem:[%s4561_s28 + $0x4d8] sm:$0xff]  ;;  %v3525_v16 = vpack.c.bf16 %v1670_v10, %v1668_v8  ;;  %v594_v2 = vld [vmem:[%s4561_s28 + $0x540] sm:$0xff] }
 0x126   : > { %2974 = vmatpush1.bf16.msra.mxu0 %v2973_v21  ;;  %v558_v21 = vld [vmem:[%s4561_s28 + $0x420] sm:$0xff]  ;;  %v601_v8 = vld [vmem:[%s4561_s28 + $0x578] sm:$0xff] }
 0x127   : > { %3486 = vmatpush1.bf16.msra.mxu1 %v3485_v22  ;;  %2976 = vmatprep.subr.bf16.mxu0 %v2975_v23  ;;  %v560_v22 = vld [vmem:[%s4561_s28 + $0x430] sm:$0xff]  ;;  %v1652_v23 = vld [vmem:[%s4572_s26 + $0x420] sm:$0xff]  ;;  %v1691_v62 = vld [vmem:[%s4572_s26 + $0x558] sm:$0xff] }
 0x128   : > { %3488 = vmatprep.subr.bf16.mxu1 %v3487_v27  ;;  %v565_v27 = vld [vmem:[%s4561_s28 + $0x458] sm:$0xff]  ;;  %v2997_v31 = vpack.c.bf16 %v560_v22, %v558_v21  ;;  %v3509_v32 = vpack.c.bf16 %v1654_v25, %v1652_v23  ;;  %v3527_v21 = vpack.c.bf16 %v1675_v14, %v1673_v13  ;;  %v583_v23 = vld [vmem:[%s4561_s28 + $0x4e8] sm:$0xff]  ;;  %v598_v14 = vld [vmem:[%s4561_s28 + $0x560] sm:$0xff] }
 0x129   : > { %v1674_v22 = vld [vmem:[%s4572_s26 + $0x4d0] sm:$0xff]  ;;  %v1677_v25 = vld [vmem:[%s4572_s26 + $0x4e8] sm:$0xff]  ;;  %v1695_v10 = vld [vmem:[%s4572_s26 + $0x578] sm:$0xff] }
 0x12a   : > { %2978 = vmatpush1.bf16.msra.mxu0 %v2977_v33  ;;  %v2999_v33 = vpack.c.bf16 %v565_v27, %v563_v26  ;;  %v1679_v26 = vld [vmem:[%s4572_s26 + $0x4f8] sm:$0xff] }
 0x12b   : > { %3490 = vmatpush1.bf16.msra.mxu1 %v3489_v34  ;;  %2980 = vmatprep.subr.bf16.mxu0 %v2979_v35  ;;  %v562_v34 = vld [vmem:[%s4561_s28 + $0x440] sm:$0xff]  ;;  %v564_v35 = vld [vmem:[%s4561_s28 + $0x450] sm:$0xff] }
 0x12c   : > { %3492 = vmatprep.subr.bf16.mxu1 %v3491_v39  ;;  %v567_v39 = vld [vmem:[%s4561_s28 + $0x468] sm:$0xff]  ;;  %v3001_v43 = vpack.c.bf16 %v564_v35, %v562_v34  ;;  %v1678_v34 = vld [vmem:[%s4572_s26 + $0x4f0] sm:$0xff] }
 0x12d   : > { %v587_v35 = vld [vmem:[%s4561_s28 + $0x508] sm:$0xff] }
 0x12e   : > { %2982 = vmatpush1.bf16.msra.mxu0 %v2981_v45  ;;  %v3003_v45 = vpack.c.bf16 %v569_v40, %v567_v39  ;;  %v3023_v41 = vpack.c.bf16 %v589_v36, %v587_v35 }
 0x12f   : > { %3494 = vmatpush1.bf16.msra.mxu1 %v3493_v46  ;;  %2984 = vmatprep.subr.bf16.mxu0 %v2983_v47  ;;  %v566_v46 = vld [vmem:[%s4561_s28 + $0x460] sm:$0xff]  ;;  %v568_v47 = vld [vmem:[%s4561_s28 + $0x470] sm:$0xff] }
 0x130   : > { %3496 = vmatprep.subr.bf16.mxu1 %v3495_v51  ;;  %v571_v51 = vld [vmem:[%s4561_s28 + $0x488] sm:$0xff]  ;;  %v3005_v55 = vpack.c.bf16 %v568_v47, %v566_v46  ;;  %v1682_v46 = vld [vmem:[%s4572_s26 + $0x510] sm:$0xff] }
 0x131   : > { %v591_v47 = vld [vmem:[%s4561_s28 + $0x528] sm:$0xff] }
 0x132   : > { %2986 = vmatpush1.bf16.msra.mxu0 %v2985_v57  ;;  %v3007_v57 = vpack.c.bf16 %v573_v52, %v571_v51  ;;  %v3027_v53 = vpack.c.bf16 %v593_v48, %v591_v47 }
 0x133   : > { %3498 = vmatpush1.bf16.msra.mxu1 %v3497_v58  ;;  %2988 = vmatprep.subr.bf16.mxu0 %v2987_v59  ;;  %v570_v58 = vld [vmem:[%s4561_s28 + $0x480] sm:$0xff]  ;;  %v572_v59 = vld [vmem:[%s4561_s28 + $0x490] sm:$0xff] }
 0x134   : > { %3500 = vmatprep.subr.bf16.mxu1 %v3499_v63  ;;  %v575_v63 = vld [vmem:[%s4561_s28 + $0x4a8] sm:$0xff]  ;;  %v3009_v3 = vpack.c.bf16 %v572_v59, %v570_v58  ;;  %v1686_v58 = vld [vmem:[%s4572_s26 + $0x530] sm:$0xff] }
 0x135   : > { %v595_v59 = vld [vmem:[%s4561_s28 + $0x548] sm:$0xff] }
 0x136   : > { %2990 = vmatpush1.bf16.msra.mxu0 %v2989_v5  ;;  %v3011_v5 = vpack.c.bf16 %v577_v0, %v575_v63  ;;  %v3031_v1 = vpack.c.bf16 %v597_v60, %v595_v59 }
 0x137   : > { %3502 = vmatpush1.bf16.msra.mxu1 %v3501_v6  ;;  %2992 = vmatprep.subr.bf16.mxu0 %v2991_v7  ;;  %v574_v6 = vld [vmem:[%s4561_s28 + $0x4a0] sm:$0xff]  ;;  %v576_v7 = vld [vmem:[%s4561_s28 + $0x4b0] sm:$0xff] }
 0x138   : > { %3504 = vmatprep.subr.bf16.mxu1 %v3503_v11  ;;  %v579_v11 = vld [vmem:[%s4561_s28 + $0x4c8] sm:$0xff]  ;;  %v3013_v15 = vpack.c.bf16 %v576_v7, %v574_v6  ;;  %v1690_v6 = vld [vmem:[%s4572_s26 + $0x550] sm:$0xff] }
 0x139   : > { %1086 = vmatmul.mubr.f32.vlgmr.msra.gmra.mrb[0].mxu0 %v412_v17  ;;  %v599_v7 = vld [vmem:[%s4561_s28 + $0x568] sm:$0xff] }
 0x13a   : > { %2994 = vmatpush1.bf16.msra.mxu0 %v2993_v18  ;;  %2180 = vmatmul.mubr.f32.vlgmr.msra.gmra.mrb[0].mxu1 %v412_v17  ;;  %v3015_v17 = vpack.c.bf16 %v581_v12, %v579_v11  ;;  %v578_v18 = vld [vmem:[%s4561_s28 + $0x4c0] sm:$0xff]  ;;  %v3035_v13 = vpack.c.bf16 %v601_v8, %v599_v7 }
 0x13b   : > { %3506 = vmatpush1.bf16.msra.mxu1 %v3505_v19  ;;  %2996 = vmatprep.subr.bf16.mxu0 %v2995_v20  ;;  %v580_v19 = vld [vmem:[%s4561_s28 + $0x4d0] sm:$0xff]  ;;  %v1672_v20 = vld [vmem:[%s4572_s26 + $0x4c0] sm:$0xff] }
 0x13c   : > { %3508 = vmatprep.subr.bf16.mxu1 %v3507_v24  ;;  %1156 = vmatprep.mubr.f32.mxu0 %v415_v30  ;;  %v585_v24 = vld [vmem:[%s4561_s28 + $0x4f8] sm:$0xff]  ;;  %v3017_v27 = vpack.c.bf16 %v580_v19, %v578_v18  ;;  %v3529_v28 = vpack.c.bf16 %v1674_v22, %v1672_v20  ;;  %v603_v19 = vld [vmem:[%s4561_s28 + $0x588] sm:$0xff] }
 0x13d   : > { %2250 = vmatprep.mubr.f32.mxu1 %v415_v30  ;;  %v3019_v29 = vpack.c.bf16 %v585_v24, %v583_v23  ;;  %v582_v30 = vld [vmem:[%s4561_s28 + $0x4e0] sm:$0xff]  ;;  %v1694_v18 = vld [vmem:[%s4572_s26 + $0x570] sm:$0xff] }
 0x13e   : > { %2998 = vmatpush1.bf16.msra.mxu0 %v2997_v31  ;;  %v584_v31 = vld [vmem:[%s4561_s28 + $0x4f0] sm:$0xff]  ;;  %v605_v20 = vld [vmem:[%s4561_s28 + $0x598] sm:$0xff] }
 0x13f   : > { %3510 = vmatpush1.bf16.msra.mxu1 %v3509_v32  ;;  %3000 = vmatprep.subr.bf16.mxu0 %v2999_v33  ;;  %v1676_v32 = vld [vmem:[%s4572_s26 + $0x4e0] sm:$0xff]  ;;  %v3531_v33 = vpack.c.bf16 %v1679_v26, %v1677_v25  ;;  %v3021_v39 = vpack.c.bf16 %v584_v31, %v582_v30  ;;  %v1699_v22 = vld [vmem:[%s4572_s26 + $0x598] sm:$0xff]  ;;  %v3039_v25 = vpack.c.bf16 %v605_v20, %v603_v19  ;;  %v1698_v30 = vld [vmem:[%s4572_s26 + $0x590] sm:$0xff] }
 0x140   : > { %3512 = vmatprep.subr.bf16.mxu1 %v3511_v37  ;;  %v1681_v37 = vld [vmem:[%s4572_s26 + $0x508] sm:$0xff]  ;;  %v3533_v40 = vpack.c.bf16 %v1678_v34, %v1676_v32  ;;  %v602_v26 = vld [vmem:[%s4561_s28 + $0x580] sm:$0xff]  ;;  %v609_v32 = vld [vmem:[%s4561_s28 + $0x5b8] sm:$0xff] }
 0x141   : > { %v607_v31 = vld [vmem:[%s4561_s28 + $0x5a8] sm:$0xff]  ;;  %v1703_v34 = vld [vmem:[%s4572_s26 + $0x5b8] sm:$0xff] }
 0x142   : > { %3002 = vmatpush1.bf16.msra.mxu0 %v3001_v43  ;;  %v588_v43 = vld [vmem:[%s4561_s28 + $0x510] sm:$0xff]  ;;  %v414_v19 = vld [vmem:[#allocation2 + $0x20] sm:$0xff] }
 0x143   : > { %3514 = vmatpush1.bf16.msra.mxu1 %v3513_v44  ;;  %3004 = vmatprep.subr.bf16.mxu0 %v3003_v45  ;;  %v1680_v44 = vld [vmem:[%s4572_s26 + $0x500] sm:$0xff]  ;;  %v3535_v45 = vpack.c.bf16 %v1683_v38, %v1681_v37  ;;  %v3025_v51 = vpack.c.bf16 %v588_v43, %v586_v42  ;;  %v3043_v37 = vpack.c.bf16 %v609_v32, %v607_v31  ;;  %v1702_v42 = vld [vmem:[%s4572_s26 + $0x5b0] sm:$0xff]  ;;  %v1723_v31 = vld [vmem:[%s4572_s26 + $0x658] sm:$0xff] }
 0x144   : > { %3516 = vmatprep.subr.bf16.mxu1 %v3515_v49  ;;  %v1685_v49 = vld [vmem:[%s4572_s26 + $0x528] sm:$0xff]  ;;  %v3537_v52 = vpack.c.bf16 %v1682_v46, %v1680_v44  ;;  %v606_v38 = vld [vmem:[%s4561_s28 + $0x5a0] sm:$0xff]  ;;  %v613_v44 = vld [vmem:[%s4561_s28 + $0x5d8] sm:$0xff] }
 0x145   : > { %v611_v43 = vld [vmem:[%s4561_s28 + $0x5c8] sm:$0xff]  ;;  %v1707_v46 = vld [vmem:[%s4572_s26 + $0x5d8] sm:$0xff] }
 0x146   : > { %3006 = vmatpush1.bf16.msra.mxu0 %v3005_v55  ;;  %v592_v55 = vld [vmem:[%s4561_s28 + $0x530] sm:$0xff]  ;;  %v417_v32 = vld [vmem:[#allocation2 + $0x38] sm:$0xff] }
 0x147   : > { %3518 = vmatpush1.bf16.msra.mxu1 %v3517_v56  ;;  %3008 = vmatprep.subr.bf16.mxu0 %v3007_v57  ;;  %v1684_v56 = vld [vmem:[%s4572_s26 + $0x520] sm:$0xff]  ;;  %v3539_v57 = vpack.c.bf16 %v1687_v50, %v1685_v49  ;;  %v3029_v63 = vpack.c.bf16 %v592_v55, %v590_v54  ;;  %v3047_v49 = vpack.c.bf16 %v613_v44, %v611_v43  ;;  %v1706_v54 = vld [vmem:[%s4572_s26 + $0x5d0] sm:$0xff]  ;;  %v1725_v43 = vld [vmem:[%s4572_s26 + $0x668] sm:$0xff] }
 0x148   : > { %3520 = vmatprep.subr.bf16.mxu1 %v3519_v61  ;;  %v1689_v61 = vld [vmem:[%s4572_s26 + $0x548] sm:$0xff]  ;;  %v3541_v0 = vpack.c.bf16 %v1686_v58, %v1684_v56  ;;  %v610_v50 = vld [vmem:[%s4561_s28 + $0x5c0] sm:$0xff]  ;;  %v617_v56 = vld [vmem:[%s4561_s28 + $0x5f8] sm:$0xff] }
 0x149   : > { %v615_v55 = vld [vmem:[%s4561_s28 + $0x5e8] sm:$0xff]  ;;  %v1711_v58 = vld [vmem:[%s4572_s26 + $0x5f8] sm:$0xff] }
 0x14a   : > { %3010 = vmatpush1.bf16.msra.mxu0 %v3009_v3  ;;  %v596_v3 = vld [vmem:[%s4561_s28 + $0x550] sm:$0xff]  ;;  %v1727_v44 = vld [vmem:[%s4572_s26 + $0x678] sm:$0xff] }
 0x14b   : > { %3522 = vmatpush1.bf16.msra.mxu1 %v3521_v4  ;;  %3012 = vmatprep.subr.bf16.mxu0 %v3011_v5  ;;  %v1688_v4 = vld [vmem:[%s4572_s26 + $0x540] sm:$0xff]  ;;  %v3543_v5 = vpack.c.bf16 %v1691_v62, %v1689_v61  ;;  %v3033_v11 = vpack.c.bf16 %v596_v3, %v594_v2  ;;  %v3051_v61 = vpack.c.bf16 %v617_v56, %v615_v55  ;;  %v1710_v2 = vld [vmem:[%s4572_s26 + $0x5f0] sm:$0xff]  ;;  %v1729_v55 = vld [vmem:[%s4572_s26 + $0x688] sm:$0xff] }
 0x14c   : > { %3524 = vmatprep.subr.bf16.mxu1 %v3523_v9  ;;  %v1693_v9 = vld [vmem:[%s4572_s26 + $0x568] sm:$0xff]  ;;  %v3545_v12 = vpack.c.bf16 %v1690_v6, %v1688_v4  ;;  %v614_v62 = vld [vmem:[%s4561_s28 + $0x5e0] sm:$0xff]  ;;  %v621_v4 = vld [vmem:[%s4561_s28 + $0x618] sm:$0xff] }
 0x14d   : > { %v619_v3 = vld [vmem:[%s4561_s28 + $0x608] sm:$0xff]  ;;  %v1715_v6 = vld [vmem:[%s4572_s26 + $0x618] sm:$0xff] }
 0x14e   : > { %3014 = vmatpush1.bf16.msra.mxu0 %v3013_v15  ;;  %v600_v15 = vld [vmem:[%s4561_s28 + $0x570] sm:$0xff]  ;;  %v1731_v56 = vld [vmem:[%s4572_s26 + $0x698] sm:$0xff] }
 0x14f   : > { %3526 = vmatpush1.bf16.msra.mxu1 %v3525_v16  ;;  %3016 = vmatprep.subr.bf16.mxu0 %v3015_v17  ;;  %v1692_v16 = vld [vmem:[%s4572_s26 + $0x560] sm:$0xff]  ;;  %v3547_v17 = vpack.c.bf16 %v1695_v10, %v1693_v9  ;;  %v3037_v23 = vpack.c.bf16 %v600_v15, %v598_v14  ;;  %v3055_v9 = vpack.c.bf16 %v621_v4, %v619_v3  ;;  %v1714_v14 = vld [vmem:[%s4572_s26 + $0x610] sm:$0xff]  ;;  %v1733_v3 = vld [vmem:[%s4572_s26 + $0x6a8] sm:$0xff] }
 0x150   : > { %3528 = vmatprep.subr.bf16.mxu1 %v3527_v21  ;;  %v1697_v21 = vld [vmem:[%s4572_s26 + $0x588] sm:$0xff]  ;;  %v3549_v24 = vpack.c.bf16 %v1694_v18, %v1692_v16  ;;  %v618_v10 = vld [vmem:[%s4561_s28 + $0x600] sm:$0xff]  ;;  %v625_v16 = vld [vmem:[%s4561_s28 + $0x638] sm:$0xff] }
 0x151   : > { %v623_v15 = vld [vmem:[%s4561_s28 + $0x628] sm:$0xff]  ;;  %v1719_v18 = vld [vmem:[%s4572_s26 + $0x638] sm:$0xff] }
 0x152   : > { %3018 = vmatpush1.bf16.msra.mxu0 %v3017_v27  ;;  %v604_v27 = vld [vmem:[%s4561_s28 + $0x590] sm:$0xff]  ;;  %v1735_v4 = vld [vmem:[%s4572_s26 + $0x6b8] sm:$0xff] }
 0x153   : > { %3530 = vmatpush1.bf16.msra.mxu1 %v3529_v28  ;;  %3020 = vmatprep.subr.bf16.mxu0 %v3019_v29  ;;  %v1696_v28 = vld [vmem:[%s4572_s26 + $0x580] sm:$0xff]  ;;  %v3551_v29 = vpack.c.bf16 %v1699_v22, %v1697_v21  ;;  %v3041_v35 = vpack.c.bf16 %v604_v27, %v602_v26  ;;  %v3059_v22 = vpack.c.bf16 %v625_v16, %v623_v15  ;;  %v1718_v27 = vld [vmem:[%s4572_s26 + $0x630] sm:$0xff]  ;;  %v1737_v15 = vld [vmem:[%s4572_s26 + $0x6c8] sm:$0xff] }
 0x154   : > { %3532 = vmatprep.subr.bf16.mxu1 %v3531_v33  ;;  %v1701_v33 = vld [vmem:[%s4572_s26 + $0x5a8] sm:$0xff]  ;;  %v3553_v36 = vpack.c.bf16 %v1698_v30, %v1696_v28  ;;  %v1739_v16 = vld [vmem:[%s4572_s26 + $0x6d8] sm:$0xff] }
 0x155   : > { %v627_v28 = vld [vmem:[%s4561_s28 + $0x648] sm:$0xff] }
 0x156   : > { %3022 = vmatpush1.bf16.msra.mxu0 %v3021_v39  ;;  %v608_v39 = vld [vmem:[%s4561_s28 + $0x5b0] sm:$0xff] }
 0x157   : > { %3534 = vmatpush1.bf16.msra.mxu1 %v3533_v40  ;;  %3024 = vmatprep.subr.bf16.mxu0 %v3023_v41  ;;  %v1700_v40 = vld [vmem:[%s4572_s26 + $0x5a0] sm:$0xff]  ;;  %v3555_v41 = vpack.c.bf16 %v1703_v34, %v1701_v33  ;;  %v3045_v47 = vpack.c.bf16 %v608_v39, %v606_v38  ;;  %v1721_v30 = vld [vmem:[%s4572_s26 + $0x648] sm:$0xff] }
 0x158   : > { %3536 = vmatprep.subr.bf16.mxu1 %v3535_v45  ;;  %v1705_v45 = vld [vmem:[%s4572_s26 + $0x5c8] sm:$0xff]  ;;  %v3557_v48 = vpack.c.bf16 %v1702_v42, %v1700_v40  ;;  %v1720_v38 = vld [vmem:[%s4572_s26 + $0x640] sm:$0xff]  ;;  %v3575_v39 = vpack.c.bf16 %v1723_v31, %v1721_v30  ;;  %v1722_v40 = vld [vmem:[%s4572_s26 + $0x650] sm:$0xff] }
 0x159   : > { %v633_v42 = vld [vmem:[%s4561_s28 + $0x678] sm:$0xff] }
 0x15a   : > { %3026 = vmatpush1.bf16.msra.mxu0 %v3025_v51  ;;  %v612_v51 = vld [vmem:[%s4561_s28 + $0x5d0] sm:$0xff] }
 0x15b   : > { %3538 = vmatpush1.bf16.msra.mxu1 %v3537_v52  ;;  %3028 = vmatprep.subr.bf16.mxu0 %v3027_v53  ;;  %v1704_v52 = vld [vmem:[%s4572_s26 + $0x5c0] sm:$0xff]  ;;  %v3559_v53 = vpack.c.bf16 %v1707_v46, %v1705_v45  ;;  %v3049_v59 = vpack.c.bf16 %v612_v51, %v610_v50  ;;  %v3577_v46 = vpack.c.bf16 %v1722_v40, %v1720_v38  ;;  %v653_v38 = vld [vmem:[%s4561_s28 + $0x718] sm:$0xff] }
 0x15c   : > { %3540 = vmatprep.subr.bf16.mxu1 %v3539_v57  ;;  %v1709_v57 = vld [vmem:[%s4572_s26 + $0x5e8] sm:$0xff]  ;;  %v3561_v60 = vpack.c.bf16 %v1706_v54, %v1704_v52  ;;  %v1724_v50 = vld [vmem:[%s4572_s26 + $0x660] sm:$0xff]  ;;  %v3579_v51 = vpack.c.bf16 %v1727_v44, %v1725_v43  ;;  %v1726_v52 = vld [vmem:[%s4572_s26 + $0x670] sm:$0xff] }
 0x15d   : > { %v637_v54 = vld [vmem:[%s4561_s28 + $0x698] sm:$0xff]  ;;  %v650_v44 = vld [vmem:[%s4561_s28 + $0x700] sm:$0xff] }
 0x15e   : > { %3030 = vmatpush1.bf16.msra.mxu0 %v3029_v63  ;;  %v616_v63 = vld [vmem:[%s4561_s28 + $0x5f0] sm:$0xff]  ;;  %v1747_v40 = vld [vmem:[%s4572_s26 + $0x718] sm:$0xff] }
 0x15f   : > { %3542 = vmatpush1.bf16.msra.mxu1 %v3541_v0  ;;  %3032 = vmatprep.subr.bf16.mxu0 %v3031_v1  ;;  %v1708_v0 = vld [vmem:[%s4572_s26 + $0x5e0] sm:$0xff]  ;;  %v3563_v1 = vpack.c.bf16 %v1711_v58, %v1709_v57  ;;  %v3053_v7 = vpack.c.bf16 %v616_v63, %v614_v62  ;;  %v3581_v58 = vpack.c.bf16 %v1726_v52, %v1724_v50  ;;  %v657_v50 = vld [vmem:[%s4561_s28 + $0x738] sm:$0xff] }
 0x160   : > { %3544 = vmatprep.subr.bf16.mxu1 %v3543_v5  ;;  %v1713_v5 = vld [vmem:[%s4572_s26 + $0x608] sm:$0xff]  ;;  %v3565_v8 = vpack.c.bf16 %v1710_v2, %v1708_v0  ;;  %v1728_v62 = vld [vmem:[%s4572_s26 + $0x680] sm:$0xff]  ;;  %v3583_v63 = vpack.c.bf16 %v1731_v56, %v1729_v55  ;;  %v1730_v0 = vld [vmem:[%s4572_s26 + $0x690] sm:$0xff] }
 0x161   : > { %v641_v2 = vld [vmem:[%s4561_s28 + $0x6b8] sm:$0xff]  ;;  %v654_v56 = vld [vmem:[%s4561_s28 + $0x720] sm:$0xff] }
 0x162   : > { %3034 = vmatpush1.bf16.msra.mxu0 %v3033_v11  ;;  %v620_v11 = vld [vmem:[%s4561_s28 + $0x610] sm:$0xff]  ;;  %v1751_v52 = vld [vmem:[%s4572_s26 + $0x738] sm:$0xff] }
 0x163   : > { %3546 = vmatpush1.bf16.msra.mxu1 %v3545_v12  ;;  %3036 = vmatprep.subr.bf16.mxu0 %v3035_v13  ;;  %v1712_v12 = vld [vmem:[%s4572_s26 + $0x600] sm:$0xff]  ;;  %v3567_v13 = vpack.c.bf16 %v1715_v6, %v1713_v5  ;;  %v3057_v20 = vpack.c.bf16 %v620_v11, %v618_v10  ;;  %v3585_v6 = vpack.c.bf16 %v1730_v0, %v1728_v62  ;;  %v661_v62 = vld [vmem:[%s4561_s28 + $0x758] sm:$0xff] }
 0x164   : > { %3548 = vmatprep.subr.bf16.mxu1 %v3547_v17  ;;  %v1717_v17 = vld [vmem:[%s4572_s26 + $0x628] sm:$0xff]  ;;  %v3569_v21 = vpack.c.bf16 %v1714_v14, %v1712_v12  ;;  %v1732_v10 = vld [vmem:[%s4572_s26 + $0x6a0] sm:$0xff]  ;;  %v3587_v11 = vpack.c.bf16 %v1735_v4, %v1733_v3  ;;  %v1734_v12 = vld [vmem:[%s4572_s26 + $0x6b0] sm:$0xff] }
 0x165   : > { %v3571_v26 = vpack.c.bf16 %v1719_v18, %v1717_v17  ;;  %v645_v14 = vld [vmem:[%s4561_s28 + $0x6d8] sm:$0xff]  ;;  %v3589_v18 = vpack.c.bf16 %v1734_v12, %v1732_v10  ;;  %v658_v4 = vld [vmem:[%s4561_s28 + $0x740] sm:$0xff] }
 0x166   : > { %3038 = vmatpush1.bf16.msra.mxu0 %v3037_v23  ;;  %v622_v23 = vld [vmem:[%s4561_s28 + $0x620] sm:$0xff]  ;;  %v665_v10 = vld [vmem:[%s4561_s28 + $0x778] sm:$0xff] }
 0x167   : > { %3550 = vmatpush1.bf16.msra.mxu1 %v3549_v24  ;;  %3040 = vmatprep.subr.bf16.mxu0 %v3039_v25  ;;  %v624_v24 = vld [vmem:[%s4561_s28 + $0x630] sm:$0xff]  ;;  %v1716_v25 = vld [vmem:[%s4572_s26 + $0x620] sm:$0xff]  ;;  %v1755_v0 = vld [vmem:[%s4572_s26 + $0x758] sm:$0xff] }
 0x168   : > { %3552 = vmatprep.subr.bf16.mxu1 %v3551_v29  ;;  %v629_v29 = vld [vmem:[%s4561_s28 + $0x658] sm:$0xff]  ;;  %v3061_v33 = vpack.c.bf16 %v624_v24, %v622_v23  ;;  %v3573_v34 = vpack.c.bf16 %v1718_v27, %v1716_v25  ;;  %v3591_v23 = vpack.c.bf16 %v1739_v16, %v1737_v15  ;;  %v647_v25 = vld [vmem:[%s4561_s28 + $0x6e8] sm:$0xff]  ;;  %v662_v16 = vld [vmem:[%s4561_s28 + $0x760] sm:$0xff] }
 0x169   : > { %v1738_v24 = vld [vmem:[%s4572_s26 + $0x6d0] sm:$0xff]  ;;  %v1741_v27 = vld [vmem:[%s4572_s26 + $0x6e8] sm:$0xff]  ;;  %v1759_v12 = vld [vmem:[%s4572_s26 + $0x778] sm:$0xff] }
 0x16a   : > { %3042 = vmatpush1.bf16.msra.mxu0 %v3041_v35  ;;  %v3063_v35 = vpack.c.bf16 %v629_v29, %v627_v28  ;;  %v1743_v28 = vld [vmem:[%s4572_s26 + $0x6f8] sm:$0xff] }
 0x16b   : > { %3554 = vmatpush1.bf16.msra.mxu1 %v3553_v36  ;;  %3044 = vmatprep.subr.bf16.mxu0 %v3043_v37  ;;  %v626_v36 = vld [vmem:[%s4561_s28 + $0x640] sm:$0xff]  ;;  %v628_v37 = vld [vmem:[%s4561_s28 + $0x650] sm:$0xff] }
 0x16c   : > { %3556 = vmatprep.subr.bf16.mxu1 %v3555_v41  ;;  %v631_v41 = vld [vmem:[%s4561_s28 + $0x668] sm:$0xff]  ;;  %v3065_v45 = vpack.c.bf16 %v628_v37, %v626_v36  ;;  %v1742_v36 = vld [vmem:[%s4572_s26 + $0x6f0] sm:$0xff] }
 0x16d   : > { %v651_v37 = vld [vmem:[%s4561_s28 + $0x708] sm:$0xff] }
 0x16e   : > { %3046 = vmatpush1.bf16.msra.mxu0 %v3045_v47  ;;  %v3067_v47 = vpack.c.bf16 %v633_v42, %v631_v41  ;;  %v3087_v43 = vpack.c.bf16 %v653_v38, %v651_v37 }
 0x16f   : > { %3558 = vmatpush1.bf16.msra.mxu1 %v3557_v48  ;;  %3048 = vmatprep.subr.bf16.mxu0 %v3047_v49  ;;  %v630_v48 = vld [vmem:[%s4561_s28 + $0x660] sm:$0xff]  ;;  %v632_v49 = vld [vmem:[%s4561_s28 + $0x670] sm:$0xff] }
 0x170   : > { %3560 = vmatprep.subr.bf16.mxu1 %v3559_v53  ;;  %v635_v53 = vld [vmem:[%s4561_s28 + $0x688] sm:$0xff]  ;;  %v3069_v57 = vpack.c.bf16 %v632_v49, %v630_v48  ;;  %v1746_v48 = vld [vmem:[%s4572_s26 + $0x710] sm:$0xff] }
 0x171   : > { %v655_v49 = vld [vmem:[%s4561_s28 + $0x728] sm:$0xff] }
 0x172   : > { %3050 = vmatpush1.bf16.msra.mxu0 %v3049_v59  ;;  %v3071_v59 = vpack.c.bf16 %v637_v54, %v635_v53  ;;  %v3091_v55 = vpack.c.bf16 %v657_v50, %v655_v49 }
 0x173   : > { %3562 = vmatpush1.bf16.msra.mxu1 %v3561_v60  ;;  %3052 = vmatprep.subr.bf16.mxu0 %v3051_v61  ;;  %v634_v60 = vld [vmem:[%s4561_s28 + $0x680] sm:$0xff]  ;;  %v636_v61 = vld [vmem:[%s4561_s28 + $0x690] sm:$0xff] }
 0x174   : > { %3564 = vmatprep.subr.bf16.mxu1 %v3563_v1  ;;  %v639_v1 = vld [vmem:[%s4561_s28 + $0x6a8] sm:$0xff]  ;;  %v3073_v5 = vpack.c.bf16 %v636_v61, %v634_v60  ;;  %v1750_v60 = vld [vmem:[%s4572_s26 + $0x730] sm:$0xff] }
 0x175   : > { %v659_v61 = vld [vmem:[%s4561_s28 + $0x748] sm:$0xff] }
 0x176   : > { %3054 = vmatpush1.bf16.msra.mxu0 %v3053_v7  ;;  %v3075_v7 = vpack.c.bf16 %v641_v2, %v639_v1  ;;  %v3095_v3 = vpack.c.bf16 %v661_v62, %v659_v61 }
 0x177   : > { %3566 = vmatpush1.bf16.msra.mxu1 %v3565_v8  ;;  %3056 = vmatprep.subr.bf16.mxu0 %v3055_v9  ;;  %v638_v8 = vld [vmem:[%s4561_s28 + $0x6a0] sm:$0xff]  ;;  %v640_v9 = vld [vmem:[%s4561_s28 + $0x6b0] sm:$0xff] }
 0x178   : > { %3568 = vmatprep.subr.bf16.mxu1 %v3567_v13  ;;  %v643_v13 = vld [vmem:[%s4561_s28 + $0x6c8] sm:$0xff]  ;;  %v3077_v17 = vpack.c.bf16 %v640_v9, %v638_v8  ;;  %v1754_v8 = vld [vmem:[%s4572_s26 + $0x750] sm:$0xff] }
 0x179   : > { %1157 = vmatmul.mubr.f32.vlgmr.msra.gmra.mrb[0].mxu0 %v414_v19  ;;  %v663_v9 = vld [vmem:[%s4561_s28 + $0x768] sm:$0xff] }
 0x17a   : > { %3058 = vmatpush1.bf16.msra.mxu0 %v3057_v20  ;;  %2251 = vmatmul.mubr.f32.vlgmr.msra.gmra.mrb[0].mxu1 %v414_v19  ;;  %v3079_v19 = vpack.c.bf16 %v645_v14, %v643_v13  ;;  %v642_v20 = vld [vmem:[%s4561_s28 + $0x6c0] sm:$0xff]  ;;  %v3099_v15 = vpack.c.bf16 %v665_v10, %v663_v9 }
 0x17b   : > { %3570 = vmatpush1.bf16.msra.mxu1 %v3569_v21  ;;  %3060 = vmatprep.subr.bf16.mxu0 %v3059_v22  ;;  %v644_v21 = vld [vmem:[%s4561_s28 + $0x6d0] sm:$0xff]  ;;  %v1736_v22 = vld [vmem:[%s4572_s26 + $0x6c0] sm:$0xff] }
 0x17c   : > { %3572 = vmatprep.subr.bf16.mxu1 %v3571_v26  ;;  %1227 = vmatprep.mubr.f32.mxu0 %v417_v32  ;;  %v649_v26 = vld [vmem:[%s4561_s28 + $0x6f8] sm:$0xff]  ;;  %v3081_v29 = vpack.c.bf16 %v644_v21, %v642_v20  ;;  %v3593_v30 = vpack.c.bf16 %v1738_v24, %v1736_v22  ;;  %v667_v21 = vld [vmem:[%s4561_s28 + $0x788] sm:$0xff] }
 0x17d   : > { %2321 = vmatprep.mubr.f32.mxu1 %v417_v32  ;;  %v3083_v31 = vpack.c.bf16 %v649_v26, %v647_v25  ;;  %v646_v32 = vld [vmem:[%s4561_s28 + $0x6e0] sm:$0xff]  ;;  %v1758_v20 = vld [vmem:[%s4572_s26 + $0x770] sm:$0xff] }
 0x17e   : > { %3062 = vmatpush1.bf16.msra.mxu0 %v3061_v33  ;;  %v648_v33 = vld [vmem:[%s4561_s28 + $0x6f0] sm:$0xff]  ;;  %v669_v22 = vld [vmem:[%s4561_s28 + $0x798] sm:$0xff] }
 0x17f   : > { %3574 = vmatpush1.bf16.msra.mxu1 %v3573_v34  ;;  %3064 = vmatprep.subr.bf16.mxu0 %v3063_v35  ;;  %v1740_v34 = vld [vmem:[%s4572_s26 + $0x6e0] sm:$0xff]  ;;  %v3595_v35 = vpack.c.bf16 %v1743_v28, %v1741_v27  ;;  %v3085_v41 = vpack.c.bf16 %v648_v33, %v646_v32  ;;  %v1763_v24 = vld [vmem:[%s4572_s26 + $0x798] sm:$0xff]  ;;  %v3103_v27 = vpack.c.bf16 %v669_v22, %v667_v21  ;;  %v1762_v32 = vld [vmem:[%s4572_s26 + $0x790] sm:$0xff] }
 0x180   : > { %3576 = vmatprep.subr.bf16.mxu1 %v3575_v39  ;;  %v1745_v39 = vld [vmem:[%s4572_s26 + $0x708] sm:$0xff]  ;;  %v3597_v42 = vpack.c.bf16 %v1742_v36, %v1740_v34  ;;  %v666_v28 = vld [vmem:[%s4561_s28 + $0x780] sm:$0xff]  ;;  %v673_v34 = vld [vmem:[%s4561_s28 + $0x7b8] sm:$0xff] }
 0x181   : > { %v671_v33 = vld [vmem:[%s4561_s28 + $0x7a8] sm:$0xff]  ;;  %v1767_v36 = vld [vmem:[%s4572_s26 + $0x7b8] sm:$0xff]  ;;  %v416_v21 = vld [vmem:[#allocation2 + $0x30] sm:$0xff] }
 0x182   : > { %3066 = vmatpush1.bf16.msra.mxu0 %v3065_v45  ;;  %v652_v45 = vld [vmem:[%s4561_s28 + $0x710] sm:$0xff] }
 0x183   : > { %3578 = vmatpush1.bf16.msra.mxu1 %v3577_v46  ;;  %3068 = vmatprep.subr.bf16.mxu0 %v3067_v47  ;;  %v1744_v46 = vld [vmem:[%s4572_s26 + $0x700] sm:$0xff]  ;;  %v3599_v47 = vpack.c.bf16 %v1747_v40, %v1745_v39  ;;  %v3089_v53 = vpack.c.bf16 %v652_v45, %v650_v44  ;;  %v3107_v39 = vpack.c.bf16 %v673_v34, %v671_v33  ;;  %v1766_v44 = vld [vmem:[%s4572_s26 + $0x7b0] sm:$0xff]  ;;  %v1787_v33 = vld [vmem:[%s4572_s26 + $0x858] sm:$0xff] }
 0x184   : > { %3580 = vmatprep.subr.bf16.mxu1 %v3579_v51  ;;  %v1749_v51 = vld [vmem:[%s4572_s26 + $0x728] sm:$0xff]  ;;  %v3601_v54 = vpack.c.bf16 %v1746_v48, %v1744_v46  ;;  %v670_v40 = vld [vmem:[%s4561_s28 + $0x7a0] sm:$0xff]  ;;  %v677_v46 = vld [vmem:[%s4561_s28 + $0x7d8] sm:$0xff] }
 0x185   : > { %v675_v45 = vld [vmem:[%s4561_s28 + $0x7c8] sm:$0xff]  ;;  %v1771_v48 = vld [vmem:[%s4572_s26 + $0x7d8] sm:$0xff] }
 0x186   : > { %3070 = vmatpush1.bf16.msra.mxu0 %v3069_v57  ;;  %v656_v57 = vld [vmem:[%s4561_s28 + $0x730] sm:$0xff]  ;;  %v419_v34 = vld [vmem:[#allocation2 + $0x48] sm:$0xff] }
 0x187   : > { %3582 = vmatpush1.bf16.msra.mxu1 %v3581_v58  ;;  %3072 = vmatprep.subr.bf16.mxu0 %v3071_v59  ;;  %v1748_v58 = vld [vmem:[%s4572_s26 + $0x720] sm:$0xff]  ;;  %v3603_v59 = vpack.c.bf16 %v1751_v52, %v1749_v51  ;;  %v3093_v1 = vpack.c.bf16 %v656_v57, %v654_v56  ;;  %v3111_v51 = vpack.c.bf16 %v677_v46, %v675_v45  ;;  %v1770_v56 = vld [vmem:[%s4572_s26 + $0x7d0] sm:$0xff]  ;;  %v1789_v45 = vld [vmem:[%s4572_s26 + $0x868] sm:$0xff] }
 0x188   : > { %3584 = vmatprep.subr.bf16.mxu1 %v3583_v63  ;;  %v1753_v63 = vld [vmem:[%s4572_s26 + $0x748] sm:$0xff]  ;;  %v3605_v2 = vpack.c.bf16 %v1750_v60, %v1748_v58  ;;  %v674_v52 = vld [vmem:[%s4561_s28 + $0x7c0] sm:$0xff]  ;;  %v681_v58 = vld [vmem:[%s4561_s28 + $0x7f8] sm:$0xff] }
 0x189   : > { %v679_v57 = vld [vmem:[%s4561_s28 + $0x7e8] sm:$0xff]  ;;  %v1775_v60 = vld [vmem:[%s4572_s26 + $0x7f8] sm:$0xff] }
 0x18a   : > { %3074 = vmatpush1.bf16.msra.mxu0 %v3073_v5  ;;  %v660_v5 = vld [vmem:[%s4561_s28 + $0x750] sm:$0xff]  ;;  %v1791_v46 = vld [vmem:[%s4572_s26 + $0x878] sm:$0xff] }
 0x18b   : > { %3586 = vmatpush1.bf16.msra.mxu1 %v3585_v6  ;;  %3076 = vmatprep.subr.bf16.mxu0 %v3075_v7  ;;  %v1752_v6 = vld [vmem:[%s4572_s26 + $0x740] sm:$0xff]  ;;  %v3607_v7 = vpack.c.bf16 %v1755_v0, %v1753_v63  ;;  %v3097_v13 = vpack.c.bf16 %v660_v5, %v658_v4  ;;  %v3115_v63 = vpack.c.bf16 %v681_v58, %v679_v57  ;;  %v1774_v4 = vld [vmem:[%s4572_s26 + $0x7f0] sm:$0xff]  ;;  %v1793_v57 = vld [vmem:[%s4572_s26 + $0x888] sm:$0xff] }
 0x18c   : > { %3588 = vmatprep.subr.bf16.mxu1 %v3587_v11  ;;  %v1757_v11 = vld [vmem:[%s4572_s26 + $0x768] sm:$0xff]  ;;  %v3609_v14 = vpack.c.bf16 %v1754_v8, %v1752_v6  ;;  %v678_v0 = vld [vmem:[%s4561_s28 + $0x7e0] sm:$0xff]  ;;  %v685_v6 = vld [vmem:[%s4561_s28 + $0x818] sm:$0xff] }
 0x18d   : > { %v683_v5 = vld [vmem:[%s4561_s28 + $0x808] sm:$0xff]  ;;  %v1779_v8 = vld [vmem:[%s4572_s26 + $0x818] sm:$0xff] }
 0x18e   : > { %3078 = vmatpush1.bf16.msra.mxu0 %v3077_v17  ;;  %v664_v17 = vld [vmem:[%s4561_s28 + $0x770] sm:$0xff]  ;;  %v1795_v58 = vld [vmem:[%s4572_s26 + $0x898] sm:$0xff] }
 0x18f   : > { %3590 = vmatpush1.bf16.msra.mxu1 %v3589_v18  ;;  %3080 = vmatprep.subr.bf16.mxu0 %v3079_v19  ;;  %v1756_v18 = vld [vmem:[%s4572_s26 + $0x760] sm:$0xff]  ;;  %v3611_v19 = vpack.c.bf16 %v1759_v12, %v1757_v11  ;;  %v3101_v25 = vpack.c.bf16 %v664_v17, %v662_v16  ;;  %v3119_v11 = vpack.c.bf16 %v685_v6, %v683_v5  ;;  %v1778_v16 = vld [vmem:[%s4572_s26 + $0x810] sm:$0xff]  ;;  %v1797_v5 = vld [vmem:[%s4572_s26 + $0x8a8] sm:$0xff] }
 0x190   : > { %3592 = vmatprep.subr.bf16.mxu1 %v3591_v23  ;;  %v1761_v23 = vld [vmem:[%s4572_s26 + $0x788] sm:$0xff]  ;;  %v3613_v26 = vpack.c.bf16 %v1758_v20, %v1756_v18  ;;  %v682_v12 = vld [vmem:[%s4561_s28 + $0x800] sm:$0xff]  ;;  %v689_v18 = vld [vmem:[%s4561_s28 + $0x838] sm:$0xff] }
 0x191   : > { %v687_v17 = vld [vmem:[%s4561_s28 + $0x828] sm:$0xff]  ;;  %v1783_v20 = vld [vmem:[%s4572_s26 + $0x838] sm:$0xff] }
 0x192   : > { %3082 = vmatpush1.bf16.msra.mxu0 %v3081_v29  ;;  %v668_v29 = vld [vmem:[%s4561_s28 + $0x790] sm:$0xff]  ;;  %v1799_v6 = vld [vmem:[%s4572_s26 + $0x8b8] sm:$0xff] }
 0x193   : > { %3594 = vmatpush1.bf16.msra.mxu1 %v3593_v30  ;;  %3084 = vmatprep.subr.bf16.mxu0 %v3083_v31  ;;  %v1760_v30 = vld [vmem:[%s4572_s26 + $0x780] sm:$0xff]  ;;  %v3615_v31 = vpack.c.bf16 %v1763_v24, %v1761_v23  ;;  %v3105_v37 = vpack.c.bf16 %v668_v29, %v666_v28  ;;  %v3123_v24 = vpack.c.bf16 %v689_v18, %v687_v17  ;;  %v1782_v29 = vld [vmem:[%s4572_s26 + $0x830] sm:$0xff]  ;;  %v1801_v17 = vld [vmem:[%s4572_s26 + $0x8c8] sm:$0xff] }
 0x194   : > { %3596 = vmatprep.subr.bf16.mxu1 %v3595_v35  ;;  %v1765_v35 = vld [vmem:[%s4572_s26 + $0x7a8] sm:$0xff]  ;;  %v3617_v38 = vpack.c.bf16 %v1762_v32, %v1760_v30  ;;  %v1803_v18 = vld [vmem:[%s4572_s26 + $0x8d8] sm:$0xff] }
 0x195   : > { %v691_v30 = vld [vmem:[%s4561_s28 + $0x848] sm:$0xff] }
 0x196   : > { %3086 = vmatpush1.bf16.msra.mxu0 %v3085_v41  ;;  %v672_v41 = vld [vmem:[%s4561_s28 + $0x7b0] sm:$0xff] }
 0x197   : > { %3598 = vmatpush1.bf16.msra.mxu1 %v3597_v42  ;;  %3088 = vmatprep.subr.bf16.mxu0 %v3087_v43  ;;  %v1764_v42 = vld [vmem:[%s4572_s26 + $0x7a0] sm:$0xff]  ;;  %v3619_v43 = vpack.c.bf16 %v1767_v36, %v1765_v35  ;;  %v3109_v49 = vpack.c.bf16 %v672_v41, %v670_v40  ;;  %v1785_v32 = vld [vmem:[%s4572_s26 + $0x848] sm:$0xff] }
 0x198   : > { %3600 = vmatprep.subr.bf16.mxu1 %v3599_v47  ;;  %v1769_v47 = vld [vmem:[%s4572_s26 + $0x7c8] sm:$0xff]  ;;  %v3621_v50 = vpack.c.bf16 %v1766_v44, %v1764_v42  ;;  %v1784_v40 = vld [vmem:[%s4572_s26 + $0x840] sm:$0xff]  ;;  %v3639_v41 = vpack.c.bf16 %v1787_v33, %v1785_v32  ;;  %v1786_v42 = vld [vmem:[%s4572_s26 + $0x850] sm:$0xff] }
 0x199   : > { %v697_v44 = vld [vmem:[%s4561_s28 + $0x878] sm:$0xff] }
 0x19a   : > { %3090 = vmatpush1.bf16.msra.mxu0 %v3089_v53  ;;  %v676_v53 = vld [vmem:[%s4561_s28 + $0x7d0] sm:$0xff] }
 0x19b   : > { %3602 = vmatpush1.bf16.msra.mxu1 %v3601_v54  ;;  %3092 = vmatprep.subr.bf16.mxu0 %v3091_v55  ;;  %v1768_v54 = vld [vmem:[%s4572_s26 + $0x7c0] sm:$0xff]  ;;  %v3623_v55 = vpack.c.bf16 %v1771_v48, %v1769_v47  ;;  %v3113_v61 = vpack.c.bf16 %v676_v53, %v674_v52  ;;  %v3641_v48 = vpack.c.bf16 %v1786_v42, %v1784_v40  ;;  %v717_v40 = vld [vmem:[%s4561_s28 + $0x918] sm:$0xff] }
 0x19c   : > { %3604 = vmatprep.subr.bf16.mxu1 %v3603_v59  ;;  %v1773_v59 = vld [vmem:[%s4572_s26 + $0x7e8] sm:$0xff]  ;;  %v3625_v62 = vpack.c.bf16 %v1770_v56, %v1768_v54  ;;  %v1788_v52 = vld [vmem:[%s4572_s26 + $0x860] sm:$0xff]  ;;  %v3643_v53 = vpack.c.bf16 %v1791_v46, %v1789_v45  ;;  %v1790_v54 = vld [vmem:[%s4572_s26 + $0x870] sm:$0xff] }
 0x19d   : > { %v701_v56 = vld [vmem:[%s4561_s28 + $0x898] sm:$0xff]  ;;  %v714_v46 = vld [vmem:[%s4561_s28 + $0x900] sm:$0xff] }
 0x19e   : > { %3094 = vmatpush1.bf16.msra.mxu0 %v3093_v1  ;;  %v680_v1 = vld [vmem:[%s4561_s28 + $0x7f0] sm:$0xff]  ;;  %v1811_v42 = vld [vmem:[%s4572_s26 + $0x918] sm:$0xff] }
 0x19f   : > { %3606 = vmatpush1.bf16.msra.mxu1 %v3605_v2  ;;  %3096 = vmatprep.subr.bf16.mxu0 %v3095_v3  ;;  %v1772_v2 = vld [vmem:[%s4572_s26 + $0x7e0] sm:$0xff]  ;;  %v3627_v3 = vpack.c.bf16 %v1775_v60, %v1773_v59  ;;  %v3117_v9 = vpack.c.bf16 %v680_v1, %v678_v0  ;;  %v3645_v60 = vpack.c.bf16 %v1790_v54, %v1788_v52  ;;  %v721_v52 = vld [vmem:[%s4561_s28 + $0x938] sm:$0xff] }
 0x1a0   : > { %3608 = vmatprep.subr.bf16.mxu1 %v3607_v7  ;;  %v1777_v7 = vld [vmem:[%s4572_s26 + $0x808] sm:$0xff]  ;;  %v3629_v10 = vpack.c.bf16 %v1774_v4, %v1772_v2  ;;  %v1792_v0 = vld [vmem:[%s4572_s26 + $0x880] sm:$0xff]  ;;  %v3647_v1 = vpack.c.bf16 %v1795_v58, %v1793_v57  ;;  %v1794_v2 = vld [vmem:[%s4572_s26 + $0x890] sm:$0xff] }
 0x1a1   : > { %v705_v4 = vld [vmem:[%s4561_s28 + $0x8b8] sm:$0xff]  ;;  %v718_v58 = vld [vmem:[%s4561_s28 + $0x920] sm:$0xff] }
 0x1a2   : > { %3098 = vmatpush1.bf16.msra.mxu0 %v3097_v13  ;;  %v684_v13 = vld [vmem:[%s4561_s28 + $0x810] sm:$0xff]  ;;  %v1815_v54 = vld [vmem:[%s4572_s26 + $0x938] sm:$0xff] }
 0x1a3   : > { %3610 = vmatpush1.bf16.msra.mxu1 %v3609_v14  ;;  %3100 = vmatprep.subr.bf16.mxu0 %v3099_v15  ;;  %v1776_v14 = vld [vmem:[%s4572_s26 + $0x800] sm:$0xff]  ;;  %v3631_v15 = vpack.c.bf16 %v1779_v8, %v1777_v7  ;;  %v3121_v22 = vpack.c.bf16 %v684_v13, %v682_v12  ;;  %v3649_v8 = vpack.c.bf16 %v1794_v2, %v1792_v0  ;;  %v725_v0 = vld [vmem:[%s4561_s28 + $0x958] sm:$0xff] }
 0x1a4   : > { %3612 = vmatprep.subr.bf16.mxu1 %v3611_v19  ;;  %v1781_v19 = vld [vmem:[%s4572_s26 + $0x828] sm:$0xff]  ;;  %v3633_v23 = vpack.c.bf16 %v1778_v16, %v1776_v14  ;;  %v1796_v12 = vld [vmem:[%s4572_s26 + $0x8a0] sm:$0xff]  ;;  %v3651_v13 = vpack.c.bf16 %v1799_v6, %v1797_v5  ;;  %v1798_v14 = vld [vmem:[%s4572_s26 + $0x8b0] sm:$0xff] }
 0x1a5   : > { %v3635_v28 = vpack.c.bf16 %v1783_v20, %v1781_v19  ;;  %v709_v16 = vld [vmem:[%s4561_s28 + $0x8d8] sm:$0xff]  ;;  %v3653_v20 = vpack.c.bf16 %v1798_v14, %v1796_v12  ;;  %v722_v6 = vld [vmem:[%s4561_s28 + $0x940] sm:$0xff] }
 0x1a6   : > { %3102 = vmatpush1.bf16.msra.mxu0 %v3101_v25  ;;  %v686_v25 = vld [vmem:[%s4561_s28 + $0x820] sm:$0xff]  ;;  %v729_v12 = vld [vmem:[%s4561_s28 + $0x978] sm:$0xff] }
 0x1a7   : > { %3614 = vmatpush1.bf16.msra.mxu1 %v3613_v26  ;;  %3104 = vmatprep.subr.bf16.mxu0 %v3103_v27  ;;  %v688_v26 = vld [vmem:[%s4561_s28 + $0x830] sm:$0xff]  ;;  %v1780_v27 = vld [vmem:[%s4572_s26 + $0x820] sm:$0xff]  ;;  %v1819_v2 = vld [vmem:[%s4572_s26 + $0x958] sm:$0xff] }
 0x1a8   : > { %3616 = vmatprep.subr.bf16.mxu1 %v3615_v31  ;;  %v693_v31 = vld [vmem:[%s4561_s28 + $0x858] sm:$0xff]  ;;  %v3125_v35 = vpack.c.bf16 %v688_v26, %v686_v25  ;;  %v3637_v36 = vpack.c.bf16 %v1782_v29, %v1780_v27  ;;  %v3655_v25 = vpack.c.bf16 %v1803_v18, %v1801_v17  ;;  %v711_v27 = vld [vmem:[%s4561_s28 + $0x8e8] sm:$0xff]  ;;  %v726_v18 = vld [vmem:[%s4561_s28 + $0x960] sm:$0xff] }
 0x1a9   : > { %v1802_v26 = vld [vmem:[%s4572_s26 + $0x8d0] sm:$0xff]  ;;  %v1805_v29 = vld [vmem:[%s4572_s26 + $0x8e8] sm:$0xff]  ;;  %v1823_v14 = vld [vmem:[%s4572_s26 + $0x978] sm:$0xff] }
 0x1aa   : > { %3106 = vmatpush1.bf16.msra.mxu0 %v3105_v37  ;;  %v3127_v37 = vpack.c.bf16 %v693_v31, %v691_v30  ;;  %v1807_v30 = vld [vmem:[%s4572_s26 + $0x8f8] sm:$0xff] }
 0x1ab   : > { %3618 = vmatpush1.bf16.msra.mxu1 %v3617_v38  ;;  %3108 = vmatprep.subr.bf16.mxu0 %v3107_v39  ;;  %v690_v38 = vld [vmem:[%s4561_s28 + $0x840] sm:$0xff]  ;;  %v692_v39 = vld [vmem:[%s4561_s28 + $0x850] sm:$0xff] }
 0x1ac   : > { %3620 = vmatprep.subr.bf16.mxu1 %v3619_v43  ;;  %v695_v43 = vld [vmem:[%s4561_s28 + $0x868] sm:$0xff]  ;;  %v3129_v47 = vpack.c.bf16 %v692_v39, %v690_v38  ;;  %v1806_v38 = vld [vmem:[%s4572_s26 + $0x8f0] sm:$0xff] }
 0x1ad   : > { %v715_v39 = vld [vmem:[%s4561_s28 + $0x908] sm:$0xff] }
 0x1ae   : > { %3110 = vmatpush1.bf16.msra.mxu0 %v3109_v49  ;;  %v3131_v49 = vpack.c.bf16 %v697_v44, %v695_v43  ;;  %v3151_v45 = vpack.c.bf16 %v717_v40, %v715_v39 }
 0x1af   : > { %3622 = vmatpush1.bf16.msra.mxu1 %v3621_v50  ;;  %3112 = vmatprep.subr.bf16.mxu0 %v3111_v51  ;;  %v694_v50 = vld [vmem:[%s4561_s28 + $0x860] sm:$0xff]  ;;  %v696_v51 = vld [vmem:[%s4561_s28 + $0x870] sm:$0xff] }
 0x1b0   : > { %3624 = vmatprep.subr.bf16.mxu1 %v3623_v55  ;;  %v699_v55 = vld [vmem:[%s4561_s28 + $0x888] sm:$0xff]  ;;  %v3133_v59 = vpack.c.bf16 %v696_v51, %v694_v50  ;;  %v1810_v50 = vld [vmem:[%s4572_s26 + $0x910] sm:$0xff] }
 0x1b1   : > { %v719_v51 = vld [vmem:[%s4561_s28 + $0x928] sm:$0xff] }
 0x1b2   : > { %3114 = vmatpush1.bf16.msra.mxu0 %v3113_v61  ;;  %v3135_v61 = vpack.c.bf16 %v701_v56, %v699_v55  ;;  %v3155_v57 = vpack.c.bf16 %v721_v52, %v719_v51 }
 0x1b3   : > { %3626 = vmatpush1.bf16.msra.mxu1 %v3625_v62  ;;  %3116 = vmatprep.subr.bf16.mxu0 %v3115_v63  ;;  %v698_v62 = vld [vmem:[%s4561_s28 + $0x880] sm:$0xff]  ;;  %v700_v63 = vld [vmem:[%s4561_s28 + $0x890] sm:$0xff] }
 0x1b4   : > { %3628 = vmatprep.subr.bf16.mxu1 %v3627_v3  ;;  %v703_v3 = vld [vmem:[%s4561_s28 + $0x8a8] sm:$0xff]  ;;  %v3137_v7 = vpack.c.bf16 %v700_v63, %v698_v62  ;;  %v1814_v62 = vld [vmem:[%s4572_s26 + $0x930] sm:$0xff] }
 0x1b5   : > { %v723_v63 = vld [vmem:[%s4561_s28 + $0x948] sm:$0xff] }
 0x1b6   : > { %3118 = vmatpush1.bf16.msra.mxu0 %v3117_v9  ;;  %v3139_v9 = vpack.c.bf16 %v705_v4, %v703_v3  ;;  %v3159_v5 = vpack.c.bf16 %v725_v0, %v723_v63 }
 0x1b7   : > { %3630 = vmatpush1.bf16.msra.mxu1 %v3629_v10  ;;  %3120 = vmatprep.subr.bf16.mxu0 %v3119_v11  ;;  %v702_v10 = vld [vmem:[%s4561_s28 + $0x8a0] sm:$0xff]  ;;  %v704_v11 = vld [vmem:[%s4561_s28 + $0x8b0] sm:$0xff] }
 0x1b8   : > { %3632 = vmatprep.subr.bf16.mxu1 %v3631_v15  ;;  %v707_v15 = vld [vmem:[%s4561_s28 + $0x8c8] sm:$0xff]  ;;  %v3141_v19 = vpack.c.bf16 %v704_v11, %v702_v10  ;;  %v1818_v10 = vld [vmem:[%s4572_s26 + $0x950] sm:$0xff] }
 0x1b9   : > { %1228 = vmatmul.mubr.f32.vlgmr.msra.gmra.mrb[0].mxu0 %v416_v21  ;;  %v727_v11 = vld [vmem:[%s4561_s28 + $0x968] sm:$0xff] }
 0x1ba   : > { %3122 = vmatpush1.bf16.msra.mxu0 %v3121_v22  ;;  %2322 = vmatmul.mubr.f32.vlgmr.msra.gmra.mrb[0].mxu1 %v416_v21  ;;  %v3143_v21 = vpack.c.bf16 %v709_v16, %v707_v15  ;;  %v706_v22 = vld [vmem:[%s4561_s28 + $0x8c0] sm:$0xff]  ;;  %v3163_v17 = vpack.c.bf16 %v729_v12, %v727_v11 }
 0x1bb   : > { %3634 = vmatpush1.bf16.msra.mxu1 %v3633_v23  ;;  %3124 = vmatprep.subr.bf16.mxu0 %v3123_v24  ;;  %v708_v23 = vld [vmem:[%s4561_s28 + $0x8d0] sm:$0xff]  ;;  %v1800_v24 = vld [vmem:[%s4572_s26 + $0x8c0] sm:$0xff] }
 0x1bc   : > { %3636 = vmatprep.subr.bf16.mxu1 %v3635_v28  ;;  %1298 = vmatprep.mubr.f32.mxu0 %v419_v34  ;;  %v713_v28 = vld [vmem:[%s4561_s28 + $0x8f8] sm:$0xff]  ;;  %v3145_v31 = vpack.c.bf16 %v708_v23, %v706_v22  ;;  %v3657_v32 = vpack.c.bf16 %v1802_v26, %v1800_v24  ;;  %v731_v23 = vld [vmem:[%s4561_s28 + $0x988] sm:$0xff] }
 0x1bd   : > { %2392 = vmatprep.mubr.f32.mxu1 %v419_v34  ;;  %v3147_v33 = vpack.c.bf16 %v713_v28, %v711_v27  ;;  %v710_v34 = vld [vmem:[%s4561_s28 + $0x8e0] sm:$0xff]  ;;  %v1822_v22 = vld [vmem:[%s4572_s26 + $0x970] sm:$0xff] }
 0x1be   : > { %3126 = vmatpush1.bf16.msra.mxu0 %v3125_v35  ;;  %v712_v35 = vld [vmem:[%s4561_s28 + $0x8f0] sm:$0xff]  ;;  %v733_v24 = vld [vmem:[%s4561_s28 + $0x998] sm:$0xff] }
 0x1bf   : > { %3638 = vmatpush1.bf16.msra.mxu1 %v3637_v36  ;;  %3128 = vmatprep.subr.bf16.mxu0 %v3127_v37  ;;  %v1804_v36 = vld [vmem:[%s4572_s26 + $0x8e0] sm:$0xff]  ;;  %v3659_v37 = vpack.c.bf16 %v1807_v30, %v1805_v29  ;;  %v3149_v43 = vpack.c.bf16 %v712_v35, %v710_v34  ;;  %v1827_v26 = vld [vmem:[%s4572_s26 + $0x998] sm:$0xff]  ;;  %v3167_v29 = vpack.c.bf16 %v733_v24, %v731_v23  ;;  %v1826_v34 = vld [vmem:[%s4572_s26 + $0x990] sm:$0xff] }
 0x1c0   : > { %3640 = vmatprep.subr.bf16.mxu1 %v3639_v41  ;;  %v1809_v41 = vld [vmem:[%s4572_s26 + $0x908] sm:$0xff]  ;;  %v3661_v44 = vpack.c.bf16 %v1806_v38, %v1804_v36  ;;  %v730_v30 = vld [vmem:[%s4561_s28 + $0x980] sm:$0xff]  ;;  %v737_v36 = vld [vmem:[%s4561_s28 + $0x9b8] sm:$0xff] }
 0x1c1   : > { %v735_v35 = vld [vmem:[%s4561_s28 + $0x9a8] sm:$0xff]  ;;  %v1831_v38 = vld [vmem:[%s4572_s26 + $0x9b8] sm:$0xff] }
 0x1c2   : > { %3130 = vmatpush1.bf16.msra.mxu0 %v3129_v47  ;;  %v716_v47 = vld [vmem:[%s4561_s28 + $0x910] sm:$0xff]  ;;  %v418_v23 = vld [vmem:[#allocation2 + $0x40] sm:$0xff] }
 0x1c3   : > { %3642 = vmatpush1.bf16.msra.mxu1 %v3641_v48  ;;  %3132 = vmatprep.subr.bf16.mxu0 %v3131_v49  ;;  %v1808_v48 = vld [vmem:[%s4572_s26 + $0x900] sm:$0xff]  ;;  %v3663_v49 = vpack.c.bf16 %v1811_v42, %v1809_v41  ;;  %v3153_v55 = vpack.c.bf16 %v716_v47, %v714_v46  ;;  %v3171_v41 = vpack.c.bf16 %v737_v36, %v735_v35  ;;  %v1830_v46 = vld [vmem:[%s4572_s26 + $0x9b0] sm:$0xff]  ;;  %v1851_v35 = vld [vmem:[%s4572_s26 + $0xa58] sm:$0xff] }
 0x1c4   : > { %3644 = vmatprep.subr.bf16.mxu1 %v3643_v53  ;;  %v1813_v53 = vld [vmem:[%s4572_s26 + $0x928] sm:$0xff]  ;;  %v3665_v56 = vpack.c.bf16 %v1810_v50, %v1808_v48  ;;  %v734_v42 = vld [vmem:[%s4561_s28 + $0x9a0] sm:$0xff]  ;;  %v741_v48 = vld [vmem:[%s4561_s28 + $0x9d8] sm:$0xff] }
 0x1c5   : > { %v739_v47 = vld [vmem:[%s4561_s28 + $0x9c8] sm:$0xff]  ;;  %v1835_v50 = vld [vmem:[%s4572_s26 + $0x9d8] sm:$0xff] }
 0x1c6   : > { %3134 = vmatpush1.bf16.msra.mxu0 %v3133_v59  ;;  %v720_v59 = vld [vmem:[%s4561_s28 + $0x930] sm:$0xff]  ;;  %v421_v36 = vld [vmem:[#allocation2 + $0x58] sm:$0xff] }
 0x1c7   : > { %3646 = vmatpush1.bf16.msra.mxu1 %v3645_v60  ;;  %3136 = vmatprep.subr.bf16.mxu0 %v3135_v61  ;;  %v1812_v60 = vld [vmem:[%s4572_s26 + $0x920] sm:$0xff]  ;;  %v3667_v61 = vpack.c.bf16 %v1815_v54, %v1813_v53  ;;  %v3157_v3 = vpack.c.bf16 %v720_v59, %v718_v58  ;;  %v3175_v53 = vpack.c.bf16 %v741_v48, %v739_v47  ;;  %v1834_v58 = vld [vmem:[%s4572_s26 + $0x9d0] sm:$0xff]  ;;  %v1853_v47 = vld [vmem:[%s4572_s26 + $0xa68] sm:$0xff] }
 0x1c8   : > { %3648 = vmatprep.subr.bf16.mxu1 %v3647_v1  ;;  %v1817_v1 = vld [vmem:[%s4572_s26 + $0x948] sm:$0xff]  ;;  %v3669_v4 = vpack.c.bf16 %v1814_v62, %v1812_v60  ;;  %v738_v54 = vld [vmem:[%s4561_s28 + $0x9c0] sm:$0xff]  ;;  %v745_v60 = vld [vmem:[%s4561_s28 + $0x9f8] sm:$0xff] }
 0x1c9   : > { %v743_v59 = vld [vmem:[%s4561_s28 + $0x9e8] sm:$0xff]  ;;  %v1839_v62 = vld [vmem:[%s4572_s26 + $0x9f8] sm:$0xff] }
 0x1ca   : > { %3138 = vmatpush1.bf16.msra.mxu0 %v3137_v7  ;;  %v724_v7 = vld [vmem:[%s4561_s28 + $0x950] sm:$0xff]  ;;  %v1855_v48 = vld [vmem:[%s4572_s26 + $0xa78] sm:$0xff] }
 0x1cb   : > { %3650 = vmatpush1.bf16.msra.mxu1 %v3649_v8  ;;  %3140 = vmatprep.subr.bf16.mxu0 %v3139_v9  ;;  %v1816_v8 = vld [vmem:[%s4572_s26 + $0x940] sm:$0xff]  ;;  %v3671_v9 = vpack.c.bf16 %v1819_v2, %v1817_v1  ;;  %v3161_v15 = vpack.c.bf16 %v724_v7, %v722_v6  ;;  %v3179_v1 = vpack.c.bf16 %v745_v60, %v743_v59  ;;  %v1838_v6 = vld [vmem:[%s4572_s26 + $0x9f0] sm:$0xff]  ;;  %v1857_v59 = vld [vmem:[%s4572_s26 + $0xa88] sm:$0xff] }
 0x1cc   : > { %3652 = vmatprep.subr.bf16.mxu1 %v3651_v13  ;;  %v1821_v13 = vld [vmem:[%s4572_s26 + $0x968] sm:$0xff]  ;;  %v3673_v16 = vpack.c.bf16 %v1818_v10, %v1816_v8  ;;  %v742_v2 = vld [vmem:[%s4561_s28 + $0x9e0] sm:$0xff]  ;;  %v749_v8 = vld [vmem:[%s4561_s28 + $0xa18] sm:$0xff] }
 0x1cd   : > { %v747_v7 = vld [vmem:[%s4561_s28 + $0xa08] sm:$0xff]  ;;  %v1843_v10 = vld [vmem:[%s4572_s26 + $0xa18] sm:$0xff] }
 0x1ce   : > { %3142 = vmatpush1.bf16.msra.mxu0 %v3141_v19  ;;  %v728_v19 = vld [vmem:[%s4561_s28 + $0x970] sm:$0xff]  ;;  %v1859_v60 = vld [vmem:[%s4572_s26 + $0xa98] sm:$0xff] }
 0x1cf   : > { %3654 = vmatpush1.bf16.msra.mxu1 %v3653_v20  ;;  %3144 = vmatprep.subr.bf16.mxu0 %v3143_v21  ;;  %v1820_v20 = vld [vmem:[%s4572_s26 + $0x960] sm:$0xff]  ;;  %v3675_v21 = vpack.c.bf16 %v1823_v14, %v1821_v13  ;;  %v3165_v27 = vpack.c.bf16 %v728_v19, %v726_v18  ;;  %v3183_v13 = vpack.c.bf16 %v749_v8, %v747_v7  ;;  %v1842_v18 = vld [vmem:[%s4572_s26 + $0xa10] sm:$0xff]  ;;  %v1861_v7 = vld [vmem:[%s4572_s26 + $0xaa8] sm:$0xff] }
 0x1d0   : > { %3656 = vmatprep.subr.bf16.mxu1 %v3655_v25  ;;  %v1825_v25 = vld [vmem:[%s4572_s26 + $0x988] sm:$0xff]  ;;  %v3677_v28 = vpack.c.bf16 %v1822_v22, %v1820_v20  ;;  %v746_v14 = vld [vmem:[%s4561_s28 + $0xa00] sm:$0xff]  ;;  %v753_v20 = vld [vmem:[%s4561_s28 + $0xa38] sm:$0xff] }
 0x1d1   : > { %v751_v19 = vld [vmem:[%s4561_s28 + $0xa28] sm:$0xff]  ;;  %v1847_v22 = vld [vmem:[%s4572_s26 + $0xa38] sm:$0xff] }
 0x1d2   : > { %3146 = vmatpush1.bf16.msra.mxu0 %v3145_v31  ;;  %v732_v31 = vld [vmem:[%s4561_s28 + $0x990] sm:$0xff]  ;;  %v1863_v8 = vld [vmem:[%s4572_s26 + $0xab8] sm:$0xff] }
 0x1d3   : > { %3658 = vmatpush1.bf16.msra.mxu1 %v3657_v32  ;;  %3148 = vmatprep.subr.bf16.mxu0 %v3147_v33  ;;  %v1824_v32 = vld [vmem:[%s4572_s26 + $0x980] sm:$0xff]  ;;  %v3679_v33 = vpack.c.bf16 %v1827_v26, %v1825_v25  ;;  %v3169_v39 = vpack.c.bf16 %v732_v31, %v730_v30  ;;  %v3187_v26 = vpack.c.bf16 %v753_v20, %v751_v19  ;;  %v1846_v31 = vld [vmem:[%s4572_s26 + $0xa30] sm:$0xff]  ;;  %v1865_v19 = vld [vmem:[%s4572_s26 + $0xac8] sm:$0xff] }
 0x1d4   : > { %3660 = vmatprep.subr.bf16.mxu1 %v3659_v37  ;;  %v1829_v37 = vld [vmem:[%s4572_s26 + $0x9a8] sm:$0xff]  ;;  %v3681_v40 = vpack.c.bf16 %v1826_v34, %v1824_v32  ;;  %v1867_v20 = vld [vmem:[%s4572_s26 + $0xad8] sm:$0xff] }
 0x1d5   : > { %v755_v32 = vld [vmem:[%s4561_s28 + $0xa48] sm:$0xff] }
 0x1d6   : > { %3150 = vmatpush1.bf16.msra.mxu0 %v3149_v43  ;;  %v736_v43 = vld [vmem:[%s4561_s28 + $0x9b0] sm:$0xff] }
 0x1d7   : > { %3662 = vmatpush1.bf16.msra.mxu1 %v3661_v44  ;;  %3152 = vmatprep.subr.bf16.mxu0 %v3151_v45  ;;  %v1828_v44 = vld [vmem:[%s4572_s26 + $0x9a0] sm:$0xff]  ;;  %v3683_v45 = vpack.c.bf16 %v1831_v38, %v1829_v37  ;;  %v3173_v51 = vpack.c.bf16 %v736_v43, %v734_v42  ;;  %v1849_v34 = vld [vmem:[%s4572_s26 + $0xa48] sm:$0xff] }
 0x1d8   : > { %3664 = vmatprep.subr.bf16.mxu1 %v3663_v49  ;;  %v1833_v49 = vld [vmem:[%s4572_s26 + $0x9c8] sm:$0xff]  ;;  %v3685_v52 = vpack.c.bf16 %v1830_v46, %v1828_v44  ;;  %v1848_v42 = vld [vmem:[%s4572_s26 + $0xa40] sm:$0xff]  ;;  %v3703_v43 = vpack.c.bf16 %v1851_v35, %v1849_v34  ;;  %v1850_v44 = vld [vmem:[%s4572_s26 + $0xa50] sm:$0xff] }
 0x1d9   : > { %v761_v46 = vld [vmem:[%s4561_s28 + $0xa78] sm:$0xff] }
 0x1da   : > { %3154 = vmatpush1.bf16.msra.mxu0 %v3153_v55  ;;  %v740_v55 = vld [vmem:[%s4561_s28 + $0x9d0] sm:$0xff] }
 0x1db   : > { %3666 = vmatpush1.bf16.msra.mxu1 %v3665_v56  ;;  %3156 = vmatprep.subr.bf16.mxu0 %v3155_v57  ;;  %v1832_v56 = vld [vmem:[%s4572_s26 + $0x9c0] sm:$0xff]  ;;  %v3687_v57 = vpack.c.bf16 %v1835_v50, %v1833_v49  ;;  %v3177_v63 = vpack.c.bf16 %v740_v55, %v738_v54  ;;  %v3705_v50 = vpack.c.bf16 %v1850_v44, %v1848_v42  ;;  %v781_v42 = vld [vmem:[%s4561_s28 + $0xb18] sm:$0xff] }
 0x1dc   : > { %3668 = vmatprep.subr.bf16.mxu1 %v3667_v61  ;;  %v1837_v61 = vld [vmem:[%s4572_s26 + $0x9e8] sm:$0xff]  ;;  %v3689_v0 = vpack.c.bf16 %v1834_v58, %v1832_v56  ;;  %v1852_v54 = vld [vmem:[%s4572_s26 + $0xa60] sm:$0xff]  ;;  %v3707_v55 = vpack.c.bf16 %v1855_v48, %v1853_v47  ;;  %v1854_v56 = vld [vmem:[%s4572_s26 + $0xa70] sm:$0xff] }
 0x1dd   : > { %v765_v58 = vld [vmem:[%s4561_s28 + $0xa98] sm:$0xff]  ;;  %v778_v48 = vld [vmem:[%s4561_s28 + $0xb00] sm:$0xff] }
 0x1de   : > { %3158 = vmatpush1.bf16.msra.mxu0 %v3157_v3  ;;  %v744_v3 = vld [vmem:[%s4561_s28 + $0x9f0] sm:$0xff]  ;;  %v1875_v44 = vld [vmem:[%s4572_s26 + $0xb18] sm:$0xff] }
 0x1df   : > { %3670 = vmatpush1.bf16.msra.mxu1 %v3669_v4  ;;  %3160 = vmatprep.subr.bf16.mxu0 %v3159_v5  ;;  %v1836_v4 = vld [vmem:[%s4572_s26 + $0x9e0] sm:$0xff]  ;;  %v3691_v5 = vpack.c.bf16 %v1839_v62, %v1837_v61  ;;  %v3181_v11 = vpack.c.bf16 %v744_v3, %v742_v2  ;;  %v3709_v62 = vpack.c.bf16 %v1854_v56, %v1852_v54  ;;  %v785_v54 = vld [vmem:[%s4561_s28 + $0xb38] sm:$0xff] }
 0x1e0   : > { %3672 = vmatprep.subr.bf16.mxu1 %v3671_v9  ;;  %v1841_v9 = vld [vmem:[%s4572_s26 + $0xa08] sm:$0xff]  ;;  %v3693_v12 = vpack.c.bf16 %v1838_v6, %v1836_v4  ;;  %v1856_v2 = vld [vmem:[%s4572_s26 + $0xa80] sm:$0xff]  ;;  %v3711_v3 = vpack.c.bf16 %v1859_v60, %v1857_v59  ;;  %v1858_v4 = vld [vmem:[%s4572_s26 + $0xa90] sm:$0xff] }
 0x1e1   : > { %v769_v6 = vld [vmem:[%s4561_s28 + $0xab8] sm:$0xff]  ;;  %v782_v60 = vld [vmem:[%s4561_s28 + $0xb20] sm:$0xff] }
 0x1e2   : > { %3162 = vmatpush1.bf16.msra.mxu0 %v3161_v15  ;;  %v748_v15 = vld [vmem:[%s4561_s28 + $0xa10] sm:$0xff]  ;;  %v1879_v56 = vld [vmem:[%s4572_s26 + $0xb38] sm:$0xff] }
 0x1e3   : > { %3674 = vmatpush1.bf16.msra.mxu1 %v3673_v16  ;;  %3164 = vmatprep.subr.bf16.mxu0 %v3163_v17  ;;  %v1840_v16 = vld [vmem:[%s4572_s26 + $0xa00] sm:$0xff]  ;;  %v3695_v17 = vpack.c.bf16 %v1843_v10, %v1841_v9  ;;  %v3185_v24 = vpack.c.bf16 %v748_v15, %v746_v14  ;;  %v3713_v10 = vpack.c.bf16 %v1858_v4, %v1856_v2  ;;  %v789_v2 = vld [vmem:[%s4561_s28 + $0xb58] sm:$0xff] }
 0x1e4   : > { %3676 = vmatprep.subr.bf16.mxu1 %v3675_v21  ;;  %v1845_v21 = vld [vmem:[%s4572_s26 + $0xa28] sm:$0xff]  ;;  %v3697_v25 = vpack.c.bf16 %v1842_v18, %v1840_v16  ;;  %v1860_v14 = vld [vmem:[%s4572_s26 + $0xaa0] sm:$0xff]  ;;  %v3715_v15 = vpack.c.bf16 %v1863_v8, %v1861_v7  ;;  %v1862_v16 = vld [vmem:[%s4572_s26 + $0xab0] sm:$0xff] }
 0x1e5   : > { %v3699_v30 = vpack.c.bf16 %v1847_v22, %v1845_v21  ;;  %v773_v18 = vld [vmem:[%s4561_s28 + $0xad8] sm:$0xff]  ;;  %v3717_v22 = vpack.c.bf16 %v1862_v16, %v1860_v14  ;;  %v786_v8 = vld [vmem:[%s4561_s28 + $0xb40] sm:$0xff] }
 0x1e6   : > { %3166 = vmatpush1.bf16.msra.mxu0 %v3165_v27  ;;  %v750_v27 = vld [vmem:[%s4561_s28 + $0xa20] sm:$0xff]  ;;  %v793_v14 = vld [vmem:[%s4561_s28 + $0xb78] sm:$0xff] }
 0x1e7   : > { %3678 = vmatpush1.bf16.msra.mxu1 %v3677_v28  ;;  %3168 = vmatprep.subr.bf16.mxu0 %v3167_v29  ;;  %v752_v28 = vld [vmem:[%s4561_s28 + $0xa30] sm:$0xff]  ;;  %v1844_v29 = vld [vmem:[%s4572_s26 + $0xa20] sm:$0xff]  ;;  %v1883_v4 = vld [vmem:[%s4572_s26 + $0xb58] sm:$0xff] }
 0x1e8   : > { %3680 = vmatprep.subr.bf16.mxu1 %v3679_v33  ;;  %v757_v33 = vld [vmem:[%s4561_s28 + $0xa58] sm:$0xff]  ;;  %v3189_v37 = vpack.c.bf16 %v752_v28, %v750_v27  ;;  %v3701_v38 = vpack.c.bf16 %v1846_v31, %v1844_v29  ;;  %v3719_v27 = vpack.c.bf16 %v1867_v20, %v1865_v19  ;;  %v775_v29 = vld [vmem:[%s4561_s28 + $0xae8] sm:$0xff]  ;;  %v790_v20 = vld [vmem:[%s4561_s28 + $0xb60] sm:$0xff] }
 0x1e9   : > { %v1866_v28 = vld [vmem:[%s4572_s26 + $0xad0] sm:$0xff]  ;;  %v1869_v31 = vld [vmem:[%s4572_s26 + $0xae8] sm:$0xff]  ;;  %v1887_v16 = vld [vmem:[%s4572_s26 + $0xb78] sm:$0xff] }
 0x1ea   : > { %3170 = vmatpush1.bf16.msra.mxu0 %v3169_v39  ;;  %v3191_v39 = vpack.c.bf16 %v757_v33, %v755_v32  ;;  %v1871_v32 = vld [vmem:[%s4572_s26 + $0xaf8] sm:$0xff] }
 0x1eb   : > { %3682 = vmatpush1.bf16.msra.mxu1 %v3681_v40  ;;  %3172 = vmatprep.subr.bf16.mxu0 %v3171_v41  ;;  %v754_v40 = vld [vmem:[%s4561_s28 + $0xa40] sm:$0xff]  ;;  %v756_v41 = vld [vmem:[%s4561_s28 + $0xa50] sm:$0xff] }
 0x1ec   : > { %3684 = vmatprep.subr.bf16.mxu1 %v3683_v45  ;;  %v759_v45 = vld [vmem:[%s4561_s28 + $0xa68] sm:$0xff]  ;;  %v3193_v49 = vpack.c.bf16 %v756_v41, %v754_v40  ;;  %v1870_v40 = vld [vmem:[%s4572_s26 + $0xaf0] sm:$0xff] }
 0x1ed   : > { %v779_v41 = vld [vmem:[%s4561_s28 + $0xb08] sm:$0xff] }
 0x1ee   : > { %3174 = vmatpush1.bf16.msra.mxu0 %v3173_v51  ;;  %v3195_v51 = vpack.c.bf16 %v761_v46, %v759_v45  ;;  %v3215_v47 = vpack.c.bf16 %v781_v42, %v779_v41 }
 0x1ef   : > { %3686 = vmatpush1.bf16.msra.mxu1 %v3685_v52  ;;  %3176 = vmatprep.subr.bf16.mxu0 %v3175_v53  ;;  %v758_v52 = vld [vmem:[%s4561_s28 + $0xa60] sm:$0xff]  ;;  %v760_v53 = vld [vmem:[%s4561_s28 + $0xa70] sm:$0xff] }
 0x1f0   : > { %3688 = vmatprep.subr.bf16.mxu1 %v3687_v57  ;;  %v763_v57 = vld [vmem:[%s4561_s28 + $0xa88] sm:$0xff]  ;;  %v3197_v61 = vpack.c.bf16 %v760_v53, %v758_v52  ;;  %v1874_v52 = vld [vmem:[%s4572_s26 + $0xb10] sm:$0xff] }
 0x1f1   : > { %v783_v53 = vld [vmem:[%s4561_s28 + $0xb28] sm:$0xff] }
 0x1f2   : > { %3178 = vmatpush1.bf16.msra.mxu0 %v3177_v63  ;;  %v3199_v63 = vpack.c.bf16 %v765_v58, %v763_v57  ;;  %v3219_v59 = vpack.c.bf16 %v785_v54, %v783_v53 }
 0x1f3   : > { %3690 = vmatpush1.bf16.msra.mxu1 %v3689_v0  ;;  %3180 = vmatprep.subr.bf16.mxu0 %v3179_v1  ;;  %v762_v0 = vld [vmem:[%s4561_s28 + $0xa80] sm:$0xff]  ;;  %v764_v1 = vld [vmem:[%s4561_s28 + $0xa90] sm:$0xff] }
 0x1f4   : > { %3692 = vmatprep.subr.bf16.mxu1 %v3691_v5  ;;  %v767_v5 = vld [vmem:[%s4561_s28 + $0xaa8] sm:$0xff]  ;;  %v3201_v9 = vpack.c.bf16 %v764_v1, %v762_v0  ;;  %v1878_v0 = vld [vmem:[%s4572_s26 + $0xb30] sm:$0xff] }
 0x1f5   : > { %v787_v1 = vld [vmem:[%s4561_s28 + $0xb48] sm:$0xff] }
 0x1f6   : > { %3182 = vmatpush1.bf16.msra.mxu0 %v3181_v11  ;;  %v3203_v11 = vpack.c.bf16 %v769_v6, %v767_v5  ;;  %v3223_v7 = vpack.c.bf16 %v789_v2, %v787_v1 }
 0x1f7   : > { %3694 = vmatpush1.bf16.msra.mxu1 %v3693_v12  ;;  %3184 = vmatprep.subr.bf16.mxu0 %v3183_v13  ;;  %v766_v12 = vld [vmem:[%s4561_s28 + $0xaa0] sm:$0xff]  ;;  %v768_v13 = vld [vmem:[%s4561_s28 + $0xab0] sm:$0xff] }
 0x1f8   : > { %3696 = vmatprep.subr.bf16.mxu1 %v3695_v17  ;;  %v771_v17 = vld [vmem:[%s4561_s28 + $0xac8] sm:$0xff]  ;;  %v3205_v21 = vpack.c.bf16 %v768_v13, %v766_v12  ;;  %v1882_v12 = vld [vmem:[%s4572_s26 + $0xb50] sm:$0xff] }
 0x1f9   : > { %1299 = vmatmul.mubr.f32.vlgmr.msra.gmra.mrb[0].mxu0 %v418_v23  ;;  %v791_v13 = vld [vmem:[%s4561_s28 + $0xb68] sm:$0xff] }
 0x1fa   : > { %3186 = vmatpush1.bf16.msra.mxu0 %v3185_v24  ;;  %2393 = vmatmul.mubr.f32.vlgmr.msra.gmra.mrb[0].mxu1 %v418_v23  ;;  %v3207_v23 = vpack.c.bf16 %v773_v18, %v771_v17  ;;  %v770_v24 = vld [vmem:[%s4561_s28 + $0xac0] sm:$0xff]  ;;  %v3227_v19 = vpack.c.bf16 %v793_v14, %v791_v13 }
 0x1fb   : > { %3698 = vmatpush1.bf16.msra.mxu1 %v3697_v25  ;;  %3188 = vmatprep.subr.bf16.mxu0 %v3187_v26  ;;  %v772_v25 = vld [vmem:[%s4561_s28 + $0xad0] sm:$0xff]  ;;  %v1864_v26 = vld [vmem:[%s4572_s26 + $0xac0] sm:$0xff] }
 0x1fc   : > { %3700 = vmatprep.subr.bf16.mxu1 %v3699_v30  ;;  %1369 = vmatprep.mubr.f32.mxu0 %v421_v36  ;;  %v777_v30 = vld [vmem:[%s4561_s28 + $0xaf8] sm:$0xff]  ;;  %v3209_v33 = vpack.c.bf16 %v772_v25, %v770_v24  ;;  %v3721_v34 = vpack.c.bf16 %v1866_v28, %v1864_v26  ;;  %v795_v25 = vld [vmem:[%s4561_s28 + $0xb88] sm:$0xff] }
 0x1fd   : > { %2463 = vmatprep.mubr.f32.mxu1 %v421_v36  ;;  %v3211_v35 = vpack.c.bf16 %v777_v30, %v775_v29  ;;  %v774_v36 = vld [vmem:[%s4561_s28 + $0xae0] sm:$0xff]  ;;  %v1886_v24 = vld [vmem:[%s4572_s26 + $0xb70] sm:$0xff] }
 0x1fe   : > { %3190 = vmatpush1.bf16.msra.mxu0 %v3189_v37  ;;  %v776_v37 = vld [vmem:[%s4561_s28 + $0xaf0] sm:$0xff]  ;;  %v797_v26 = vld [vmem:[%s4561_s28 + $0xb98] sm:$0xff] }
 0x1ff   : > { %3702 = vmatpush1.bf16.msra.mxu1 %v3701_v38  ;;  %3192 = vmatprep.subr.bf16.mxu0 %v3191_v39  ;;  %v1868_v38 = vld [vmem:[%s4572_s26 + $0xae0] sm:$0xff]  ;;  %v3723_v39 = vpack.c.bf16 %v1871_v32, %v1869_v31  ;;  %v3213_v45 = vpack.c.bf16 %v776_v37, %v774_v36  ;;  %v1891_v28 = vld [vmem:[%s4572_s26 + $0xb98] sm:$0xff]  ;;  %v3231_v31 = vpack.c.bf16 %v797_v26, %v795_v25  ;;  %v1890_v36 = vld [vmem:[%s4572_s26 + $0xb90] sm:$0xff] }
 0x200   : > { %3704 = vmatprep.subr.bf16.mxu1 %v3703_v43  ;;  %v1873_v43 = vld [vmem:[%s4572_s26 + $0xb08] sm:$0xff]  ;;  %v3725_v46 = vpack.c.bf16 %v1870_v40, %v1868_v38  ;;  %v794_v32 = vld [vmem:[%s4561_s28 + $0xb80] sm:$0xff]  ;;  %v801_v38 = vld [vmem:[%s4561_s28 + $0xbb8] sm:$0xff] }
 0x201   : > { %v799_v37 = vld [vmem:[%s4561_s28 + $0xba8] sm:$0xff]  ;;  %v1895_v40 = vld [vmem:[%s4572_s26 + $0xbb8] sm:$0xff]  ;;  %v420_v25 = vld [vmem:[#allocation2 + $0x50] sm:$0xff] }
 0x202   : > { %3194 = vmatpush1.bf16.msra.mxu0 %v3193_v49  ;;  %v780_v49 = vld [vmem:[%s4561_s28 + $0xb10] sm:$0xff] }
 0x203   : > { %3706 = vmatpush1.bf16.msra.mxu1 %v3705_v50  ;;  %3196 = vmatprep.subr.bf16.mxu0 %v3195_v51  ;;  %v1872_v50 = vld [vmem:[%s4572_s26 + $0xb00] sm:$0xff]  ;;  %v3727_v51 = vpack.c.bf16 %v1875_v44, %v1873_v43  ;;  %v3217_v57 = vpack.c.bf16 %v780_v49, %v778_v48  ;;  %v3235_v43 = vpack.c.bf16 %v801_v38, %v799_v37  ;;  %v1894_v48 = vld [vmem:[%s4572_s26 + $0xbb0] sm:$0xff]  ;;  %v1915_v37 = vld [vmem:[%s4572_s26 + $0xc58] sm:$0xff] }
 0x204   : > { %3708 = vmatprep.subr.bf16.mxu1 %v3707_v55  ;;  %v1877_v55 = vld [vmem:[%s4572_s26 + $0xb28] sm:$0xff]  ;;  %v3729_v58 = vpack.c.bf16 %v1874_v52, %v1872_v50  ;;  %v798_v44 = vld [vmem:[%s4561_s28 + $0xba0] sm:$0xff]  ;;  %v805_v50 = vld [vmem:[%s4561_s28 + $0xbd8] sm:$0xff] }
 0x205   : > { %v803_v49 = vld [vmem:[%s4561_s28 + $0xbc8] sm:$0xff]  ;;  %v1899_v52 = vld [vmem:[%s4572_s26 + $0xbd8] sm:$0xff] }
 0x206   : > { %3198 = vmatpush1.bf16.msra.mxu0 %v3197_v61  ;;  %v784_v61 = vld [vmem:[%s4561_s28 + $0xb30] sm:$0xff]  ;;  %v423_v38 = vld [vmem:[#allocation2 + $0x68] sm:$0xff] }
 0x207   : > { %3710 = vmatpush1.bf16.msra.mxu1 %v3709_v62  ;;  %3200 = vmatprep.subr.bf16.mxu0 %v3199_v63  ;;  %v1876_v62 = vld [vmem:[%s4572_s26 + $0xb20] sm:$0xff]  ;;  %v3731_v63 = vpack.c.bf16 %v1879_v56, %v1877_v55  ;;  %v3221_v5 = vpack.c.bf16 %v784_v61, %v782_v60  ;;  %v3239_v55 = vpack.c.bf16 %v805_v50, %v803_v49  ;;  %v1898_v60 = vld [vmem:[%s4572_s26 + $0xbd0] sm:$0xff]  ;;  %v1917_v49 = vld [vmem:[%s4572_s26 + $0xc68] sm:$0xff] }
 0x208   : > { %3712 = vmatprep.subr.bf16.mxu1 %v3711_v3  ;;  %v1881_v3 = vld [vmem:[%s4572_s26 + $0xb48] sm:$0xff]  ;;  %v3733_v6 = vpack.c.bf16 %v1878_v0, %v1876_v62  ;;  %v802_v56 = vld [vmem:[%s4561_s28 + $0xbc0] sm:$0xff]  ;;  %v809_v62 = vld [vmem:[%s4561_s28 + $0xbf8] sm:$0xff] }
 0x209   : > { %v807_v61 = vld [vmem:[%s4561_s28 + $0xbe8] sm:$0xff]  ;;  %v1903_v0 = vld [vmem:[%s4572_s26 + $0xbf8] sm:$0xff] }
 0x20a   : > { %3202 = vmatpush1.bf16.msra.mxu0 %v3201_v9  ;;  %v788_v9 = vld [vmem:[%s4561_s28 + $0xb50] sm:$0xff]  ;;  %v1919_v50 = vld [vmem:[%s4572_s26 + $0xc78] sm:$0xff] }
 0x20b   : > { %3714 = vmatpush1.bf16.msra.mxu1 %v3713_v10  ;;  %3204 = vmatprep.subr.bf16.mxu0 %v3203_v11  ;;  %v1880_v10 = vld [vmem:[%s4572_s26 + $0xb40] sm:$0xff]  ;;  %v3735_v11 = vpack.c.bf16 %v1883_v4, %v1881_v3  ;;  %v3225_v17 = vpack.c.bf16 %v788_v9, %v786_v8  ;;  %v3243_v3 = vpack.c.bf16 %v809_v62, %v807_v61  ;;  %v1902_v8 = vld [vmem:[%s4572_s26 + $0xbf0] sm:$0xff]  ;;  %v1921_v61 = vld [vmem:[%s4572_s26 + $0xc88] sm:$0xff] }
 0x20c   : > { %3716 = vmatprep.subr.bf16.mxu1 %v3715_v15  ;;  %v1885_v15 = vld [vmem:[%s4572_s26 + $0xb68] sm:$0xff]  ;;  %v3737_v18 = vpack.c.bf16 %v1882_v12, %v1880_v10  ;;  %v806_v4 = vld [vmem:[%s4561_s28 + $0xbe0] sm:$0xff]  ;;  %v813_v10 = vld [vmem:[%s4561_s28 + $0xc18] sm:$0xff] }
 0x20d   : > { %v811_v9 = vld [vmem:[%s4561_s28 + $0xc08] sm:$0xff]  ;;  %v1907_v12 = vld [vmem:[%s4572_s26 + $0xc18] sm:$0xff] }
 0x20e   : > { %3206 = vmatpush1.bf16.msra.mxu0 %v3205_v21  ;;  %v792_v21 = vld [vmem:[%s4561_s28 + $0xb70] sm:$0xff]  ;;  %v1923_v62 = vld [vmem:[%s4572_s26 + $0xc98] sm:$0xff] }
 0x20f   : > { %3718 = vmatpush1.bf16.msra.mxu1 %v3717_v22  ;;  %3208 = vmatprep.subr.bf16.mxu0 %v3207_v23  ;;  %v1884_v22 = vld [vmem:[%s4572_s26 + $0xb60] sm:$0xff]  ;;  %v3739_v23 = vpack.c.bf16 %v1887_v16, %v1885_v15  ;;  %v3229_v29 = vpack.c.bf16 %v792_v21, %v790_v20  ;;  %v3247_v15 = vpack.c.bf16 %v813_v10, %v811_v9  ;;  %v1906_v20 = vld [vmem:[%s4572_s26 + $0xc10] sm:$0xff]  ;;  %v1925_v9 = vld [vmem:[%s4572_s26 + $0xca8] sm:$0xff] }
 0x210   : > { %3720 = vmatprep.subr.bf16.mxu1 %v3719_v27  ;;  %v1889_v27 = vld [vmem:[%s4572_s26 + $0xb88] sm:$0xff]  ;;  %v3741_v30 = vpack.c.bf16 %v1886_v24, %v1884_v22  ;;  %v810_v16 = vld [vmem:[%s4561_s28 + $0xc00] sm:$0xff]  ;;  %v817_v22 = vld [vmem:[%s4561_s28 + $0xc38] sm:$0xff] }
 0x211   : > { %v815_v21 = vld [vmem:[%s4561_s28 + $0xc28] sm:$0xff]  ;;  %v1911_v24 = vld [vmem:[%s4572_s26 + $0xc38] sm:$0xff] }
 0x212   : > { %3210 = vmatpush1.bf16.msra.mxu0 %v3209_v33  ;;  %v796_v33 = vld [vmem:[%s4561_s28 + $0xb90] sm:$0xff]  ;;  %v1927_v10 = vld [vmem:[%s4572_s26 + $0xcb8] sm:$0xff] }
 0x213   : > { %3722 = vmatpush1.bf16.msra.mxu1 %v3721_v34  ;;  %3212 = vmatprep.subr.bf16.mxu0 %v3211_v35  ;;  %v1888_v34 = vld [vmem:[%s4572_s26 + $0xb80] sm:$0xff]  ;;  %v3743_v35 = vpack.c.bf16 %v1891_v28, %v1889_v27  ;;  %v3233_v41 = vpack.c.bf16 %v796_v33, %v794_v32  ;;  %v3251_v28 = vpack.c.bf16 %v817_v22, %v815_v21  ;;  %v1910_v33 = vld [vmem:[%s4572_s26 + $0xc30] sm:$0xff]  ;;  %v1929_v21 = vld [vmem:[%s4572_s26 + $0xcc8] sm:$0xff] }
 0x214   : > { %3724 = vmatprep.subr.bf16.mxu1 %v3723_v39  ;;  %v1893_v39 = vld [vmem:[%s4572_s26 + $0xba8] sm:$0xff]  ;;  %v3745_v42 = vpack.c.bf16 %v1890_v36, %v1888_v34  ;;  %v1931_v22 = vld [vmem:[%s4572_s26 + $0xcd8] sm:$0xff] }
 0x215   : > { %v819_v34 = vld [vmem:[%s4561_s28 + $0xc48] sm:$0xff] }
 0x216   : > { %3214 = vmatpush1.bf16.msra.mxu0 %v3213_v45  ;;  %v800_v45 = vld [vmem:[%s4561_s28 + $0xbb0] sm:$0xff] }
 0x217   : > { %3726 = vmatpush1.bf16.msra.mxu1 %v3725_v46  ;;  %3216 = vmatprep.subr.bf16.mxu0 %v3215_v47  ;;  %v1892_v46 = vld [vmem:[%s4572_s26 + $0xba0] sm:$0xff]  ;;  %v3747_v47 = vpack.c.bf16 %v1895_v40, %v1893_v39  ;;  %v3237_v53 = vpack.c.bf16 %v800_v45, %v798_v44  ;;  %v1913_v36 = vld [vmem:[%s4572_s26 + $0xc48] sm:$0xff] }
 0x218   : > { %3728 = vmatprep.subr.bf16.mxu1 %v3727_v51  ;;  %v1897_v51 = vld [vmem:[%s4572_s26 + $0xbc8] sm:$0xff]  ;;  %v3749_v54 = vpack.c.bf16 %v1894_v48, %v1892_v46  ;;  %v1912_v44 = vld [vmem:[%s4572_s26 + $0xc40] sm:$0xff]  ;;  %v3767_v45 = vpack.c.bf16 %v1915_v37, %v1913_v36  ;;  %v1914_v46 = vld [vmem:[%s4572_s26 + $0xc50] sm:$0xff] }
 0x219   : > { %v825_v48 = vld [vmem:[%s4561_s28 + $0xc78] sm:$0xff] }
 0x21a   : > { %3218 = vmatpush1.bf16.msra.mxu0 %v3217_v57  ;;  %v804_v57 = vld [vmem:[%s4561_s28 + $0xbd0] sm:$0xff] }
 0x21b   : > { %3730 = vmatpush1.bf16.msra.mxu1 %v3729_v58  ;;  %3220 = vmatprep.subr.bf16.mxu0 %v3219_v59  ;;  %v1896_v58 = vld [vmem:[%s4572_s26 + $0xbc0] sm:$0xff]  ;;  %v3751_v59 = vpack.c.bf16 %v1899_v52, %v1897_v51  ;;  %v3241_v1 = vpack.c.bf16 %v804_v57, %v802_v56  ;;  %v3769_v52 = vpack.c.bf16 %v1914_v46, %v1912_v44  ;;  %v845_v44 = vld [vmem:[%s4561_s28 + $0xd18] sm:$0xff] }
 0x21c   : > { %3732 = vmatprep.subr.bf16.mxu1 %v3731_v63  ;;  %v1901_v63 = vld [vmem:[%s4572_s26 + $0xbe8] sm:$0xff]  ;;  %v3753_v2 = vpack.c.bf16 %v1898_v60, %v1896_v58  ;;  %v1916_v56 = vld [vmem:[%s4572_s26 + $0xc60] sm:$0xff]  ;;  %v3771_v57 = vpack.c.bf16 %v1919_v50, %v1917_v49  ;;  %v1918_v58 = vld [vmem:[%s4572_s26 + $0xc70] sm:$0xff] }
 0x21d   : > { %v829_v60 = vld [vmem:[%s4561_s28 + $0xc98] sm:$0xff]  ;;  %v842_v50 = vld [vmem:[%s4561_s28 + $0xd00] sm:$0xff] }
 0x21e   : > { %3222 = vmatpush1.bf16.msra.mxu0 %v3221_v5  ;;  %v808_v5 = vld [vmem:[%s4561_s28 + $0xbf0] sm:$0xff]  ;;  %v1939_v46 = vld [vmem:[%s4572_s26 + $0xd18] sm:$0xff] }
 0x21f   : > { %3734 = vmatpush1.bf16.msra.mxu1 %v3733_v6  ;;  %3224 = vmatprep.subr.bf16.mxu0 %v3223_v7  ;;  %v1900_v6 = vld [vmem:[%s4572_s26 + $0xbe0] sm:$0xff]  ;;  %v3755_v7 = vpack.c.bf16 %v1903_v0, %v1901_v63  ;;  %v3245_v13 = vpack.c.bf16 %v808_v5, %v806_v4  ;;  %v3773_v0 = vpack.c.bf16 %v1918_v58, %v1916_v56  ;;  %v849_v56 = vld [vmem:[%s4561_s28 + $0xd38] sm:$0xff] }
 0x220   : > { %3736 = vmatprep.subr.bf16.mxu1 %v3735_v11  ;;  %v1905_v11 = vld [vmem:[%s4572_s26 + $0xc08] sm:$0xff]  ;;  %v3757_v14 = vpack.c.bf16 %v1902_v8, %v1900_v6  ;;  %v1920_v4 = vld [vmem:[%s4572_s26 + $0xc80] sm:$0xff]  ;;  %v3775_v5 = vpack.c.bf16 %v1923_v62, %v1921_v61  ;;  %v1922_v6 = vld [vmem:[%s4572_s26 + $0xc90] sm:$0xff] }
 0x221   : > { %v833_v8 = vld [vmem:[%s4561_s28 + $0xcb8] sm:$0xff]  ;;  %v846_v62 = vld [vmem:[%s4561_s28 + $0xd20] sm:$0xff] }
 0x222   : > { %3226 = vmatpush1.bf16.msra.mxu0 %v3225_v17  ;;  %v812_v17 = vld [vmem:[%s4561_s28 + $0xc10] sm:$0xff]  ;;  %v1943_v58 = vld [vmem:[%s4572_s26 + $0xd38] sm:$0xff] }
 0x223   : > { %3738 = vmatpush1.bf16.msra.mxu1 %v3737_v18  ;;  %3228 = vmatprep.subr.bf16.mxu0 %v3227_v19  ;;  %v1904_v18 = vld [vmem:[%s4572_s26 + $0xc00] sm:$0xff]  ;;  %v3759_v19 = vpack.c.bf16 %v1907_v12, %v1905_v11  ;;  %v3249_v26 = vpack.c.bf16 %v812_v17, %v810_v16  ;;  %v3777_v12 = vpack.c.bf16 %v1922_v6, %v1920_v4  ;;  %v853_v4 = vld [vmem:[%s4561_s28 + $0xd58] sm:$0xff] }
 0x224   : > { %3740 = vmatprep.subr.bf16.mxu1 %v3739_v23  ;;  %v1909_v23 = vld [vmem:[%s4572_s26 + $0xc28] sm:$0xff]  ;;  %v3761_v27 = vpack.c.bf16 %v1906_v20, %v1904_v18  ;;  %v1924_v16 = vld [vmem:[%s4572_s26 + $0xca0] sm:$0xff]  ;;  %v3779_v17 = vpack.c.bf16 %v1927_v10, %v1925_v9  ;;  %v1926_v18 = vld [vmem:[%s4572_s26 + $0xcb0] sm:$0xff] }
 0x225   : > { %v3763_v32 = vpack.c.bf16 %v1911_v24, %v1909_v23  ;;  %v837_v20 = vld [vmem:[%s4561_s28 + $0xcd8] sm:$0xff]  ;;  %v3781_v24 = vpack.c.bf16 %v1926_v18, %v1924_v16  ;;  %v850_v10 = vld [vmem:[%s4561_s28 + $0xd40] sm:$0xff] }
 0x226   : > { %3230 = vmatpush1.bf16.msra.mxu0 %v3229_v29  ;;  %v814_v29 = vld [vmem:[%s4561_s28 + $0xc20] sm:$0xff]  ;;  %v857_v16 = vld [vmem:[%s4561_s28 + $0xd78] sm:$0xff] }
 0x227   : > { %3742 = vmatpush1.bf16.msra.mxu1 %v3741_v30  ;;  %3232 = vmatprep.subr.bf16.mxu0 %v3231_v31  ;;  %v816_v30 = vld [vmem:[%s4561_s28 + $0xc30] sm:$0xff]  ;;  %v1908_v31 = vld [vmem:[%s4572_s26 + $0xc20] sm:$0xff]  ;;  %v1947_v6 = vld [vmem:[%s4572_s26 + $0xd58] sm:$0xff] }
 0x228   : > { %3744 = vmatprep.subr.bf16.mxu1 %v3743_v35  ;;  %v821_v35 = vld [vmem:[%s4561_s28 + $0xc58] sm:$0xff]  ;;  %v3253_v39 = vpack.c.bf16 %v816_v30, %v814_v29  ;;  %v3765_v40 = vpack.c.bf16 %v1910_v33, %v1908_v31  ;;  %v3783_v29 = vpack.c.bf16 %v1931_v22, %v1929_v21  ;;  %v839_v31 = vld [vmem:[%s4561_s28 + $0xce8] sm:$0xff]  ;;  %v854_v22 = vld [vmem:[%s4561_s28 + $0xd60] sm:$0xff] }
 0x229   : > { %v1930_v30 = vld [vmem:[%s4572_s26 + $0xcd0] sm:$0xff]  ;;  %v1933_v33 = vld [vmem:[%s4572_s26 + $0xce8] sm:$0xff]  ;;  %v1951_v18 = vld [vmem:[%s4572_s26 + $0xd78] sm:$0xff] }
 0x22a   : > { %3234 = vmatpush1.bf16.msra.mxu0 %v3233_v41  ;;  %v3255_v41 = vpack.c.bf16 %v821_v35, %v819_v34  ;;  %v1935_v34 = vld [vmem:[%s4572_s26 + $0xcf8] sm:$0xff] }
 0x22b   : > { %3746 = vmatpush1.bf16.msra.mxu1 %v3745_v42  ;;  %3236 = vmatprep.subr.bf16.mxu0 %v3235_v43  ;;  %v818_v42 = vld [vmem:[%s4561_s28 + $0xc40] sm:$0xff]  ;;  %v820_v43 = vld [vmem:[%s4561_s28 + $0xc50] sm:$0xff] }
 0x22c   : > { %3748 = vmatprep.subr.bf16.mxu1 %v3747_v47  ;;  %v823_v47 = vld [vmem:[%s4561_s28 + $0xc68] sm:$0xff]  ;;  %v3257_v51 = vpack.c.bf16 %v820_v43, %v818_v42  ;;  %v1934_v42 = vld [vmem:[%s4572_s26 + $0xcf0] sm:$0xff] }
 0x22d   : > { %v843_v43 = vld [vmem:[%s4561_s28 + $0xd08] sm:$0xff] }
 0x22e   : > { %3238 = vmatpush1.bf16.msra.mxu0 %v3237_v53  ;;  %v3259_v53 = vpack.c.bf16 %v825_v48, %v823_v47  ;;  %v3279_v49 = vpack.c.bf16 %v845_v44, %v843_v43 }
 0x22f   : > { %3750 = vmatpush1.bf16.msra.mxu1 %v3749_v54  ;;  %3240 = vmatprep.subr.bf16.mxu0 %v3239_v55  ;;  %v822_v54 = vld [vmem:[%s4561_s28 + $0xc60] sm:$0xff]  ;;  %v824_v55 = vld [vmem:[%s4561_s28 + $0xc70] sm:$0xff] }
 0x230   : > { %3752 = vmatprep.subr.bf16.mxu1 %v3751_v59  ;;  %v827_v59 = vld [vmem:[%s4561_s28 + $0xc88] sm:$0xff]  ;;  %v3261_v63 = vpack.c.bf16 %v824_v55, %v822_v54  ;;  %v1938_v54 = vld [vmem:[%s4572_s26 + $0xd10] sm:$0xff] }
 0x231   : > { %v847_v55 = vld [vmem:[%s4561_s28 + $0xd28] sm:$0xff] }
 0x232   : > { %3242 = vmatpush1.bf16.msra.mxu0 %v3241_v1  ;;  %v3263_v1 = vpack.c.bf16 %v829_v60, %v827_v59  ;;  %v3283_v61 = vpack.c.bf16 %v849_v56, %v847_v55 }
 0x233   : > { %3754 = vmatpush1.bf16.msra.mxu1 %v3753_v2  ;;  %3244 = vmatprep.subr.bf16.mxu0 %v3243_v3  ;;  %v826_v2 = vld [vmem:[%s4561_s28 + $0xc80] sm:$0xff]  ;;  %v828_v3 = vld [vmem:[%s4561_s28 + $0xc90] sm:$0xff] }
 0x234   : > { %3756 = vmatprep.subr.bf16.mxu1 %v3755_v7  ;;  %v831_v7 = vld [vmem:[%s4561_s28 + $0xca8] sm:$0xff]  ;;  %v3265_v11 = vpack.c.bf16 %v828_v3, %v826_v2  ;;  %v1942_v2 = vld [vmem:[%s4572_s26 + $0xd30] sm:$0xff] }
 0x235   : > { %v851_v3 = vld [vmem:[%s4561_s28 + $0xd48] sm:$0xff] }
 0x236   : > { %3246 = vmatpush1.bf16.msra.mxu0 %v3245_v13  ;;  %v3267_v13 = vpack.c.bf16 %v833_v8, %v831_v7  ;;  %v3287_v9 = vpack.c.bf16 %v853_v4, %v851_v3 }
 0x237   : > { %3758 = vmatpush1.bf16.msra.mxu1 %v3757_v14  ;;  %3248 = vmatprep.subr.bf16.mxu0 %v3247_v15  ;;  %v830_v14 = vld [vmem:[%s4561_s28 + $0xca0] sm:$0xff]  ;;  %v832_v15 = vld [vmem:[%s4561_s28 + $0xcb0] sm:$0xff] }
 0x238   : > { %3760 = vmatprep.subr.bf16.mxu1 %v3759_v19  ;;  %v835_v19 = vld [vmem:[%s4561_s28 + $0xcc8] sm:$0xff]  ;;  %v3269_v23 = vpack.c.bf16 %v832_v15, %v830_v14  ;;  %v1946_v14 = vld [vmem:[%s4572_s26 + $0xd50] sm:$0xff] }
 0x239   : > { %1370 = vmatmul.mubr.f32.vlgmr.msra.gmra.mrb[0].mxu0 %v420_v25  ;;  %v855_v15 = vld [vmem:[%s4561_s28 + $0xd68] sm:$0xff] }
 0x23a   : > { %3250 = vmatpush1.bf16.msra.mxu0 %v3249_v26  ;;  %2464 = vmatmul.mubr.f32.vlgmr.msra.gmra.mrb[0].mxu1 %v420_v25  ;;  %v3271_v25 = vpack.c.bf16 %v837_v20, %v835_v19  ;;  %v834_v26 = vld [vmem:[%s4561_s28 + $0xcc0] sm:$0xff]  ;;  %v3291_v21 = vpack.c.bf16 %v857_v16, %v855_v15 }
 0x23b   : > { %3762 = vmatpush1.bf16.msra.mxu1 %v3761_v27  ;;  %3252 = vmatprep.subr.bf16.mxu0 %v3251_v28  ;;  %v836_v27 = vld [vmem:[%s4561_s28 + $0xcd0] sm:$0xff]  ;;  %v1928_v28 = vld [vmem:[%s4572_s26 + $0xcc0] sm:$0xff] }
 0x23c   : > { %3764 = vmatprep.subr.bf16.mxu1 %v3763_v32  ;;  %1440 = vmatprep.mubr.f32.mxu0 %v423_v38  ;;  %v841_v32 = vld [vmem:[%s4561_s28 + $0xcf8] sm:$0xff]  ;;  %v3273_v35 = vpack.c.bf16 %v836_v27, %v834_v26  ;;  %v3785_v36 = vpack.c.bf16 %v1930_v30, %v1928_v28  ;;  %v859_v27 = vld [vmem:[%s4561_s28 + $0xd88] sm:$0xff] }
 0x23d   : > { %2534 = vmatprep.mubr.f32.mxu1 %v423_v38  ;;  %v3275_v37 = vpack.c.bf16 %v841_v32, %v839_v31  ;;  %v838_v38 = vld [vmem:[%s4561_s28 + $0xce0] sm:$0xff]  ;;  %v1950_v26 = vld [vmem:[%s4572_s26 + $0xd70] sm:$0xff] }
 0x23e   : > { %3254 = vmatpush1.bf16.msra.mxu0 %v3253_v39  ;;  %v840_v39 = vld [vmem:[%s4561_s28 + $0xcf0] sm:$0xff]  ;;  %v861_v28 = vld [vmem:[%s4561_s28 + $0xd98] sm:$0xff] }
 0x23f   : > { %3766 = vmatpush1.bf16.msra.mxu1 %v3765_v40  ;;  %3256 = vmatprep.subr.bf16.mxu0 %v3255_v41  ;;  %v1932_v40 = vld [vmem:[%s4572_s26 + $0xce0] sm:$0xff]  ;;  %v3787_v41 = vpack.c.bf16 %v1935_v34, %v1933_v33  ;;  %v3277_v47 = vpack.c.bf16 %v840_v39, %v838_v38  ;;  %v1955_v30 = vld [vmem:[%s4572_s26 + $0xd98] sm:$0xff]  ;;  %v3295_v33 = vpack.c.bf16 %v861_v28, %v859_v27  ;;  %v1954_v38 = vld [vmem:[%s4572_s26 + $0xd90] sm:$0xff] }
 0x240   : > { %3768 = vmatprep.subr.bf16.mxu1 %v3767_v45  ;;  %v1937_v45 = vld [vmem:[%s4572_s26 + $0xd08] sm:$0xff]  ;;  %v3789_v48 = vpack.c.bf16 %v1934_v42, %v1932_v40  ;;  %v858_v34 = vld [vmem:[%s4561_s28 + $0xd80] sm:$0xff]  ;;  %v865_v40 = vld [vmem:[%s4561_s28 + $0xdb8] sm:$0xff] }
 0x241   : > { %v863_v39 = vld [vmem:[%s4561_s28 + $0xda8] sm:$0xff]  ;;  %v1959_v42 = vld [vmem:[%s4572_s26 + $0xdb8] sm:$0xff] }
 0x242   : > { %3258 = vmatpush1.bf16.msra.mxu0 %v3257_v51  ;;  %v844_v51 = vld [vmem:[%s4561_s28 + $0xd10] sm:$0xff]  ;;  %v422_v27 = vld [vmem:[#allocation2 + $0x60] sm:$0xff] }
 0x243   : > { %3770 = vmatpush1.bf16.msra.mxu1 %v3769_v52  ;;  %3260 = vmatprep.subr.bf16.mxu0 %v3259_v53  ;;  %v1936_v52 = vld [vmem:[%s4572_s26 + $0xd00] sm:$0xff]  ;;  %v3791_v53 = vpack.c.bf16 %v1939_v46, %v1937_v45  ;;  %v3281_v59 = vpack.c.bf16 %v844_v51, %v842_v50  ;;  %v3299_v45 = vpack.c.bf16 %v865_v40, %v863_v39  ;;  %v1958_v50 = vld [vmem:[%s4572_s26 + $0xdb0] sm:$0xff]  ;;  %v1979_v39 = vld [vmem:[%s4572_s26 + $0xe58] sm:$0xff] }
 0x244   : > { %3772 = vmatprep.subr.bf16.mxu1 %v3771_v57  ;;  %v1941_v57 = vld [vmem:[%s4572_s26 + $0xd28] sm:$0xff]  ;;  %v3793_v60 = vpack.c.bf16 %v1938_v54, %v1936_v52  ;;  %v862_v46 = vld [vmem:[%s4561_s28 + $0xda0] sm:$0xff]  ;;  %v869_v52 = vld [vmem:[%s4561_s28 + $0xdd8] sm:$0xff] }
 0x245   : > { %v867_v51 = vld [vmem:[%s4561_s28 + $0xdc8] sm:$0xff]  ;;  %v1963_v54 = vld [vmem:[%s4572_s26 + $0xdd8] sm:$0xff] }
 0x246   : > { %3262 = vmatpush1.bf16.msra.mxu0 %v3261_v63  ;;  %v848_v63 = vld [vmem:[%s4561_s28 + $0xd30] sm:$0xff]  ;;  %v425_v40 = vld [vmem:[#allocation2 + $0x78] sm:$0xff] }
 0x247   : > { %3774 = vmatpush1.bf16.msra.mxu1 %v3773_v0  ;;  %3264 = vmatprep.subr.bf16.mxu0 %v3263_v1  ;;  %v1940_v0 = vld [vmem:[%s4572_s26 + $0xd20] sm:$0xff]  ;;  %v3795_v1 = vpack.c.bf16 %v1943_v58, %v1941_v57  ;;  %v3285_v7 = vpack.c.bf16 %v848_v63, %v846_v62  ;;  %v3303_v57 = vpack.c.bf16 %v869_v52, %v867_v51  ;;  %v1962_v62 = vld [vmem:[%s4572_s26 + $0xdd0] sm:$0xff]  ;;  %v1981_v51 = vld [vmem:[%s4572_s26 + $0xe68] sm:$0xff] }
 0x248   : > { %3776 = vmatprep.subr.bf16.mxu1 %v3775_v5  ;;  %v1945_v5 = vld [vmem:[%s4572_s26 + $0xd48] sm:$0xff]  ;;  %v3797_v8 = vpack.c.bf16 %v1942_v2, %v1940_v0  ;;  %v866_v58 = vld [vmem:[%s4561_s28 + $0xdc0] sm:$0xff]  ;;  %v873_v0 = vld [vmem:[%s4561_s28 + $0xdf8] sm:$0xff] }
 0x249   : > { %v871_v63 = vld [vmem:[%s4561_s28 + $0xde8] sm:$0xff]  ;;  %v1967_v2 = vld [vmem:[%s4572_s26 + $0xdf8] sm:$0xff] }
 0x24a   : > { %3266 = vmatpush1.bf16.msra.mxu0 %v3265_v11  ;;  %v852_v11 = vld [vmem:[%s4561_s28 + $0xd50] sm:$0xff]  ;;  %v1983_v52 = vld [vmem:[%s4572_s26 + $0xe78] sm:$0xff] }
 0x24b   : > { %3778 = vmatpush1.bf16.msra.mxu1 %v3777_v12  ;;  %3268 = vmatprep.subr.bf16.mxu0 %v3267_v13  ;;  %v1944_v12 = vld [vmem:[%s4572_s26 + $0xd40] sm:$0xff]  ;;  %v3799_v13 = vpack.c.bf16 %v1947_v6, %v1945_v5  ;;  %v3289_v19 = vpack.c.bf16 %v852_v11, %v850_v10  ;;  %v3307_v5 = vpack.c.bf16 %v873_v0, %v871_v63  ;;  %v1966_v10 = vld [vmem:[%s4572_s26 + $0xdf0] sm:$0xff]  ;;  %v1985_v63 = vld [vmem:[%s4572_s26 + $0xe88] sm:$0xff] }
 0x24c   : > { %3780 = vmatprep.subr.bf16.mxu1 %v3779_v17  ;;  %v1949_v17 = vld [vmem:[%s4572_s26 + $0xd68] sm:$0xff]  ;;  %v3801_v20 = vpack.c.bf16 %v1946_v14, %v1944_v12  ;;  %v870_v6 = vld [vmem:[%s4561_s28 + $0xde0] sm:$0xff]  ;;  %v877_v12 = vld [vmem:[%s4561_s28 + $0xe18] sm:$0xff] }
 0x24d   : > { %v875_v11 = vld [vmem:[%s4561_s28 + $0xe08] sm:$0xff]  ;;  %v1971_v14 = vld [vmem:[%s4572_s26 + $0xe18] sm:$0xff] }
 0x24e   : > { %3270 = vmatpush1.bf16.msra.mxu0 %v3269_v23  ;;  %v856_v23 = vld [vmem:[%s4561_s28 + $0xd70] sm:$0xff]  ;;  %v1987_v0 = vld [vmem:[%s4572_s26 + $0xe98] sm:$0xff] }
 0x24f   : > { %3782 = vmatpush1.bf16.msra.mxu1 %v3781_v24  ;;  %3272 = vmatprep.subr.bf16.mxu0 %v3271_v25  ;;  %v1948_v24 = vld [vmem:[%s4572_s26 + $0xd60] sm:$0xff]  ;;  %v3803_v25 = vpack.c.bf16 %v1951_v18, %v1949_v17  ;;  %v3293_v31 = vpack.c.bf16 %v856_v23, %v854_v22  ;;  %v3311_v17 = vpack.c.bf16 %v877_v12, %v875_v11  ;;  %v1970_v22 = vld [vmem:[%s4572_s26 + $0xe10] sm:$0xff]  ;;  %v1989_v11 = vld [vmem:[%s4572_s26 + $0xea8] sm:$0xff] }
 0x250   : > { %3784 = vmatprep.subr.bf16.mxu1 %v3783_v29  ;;  %v1953_v29 = vld [vmem:[%s4572_s26 + $0xd88] sm:$0xff]  ;;  %v3805_v32 = vpack.c.bf16 %v1950_v26, %v1948_v24  ;;  %v874_v18 = vld [vmem:[%s4561_s28 + $0xe00] sm:$0xff]  ;;  %v881_v24 = vld [vmem:[%s4561_s28 + $0xe38] sm:$0xff] }
 0x251   : > { %v879_v23 = vld [vmem:[%s4561_s28 + $0xe28] sm:$0xff]  ;;  %v1975_v26 = vld [vmem:[%s4572_s26 + $0xe38] sm:$0xff] }
 0x252   : > { %3274 = vmatpush1.bf16.msra.mxu0 %v3273_v35  ;;  %v860_v35 = vld [vmem:[%s4561_s28 + $0xd90] sm:$0xff]  ;;  %v1991_v12 = vld [vmem:[%s4572_s26 + $0xeb8] sm:$0xff] }
 0x253   : > { %3786 = vmatpush1.bf16.msra.mxu1 %v3785_v36  ;;  %3276 = vmatprep.subr.bf16.mxu0 %v3275_v37  ;;  %v1952_v36 = vld [vmem:[%s4572_s26 + $0xd80] sm:$0xff]  ;;  %v3807_v37 = vpack.c.bf16 %v1955_v30, %v1953_v29  ;;  %v3297_v43 = vpack.c.bf16 %v860_v35, %v858_v34  ;;  %v3315_v30 = vpack.c.bf16 %v881_v24, %v879_v23  ;;  %v1974_v35 = vld [vmem:[%s4572_s26 + $0xe30] sm:$0xff]  ;;  %v1993_v23 = vld [vmem:[%s4572_s26 + $0xec8] sm:$0xff] }
 0x254   : > { %3788 = vmatprep.subr.bf16.mxu1 %v3787_v41  ;;  %v1957_v41 = vld [vmem:[%s4572_s26 + $0xda8] sm:$0xff]  ;;  %v3809_v44 = vpack.c.bf16 %v1954_v38, %v1952_v36  ;;  %v1995_v24 = vld [vmem:[%s4572_s26 + $0xed8] sm:$0xff] }
 0x255   : > { %v883_v36 = vld [vmem:[%s4561_s28 + $0xe48] sm:$0xff] }
 0x256   : > { %3278 = vmatpush1.bf16.msra.mxu0 %v3277_v47  ;;  %v864_v47 = vld [vmem:[%s4561_s28 + $0xdb0] sm:$0xff] }
 0x257   : > { %3790 = vmatpush1.bf16.msra.mxu1 %v3789_v48  ;;  %3280 = vmatprep.subr.bf16.mxu0 %v3279_v49  ;;  %v1956_v48 = vld [vmem:[%s4572_s26 + $0xda0] sm:$0xff]  ;;  %v3811_v49 = vpack.c.bf16 %v1959_v42, %v1957_v41  ;;  %v3301_v55 = vpack.c.bf16 %v864_v47, %v862_v46  ;;  %v1977_v38 = vld [vmem:[%s4572_s26 + $0xe48] sm:$0xff] }
 0x258   : > { %3792 = vmatprep.subr.bf16.mxu1 %v3791_v53  ;;  %v1961_v53 = vld [vmem:[%s4572_s26 + $0xdc8] sm:$0xff]  ;;  %v3813_v56 = vpack.c.bf16 %v1958_v50, %v1956_v48  ;;  %v1976_v46 = vld [vmem:[%s4572_s26 + $0xe40] sm:$0xff]  ;;  %v3831_v47 = vpack.c.bf16 %v1979_v39, %v1977_v38  ;;  %v1978_v48 = vld [vmem:[%s4572_s26 + $0xe50] sm:$0xff] }
 0x259   : > { %v889_v50 = vld [vmem:[%s4561_s28 + $0xe78] sm:$0xff] }
 0x25a   : > { %3282 = vmatpush1.bf16.msra.mxu0 %v3281_v59  ;;  %v868_v59 = vld [vmem:[%s4561_s28 + $0xdd0] sm:$0xff] }
 0x25b   : > { %3794 = vmatpush1.bf16.msra.mxu1 %v3793_v60  ;;  %3284 = vmatprep.subr.bf16.mxu0 %v3283_v61  ;;  %v1960_v60 = vld [vmem:[%s4572_s26 + $0xdc0] sm:$0xff]  ;;  %v3815_v61 = vpack.c.bf16 %v1963_v54, %v1961_v53  ;;  %v3305_v3 = vpack.c.bf16 %v868_v59, %v866_v58  ;;  %v3833_v54 = vpack.c.bf16 %v1978_v48, %v1976_v46  ;;  %v909_v46 = vld [vmem:[%s4561_s28 + $0xf18] sm:$0xff] }
 0x25c   : > { %3796 = vmatprep.subr.bf16.mxu1 %v3795_v1  ;;  %v1965_v1 = vld [vmem:[%s4572_s26 + $0xde8] sm:$0xff]  ;;  %v3817_v4 = vpack.c.bf16 %v1962_v62, %v1960_v60  ;;  %v1980_v58 = vld [vmem:[%s4572_s26 + $0xe60] sm:$0xff]  ;;  %v3835_v59 = vpack.c.bf16 %v1983_v52, %v1981_v51  ;;  %v1982_v60 = vld [vmem:[%s4572_s26 + $0xe70] sm:$0xff] }
 0x25d   : > { %v893_v62 = vld [vmem:[%s4561_s28 + $0xe98] sm:$0xff]  ;;  %v906_v52 = vld [vmem:[%s4561_s28 + $0xf00] sm:$0xff] }
 0x25e   : > { %3286 = vmatpush1.bf16.msra.mxu0 %v3285_v7  ;;  %v872_v7 = vld [vmem:[%s4561_s28 + $0xdf0] sm:$0xff]  ;;  %v2003_v48 = vld [vmem:[%s4572_s26 + $0xf18] sm:$0xff] }
 0x25f   : > { %3798 = vmatpush1.bf16.msra.mxu1 %v3797_v8  ;;  %3288 = vmatprep.subr.bf16.mxu0 %v3287_v9  ;;  %v1964_v8 = vld [vmem:[%s4572_s26 + $0xde0] sm:$0xff]  ;;  %v3819_v9 = vpack.c.bf16 %v1967_v2, %v1965_v1  ;;  %v3309_v15 = vpack.c.bf16 %v872_v7, %v870_v6  ;;  %v3837_v2 = vpack.c.bf16 %v1982_v60, %v1980_v58  ;;  %v913_v58 = vld [vmem:[%s4561_s28 + $0xf38] sm:$0xff] }
 0x260   : > { %3800 = vmatprep.subr.bf16.mxu1 %v3799_v13  ;;  %v1969_v13 = vld [vmem:[%s4572_s26 + $0xe08] sm:$0xff]  ;;  %v3821_v16 = vpack.c.bf16 %v1966_v10, %v1964_v8  ;;  %v1984_v6 = vld [vmem:[%s4572_s26 + $0xe80] sm:$0xff]  ;;  %v3839_v7 = vpack.c.bf16 %v1987_v0, %v1985_v63  ;;  %v1986_v8 = vld [vmem:[%s4572_s26 + $0xe90] sm:$0xff] }
 0x261   : > { %v897_v10 = vld [vmem:[%s4561_s28 + $0xeb8] sm:$0xff]  ;;  %v910_v0 = vld [vmem:[%s4561_s28 + $0xf20] sm:$0xff] }
 0x262   : > { %3290 = vmatpush1.bf16.msra.mxu0 %v3289_v19  ;;  %v876_v19 = vld [vmem:[%s4561_s28 + $0xe10] sm:$0xff]  ;;  %v2007_v60 = vld [vmem:[%s4572_s26 + $0xf38] sm:$0xff] }
 0x263   : > { %3802 = vmatpush1.bf16.msra.mxu1 %v3801_v20  ;;  %3292 = vmatprep.subr.bf16.mxu0 %v3291_v21  ;;  %v1968_v20 = vld [vmem:[%s4572_s26 + $0xe00] sm:$0xff]  ;;  %v3823_v21 = vpack.c.bf16 %v1971_v14, %v1969_v13  ;;  %v3313_v28 = vpack.c.bf16 %v876_v19, %v874_v18  ;;  %v3841_v14 = vpack.c.bf16 %v1986_v8, %v1984_v6  ;;  %v917_v6 = vld [vmem:[%s4561_s28 + $0xf58] sm:$0xff] }
 0x264   : > { %3804 = vmatprep.subr.bf16.mxu1 %v3803_v25  ;;  %v1973_v25 = vld [vmem:[%s4572_s26 + $0xe28] sm:$0xff]  ;;  %v3825_v29 = vpack.c.bf16 %v1970_v22, %v1968_v20  ;;  %v1988_v18 = vld [vmem:[%s4572_s26 + $0xea0] sm:$0xff]  ;;  %v3843_v19 = vpack.c.bf16 %v1991_v12, %v1989_v11  ;;  %v1990_v20 = vld [vmem:[%s4572_s26 + $0xeb0] sm:$0xff] }
 0x265   : > { %v3827_v34 = vpack.c.bf16 %v1975_v26, %v1973_v25  ;;  %v901_v22 = vld [vmem:[%s4561_s28 + $0xed8] sm:$0xff]  ;;  %v3845_v26 = vpack.c.bf16 %v1990_v20, %v1988_v18  ;;  %v914_v12 = vld [vmem:[%s4561_s28 + $0xf40] sm:$0xff] }
 0x266   : > { %3294 = vmatpush1.bf16.msra.mxu0 %v3293_v31  ;;  %v878_v31 = vld [vmem:[%s4561_s28 + $0xe20] sm:$0xff]  ;;  %v921_v18 = vld [vmem:[%s4561_s28 + $0xf78] sm:$0xff] }
 0x267   : > { %3806 = vmatpush1.bf16.msra.mxu1 %v3805_v32  ;;  %3296 = vmatprep.subr.bf16.mxu0 %v3295_v33  ;;  %v880_v32 = vld [vmem:[%s4561_s28 + $0xe30] sm:$0xff]  ;;  %v1972_v33 = vld [vmem:[%s4572_s26 + $0xe20] sm:$0xff]  ;;  %v2011_v8 = vld [vmem:[%s4572_s26 + $0xf58] sm:$0xff] }
 0x268   : > { %3808 = vmatprep.subr.bf16.mxu1 %v3807_v37  ;;  %v885_v37 = vld [vmem:[%s4561_s28 + $0xe58] sm:$0xff]  ;;  %v3317_v41 = vpack.c.bf16 %v880_v32, %v878_v31  ;;  %v3829_v42 = vpack.c.bf16 %v1974_v35, %v1972_v33  ;;  %v3847_v31 = vpack.c.bf16 %v1995_v24, %v1993_v23  ;;  %v903_v33 = vld [vmem:[%s4561_s28 + $0xee8] sm:$0xff]  ;;  %v918_v24 = vld [vmem:[%s4561_s28 + $0xf60] sm:$0xff] }
 0x269   : > { %v1994_v32 = vld [vmem:[%s4572_s26 + $0xed0] sm:$0xff]  ;;  %v1997_v35 = vld [vmem:[%s4572_s26 + $0xee8] sm:$0xff]  ;;  %v2015_v20 = vld [vmem:[%s4572_s26 + $0xf78] sm:$0xff] }
 0x26a   : > { %3298 = vmatpush1.bf16.msra.mxu0 %v3297_v43  ;;  %v3319_v43 = vpack.c.bf16 %v885_v37, %v883_v36  ;;  %v1999_v36 = vld [vmem:[%s4572_s26 + $0xef8] sm:$0xff] }
 0x26b   : > { %3810 = vmatpush1.bf16.msra.mxu1 %v3809_v44  ;;  %3300 = vmatprep.subr.bf16.mxu0 %v3299_v45  ;;  %v882_v44 = vld [vmem:[%s4561_s28 + $0xe40] sm:$0xff]  ;;  %v884_v45 = vld [vmem:[%s4561_s28 + $0xe50] sm:$0xff] }
 0x26c   : > { %3812 = vmatprep.subr.bf16.mxu1 %v3811_v49  ;;  %v887_v49 = vld [vmem:[%s4561_s28 + $0xe68] sm:$0xff]  ;;  %v3321_v53 = vpack.c.bf16 %v884_v45, %v882_v44  ;;  %v1998_v44 = vld [vmem:[%s4572_s26 + $0xef0] sm:$0xff] }
 0x26d   : > { %v907_v45 = vld [vmem:[%s4561_s28 + $0xf08] sm:$0xff] }
 0x26e   : > { %3302 = vmatpush1.bf16.msra.mxu0 %v3301_v55  ;;  %v3323_v55 = vpack.c.bf16 %v889_v50, %v887_v49  ;;  %v3343_v51 = vpack.c.bf16 %v909_v46, %v907_v45 }
 0x26f   : > { %3814 = vmatpush1.bf16.msra.mxu1 %v3813_v56  ;;  %3304 = vmatprep.subr.bf16.mxu0 %v3303_v57  ;;  %v886_v56 = vld [vmem:[%s4561_s28 + $0xe60] sm:$0xff]  ;;  %v888_v57 = vld [vmem:[%s4561_s28 + $0xe70] sm:$0xff] }
 0x270   : > { %3816 = vmatprep.subr.bf16.mxu1 %v3815_v61  ;;  %v891_v61 = vld [vmem:[%s4561_s28 + $0xe88] sm:$0xff]  ;;  %v3325_v1 = vpack.c.bf16 %v888_v57, %v886_v56  ;;  %v2002_v56 = vld [vmem:[%s4572_s26 + $0xf10] sm:$0xff] }
 0x271   : > { %v911_v57 = vld [vmem:[%s4561_s28 + $0xf28] sm:$0xff] }
 0x272   : > { %3306 = vmatpush1.bf16.msra.mxu0 %v3305_v3  ;;  %v3327_v3 = vpack.c.bf16 %v893_v62, %v891_v61  ;;  %v3347_v63 = vpack.c.bf16 %v913_v58, %v911_v57 }
 0x273   : > { %3818 = vmatpush1.bf16.msra.mxu1 %v3817_v4  ;;  %3308 = vmatprep.subr.bf16.mxu0 %v3307_v5  ;;  %v890_v4 = vld [vmem:[%s4561_s28 + $0xe80] sm:$0xff]  ;;  %v892_v5 = vld [vmem:[%s4561_s28 + $0xe90] sm:$0xff] }
 0x274   : > { %3820 = vmatprep.subr.bf16.mxu1 %v3819_v9  ;;  %v895_v9 = vld [vmem:[%s4561_s28 + $0xea8] sm:$0xff]  ;;  %v3329_v13 = vpack.c.bf16 %v892_v5, %v890_v4  ;;  %v2006_v4 = vld [vmem:[%s4572_s26 + $0xf30] sm:$0xff] }
 0x275   : > { %v915_v5 = vld [vmem:[%s4561_s28 + $0xf48] sm:$0xff] }
 0x276   : > { %3310 = vmatpush1.bf16.msra.mxu0 %v3309_v15  ;;  %v3331_v15 = vpack.c.bf16 %v897_v10, %v895_v9  ;;  %v3351_v11 = vpack.c.bf16 %v917_v6, %v915_v5 }
 0x277   : > { %3822 = vmatpush1.bf16.msra.mxu1 %v3821_v16  ;;  %3312 = vmatprep.subr.bf16.mxu0 %v3311_v17  ;;  %v894_v16 = vld [vmem:[%s4561_s28 + $0xea0] sm:$0xff]  ;;  %v896_v17 = vld [vmem:[%s4561_s28 + $0xeb0] sm:$0xff] }
 0x278   : > { %3824 = vmatprep.subr.bf16.mxu1 %v3823_v21  ;;  %v899_v21 = vld [vmem:[%s4561_s28 + $0xec8] sm:$0xff]  ;;  %v3333_v25 = vpack.c.bf16 %v896_v17, %v894_v16  ;;  %v2010_v16 = vld [vmem:[%s4572_s26 + $0xf50] sm:$0xff] }
 0x279   : > { %1441 = vmatmul.mubr.f32.vlgmr.msra.gmra.mrb[0].mxu0 %v422_v27  ;;  %v919_v17 = vld [vmem:[%s4561_s28 + $0xf68] sm:$0xff] }
 0x27a   : > { %3314 = vmatpush1.bf16.msra.mxu0 %v3313_v28  ;;  %2535 = vmatmul.mubr.f32.vlgmr.msra.gmra.mrb[0].mxu1 %v422_v27  ;;  %v3335_v27 = vpack.c.bf16 %v901_v22, %v899_v21  ;;  %v898_v28 = vld [vmem:[%s4561_s28 + $0xec0] sm:$0xff]  ;;  %v3355_v23 = vpack.c.bf16 %v921_v18, %v919_v17 }
 0x27b   : > { %3826 = vmatpush1.bf16.msra.mxu1 %v3825_v29  ;;  %3316 = vmatprep.subr.bf16.mxu0 %v3315_v30  ;;  %v900_v29 = vld [vmem:[%s4561_s28 + $0xed0] sm:$0xff]  ;;  %v1992_v30 = vld [vmem:[%s4572_s26 + $0xec0] sm:$0xff] }
 0x27c   : > { %3828 = vmatprep.subr.bf16.mxu1 %v3827_v34  ;;  %1511 = vmatprep.mubr.f32.mxu0 %v425_v40  ;;  %v905_v34 = vld [vmem:[%s4561_s28 + $0xef8] sm:$0xff]  ;;  %v3337_v37 = vpack.c.bf16 %v900_v29, %v898_v28  ;;  %v3849_v38 = vpack.c.bf16 %v1994_v32, %v1992_v30  ;;  %v923_v29 = vld [vmem:[%s4561_s28 + $0xf88] sm:$0xff] }
 0x27d   : > { %2605 = vmatprep.mubr.f32.mxu1 %v425_v40  ;;  %v3339_v39 = vpack.c.bf16 %v905_v34, %v903_v33  ;;  %v902_v40 = vld [vmem:[%s4561_s28 + $0xee0] sm:$0xff]  ;;  %v2014_v28 = vld [vmem:[%s4572_s26 + $0xf70] sm:$0xff] }
 0x27e   : > { %3318 = vmatpush1.bf16.msra.mxu0 %v3317_v41  ;;  %v904_v41 = vld [vmem:[%s4561_s28 + $0xef0] sm:$0xff]  ;;  %v925_v30 = vld [vmem:[%s4561_s28 + $0xf98] sm:$0xff] }
 0x27f   : > { %3830 = vmatpush1.bf16.msra.mxu1 %v3829_v42  ;;  %3320 = vmatprep.subr.bf16.mxu0 %v3319_v43  ;;  %v1996_v42 = vld [vmem:[%s4572_s26 + $0xee0] sm:$0xff]  ;;  %v3851_v43 = vpack.c.bf16 %v1999_v36, %v1997_v35  ;;  %v3341_v49 = vpack.c.bf16 %v904_v41, %v902_v40  ;;  %v2019_v32 = vld [vmem:[%s4572_s26 + $0xf98] sm:$0xff]  ;;  %v3359_v35 = vpack.c.bf16 %v925_v30, %v923_v29  ;;  %v2018_v40 = vld [vmem:[%s4572_s26 + $0xf90] sm:$0xff] }
 0x280   : > { %3832 = vmatprep.subr.bf16.mxu1 %v3831_v47  ;;  %v2001_v47 = vld [vmem:[%s4572_s26 + $0xf08] sm:$0xff]  ;;  %v3853_v50 = vpack.c.bf16 %v1998_v44, %v1996_v42  ;;  %v922_v36 = vld [vmem:[%s4561_s28 + $0xf80] sm:$0xff]  ;;  %v929_v42 = vld [vmem:[%s4561_s28 + $0xfb8] sm:$0xff] }
 0x281   : > { %v927_v41 = vld [vmem:[%s4561_s28 + $0xfa8] sm:$0xff]  ;;  %v2023_v44 = vld [vmem:[%s4572_s26 + $0xfb8] sm:$0xff] }
 0x282   : > { %3322 = vmatpush1.bf16.msra.mxu0 %v3321_v53  ;;  %v908_v53 = vld [vmem:[%s4561_s28 + $0xf10] sm:$0xff] }
 0x283   : > { %3834 = vmatpush1.bf16.msra.mxu1 %v3833_v54  ;;  %3324 = vmatprep.subr.bf16.mxu0 %v3323_v55  ;;  %v2000_v54 = vld [vmem:[%s4572_s26 + $0xf00] sm:$0xff]  ;;  %v3855_v55 = vpack.c.bf16 %v2003_v48, %v2001_v47  ;;  %v3345_v61 = vpack.c.bf16 %v908_v53, %v906_v52  ;;  %v3363_v47 = vpack.c.bf16 %v929_v42, %v927_v41  ;;  %v2022_v52 = vld [vmem:[%s4572_s26 + $0xfb0] sm:$0xff] }
 0x284   : > { %3836 = vmatprep.subr.bf16.mxu1 %v3835_v59  ;;  %v2005_v59 = vld [vmem:[%s4572_s26 + $0xf28] sm:$0xff]  ;;  %v3857_v62 = vpack.c.bf16 %v2002_v56, %v2000_v54  ;;  %v926_v48 = vld [vmem:[%s4561_s28 + $0xfa0] sm:$0xff]  ;;  %v933_v54 = vld [vmem:[%s4561_s28 + $0xfd8] sm:$0xff] }
 0x285   : > { %v931_v53 = vld [vmem:[%s4561_s28 + $0xfc8] sm:$0xff]  ;;  %v2027_v56 = vld [vmem:[%s4572_s26 + $0xfd8] sm:$0xff] }
 0x286   : > { %3326 = vmatpush1.bf16.msra.mxu0 %v3325_v1  ;;  %v912_v1 = vld [vmem:[%s4561_s28 + $0xf30] sm:$0xff] }
 0x287   : > { %3838 = vmatpush1.bf16.msra.mxu1 %v3837_v2  ;;  %3328 = vmatprep.subr.bf16.mxu0 %v3327_v3  ;;  %v2004_v2 = vld [vmem:[%s4572_s26 + $0xf20] sm:$0xff]  ;;  %v3859_v3 = vpack.c.bf16 %v2007_v60, %v2005_v59  ;;  %v3349_v9 = vpack.c.bf16 %v912_v1, %v910_v0  ;;  %v3367_v59 = vpack.c.bf16 %v933_v54, %v931_v53  ;;  %v2026_v0 = vld [vmem:[%s4572_s26 + $0xfd0] sm:$0xff] }
 0x288   : > { %3840 = vmatprep.subr.bf16.mxu1 %v3839_v7  ;;  %v2009_v7 = vld [vmem:[%s4572_s26 + $0xf48] sm:$0xff]  ;;  %v3861_v10 = vpack.c.bf16 %v2006_v4, %v2004_v2  ;;  %v930_v60 = vld [vmem:[%s4561_s28 + $0xfc0] sm:$0xff]  ;;  %v937_v2 = vld [vmem:[%s4561_s28 + $0xff8] sm:$0xff] }
 0x289   : > { %v935_v1 = vld [vmem:[%s4561_s28 + $0xfe8] sm:$0xff]  ;;  %v2031_v4 = vld [vmem:[%s4572_s26 + $0xff8] sm:$0xff] }
 0x28a   : > { %3330 = vmatpush1.bf16.msra.mxu0 %v3329_v13  ;;  %v916_v13 = vld [vmem:[%s4561_s28 + $0xf50] sm:$0xff] }
 0x28b   : > { %3842 = vmatpush1.bf16.msra.mxu1 %v3841_v14  ;;  %3332 = vmatprep.subr.bf16.mxu0 %v3331_v15  ;;  %v2008_v14 = vld [vmem:[%s4572_s26 + $0xf40] sm:$0xff]  ;;  %v3863_v15 = vpack.c.bf16 %v2011_v8, %v2009_v7  ;;  %v3353_v21 = vpack.c.bf16 %v916_v13, %v914_v12  ;;  %v3371_v7 = vpack.c.bf16 %v937_v2, %v935_v1  ;;  %v2030_v12 = vld [vmem:[%s4572_s26 + $0xff0] sm:$0xff] }
 0x28c   : > { %3844 = vmatprep.subr.bf16.mxu1 %v3843_v19  ;;  %v2013_v19 = vld [vmem:[%s4572_s26 + $0xf68] sm:$0xff]  ;;  %v3865_v22 = vpack.c.bf16 %v2010_v16, %v2008_v14  ;;  %v934_v8 = vld [vmem:[%s4561_s28 + $0xfe0] sm:$0xff]  ;;  %v940_v16 = vlaneseq }
 0x28e   : > { %3334 = vmatpush1.bf16.msra.mxu0 %v3333_v25  ;;  %v920_v25 = vld [vmem:[%s4561_s28 + $0xf70] sm:$0xff]  ;;  %v941_v17 = vshrl.u32 %v940_v16, 7 }
 0x28f   : > { %3846 = vmatpush1.bf16.msra.mxu1 %v3845_v26  ;;  %3336 = vmatprep.subr.bf16.mxu0 %v3335_v27  ;;  %v2012_v26 = vld [vmem:[%s4572_s26 + $0xf60] sm:$0xff]  ;;  %v3867_v27 = vpack.c.bf16 %v2015_v20, %v2013_v19  ;;  %v3357_v33 = vpack.c.bf16 %v920_v25, %v918_v24  ;;  %v938_v19 = vld [vmem:[%s4570_s12] sm:$0x3] }
 0x290   : > { %3848 = vmatprep.subr.bf16.mxu1 %v3847_v31  ;;  %v2017_v31 = vld [vmem:[%s4572_s26 + $0xf88] sm:$0xff]  ;;  %v3869_v34 = vpack.c.bf16 %v2014_v28, %v2012_v26  ;;  %v942_v18 = vsub.s32 0, %v941_v17  ;;  %v946_v20 = vsub.s32 1, %v941_v17 }
 0x292   : > { %3338 = vmatpush1.bf16.msra.mxu0 %v3337_v37  ;;  %v924_v37 = vld [vmem:[%s4561_s28 + $0xf90] sm:$0xff]  ;;  %v947_v24 = vrot.slane %v938_v19, %v946_v20 }
 0x293   : > { %3850 = vmatpush1.bf16.msra.mxu1 %v3849_v38  ;;  %3340 = vmatprep.subr.bf16.mxu0 %v3339_v39  ;;  %v2016_v38 = vld [vmem:[%s4572_s26 + $0xf80] sm:$0xff]  ;;  %v3871_v39 = vpack.c.bf16 %v2019_v32, %v2017_v31  ;;  %v3361_v45 = vpack.c.bf16 %v924_v37, %v922_v36 }
 0x294   : > { %3852 = vmatprep.subr.bf16.mxu1 %v3851_v43  ;;  %v2021_v43 = vld [vmem:[%s4572_s26 + $0xfa8] sm:$0xff]  ;;  %v3873_v46 = vpack.c.bf16 %v2018_v40, %v2016_v38 }
 0x296   : > { %3342 = vmatpush1.bf16.msra.mxu0 %v3341_v49  ;;  %v928_v49 = vld [vmem:[%s4561_s28 + $0xfb0] sm:$0xff] }
 0x297   : > { %3854 = vmatpush1.bf16.msra.mxu1 %v3853_v50  ;;  %3344 = vmatprep.subr.bf16.mxu0 %v3343_v51  ;;  %v2020_v50 = vld [vmem:[%s4572_s26 + $0xfa0] sm:$0xff]  ;;  %v3875_v51 = vpack.c.bf16 %v2023_v44, %v2021_v43  ;;  %v3365_v57 = vpack.c.bf16 %v928_v49, %v926_v48 }
 0x298   : > { %3856 = vmatprep.subr.bf16.mxu1 %v3855_v55  ;;  %v2025_v55 = vld [vmem:[%s4572_s26 + $0xfc8] sm:$0xff]  ;;  %v3877_v58 = vpack.c.bf16 %v2022_v52, %v2020_v50 }
 0x29a   : > { %3346 = vmatpush1.bf16.msra.mxu0 %v3345_v61  ;;  %v932_v61 = vld [vmem:[%s4561_s28 + $0xfd0] sm:$0xff] }
 0x29b   : > { %3858 = vmatpush1.bf16.msra.mxu1 %v3857_v62  ;;  %3348 = vmatprep.subr.bf16.mxu0 %v3347_v63  ;;  %v2024_v62 = vld [vmem:[%s4572_s26 + $0xfc0] sm:$0xff]  ;;  %v3879_v63 = vpack.c.bf16 %v2027_v56, %v2025_v55  ;;  %v3369_v5 = vpack.c.bf16 %v932_v61, %v930_v60 }
 0x29c   : > { %3860 = vmatprep.subr.bf16.mxu1 %v3859_v3  ;;  %v2029_v3 = vld [vmem:[%s4572_s26 + $0xfe8] sm:$0xff]  ;;  %v3881_v6 = vpack.c.bf16 %v2026_v0, %v2024_v62 }
 0x29e   : > { %3350 = vmatpush1.bf16.msra.mxu0 %v3349_v9  ;;  %v936_v9 = vld [vmem:[%s4561_s28 + $0xff0] sm:$0xff]  ;;  %s4263_s28 = smov [#allocation11]  }
 0x29f   : > { %3862 = vmatpush1.bf16.msra.mxu1 %v3861_v10  ;;  %3352 = vmatprep.subr.bf16.mxu0 %v3351_v11  ;;  %v3883_v10 = vpack.c.bf16 %v2031_v4, %v2029_v3  ;;  %v2028_v11 = vld [vmem:[%s4572_s26 + $0xfe0] sm:$0xff]  ;;  %v3373_v13 = vpack.c.bf16 %v936_v9, %v934_v8  ;;  %s4151_s18 = sshll.u32 %s4263_s28, 4  ;;  %s4152_s18 = int_to_ptr.vmem [resolvable:$false] %s4151_s18 }
 0x2a0   : > { %3864 = vmatprep.subr.bf16.mxu1 %v3863_v15  ;;  %v3885_v14 = vpack.c.bf16 %v2030_v12, %v2028_v11  ;;  %v424_v15 = vld [vmem:[#allocation2 + $0x70] sm:$0xff]  ;;  %s4153_s12 = scalar_lea.vmem %s4152_s18, 512  ;;  %p4154_p4 = scmp.lt.s32.totalorder %s5612_s23, %s4152_s18 }
 0x2a1   : > { %p4155_p9 = scmp.lt.s32.totalorder %s4153_s12, %s4147_s1 }
 0x2a2   : > { %3354 = vmatpush1.bf16.msra.mxu0 %v3353_v21  ;;  %v2032_v21 = vld [vmem:[%s355_s29] sm:$0x3] }
 0x2a3   : > { %3866 = vmatpush1.bf16.msra.mxu1 %v3865_v22  ;;  %3356 = vmatprep.subr.bf16.mxu0 %v3355_v23  ;;  %v943_v22 = vrot.slane %v938_v19, %v942_v18  ;;  %v2037_v23 = vrot.slane %v2032_v21, %v942_v18  ;;  %v2041_v25 = vrot.slane %v2032_v21, %v946_v20  ;;  %p4156_p7 = por %p4155_p9, %p4154_p4 }
 0x2a4   : > { %3868 = vmatprep.subr.bf16.mxu1 %v3867_v27 }
 0x2a5   : > { %p4157_p2 = pnand %p4156_p7, %p4150_p3 }
 0x2a6   : > { %3358 = vmatpush1.bf16.msra.mxu0 %v3357_v33 }
 0x2a7   : > { %3870 = vmatpush1.bf16.msra.mxu1 %v3869_v34  ;;  %3360 = vmatprep.subr.bf16.mxu0 %v3359_v35 }
 0x2a8   : > { %3872 = vmatprep.subr.bf16.mxu1 %v3871_v39 }
 0x2aa   : > { %3362 = vmatpush1.bf16.msra.mxu0 %v3361_v45 }
 0x2ab   : > { %3874 = vmatpush1.bf16.msra.mxu1 %v3873_v46  ;;  %3364 = vmatprep.subr.bf16.mxu0 %v3363_v47 }
 0x2ac   : > { %3876 = vmatprep.subr.bf16.mxu1 %v3875_v51 }
 0x2ae   : > { %3366 = vmatpush1.bf16.msra.mxu0 %v3365_v57 }
 0x2af   : > { %3878 = vmatpush1.bf16.msra.mxu1 %v3877_v58  ;;  %3368 = vmatprep.subr.bf16.mxu0 %v3367_v59 }
 0x2b0   : > { %3880 = vmatprep.subr.bf16.mxu1 %v3879_v63 }
 0x2b2   : > { %3370 = vmatpush1.bf16.msra.mxu0 %v3369_v5 }
 0x2b3   : > { %3882 = vmatpush1.bf16.msra.mxu1 %v3881_v6  ;;  %3372 = vmatprep.subr.bf16.mxu0 %v3371_v7 }
 0x2b4   : > { %3884 = vmatprep.subr.bf16.mxu1 %v3883_v10 }
 0x2b6   : > { %3374 = vmatpush1.bf16.msra.mxu0 %v3373_v13 }
 0x2b7   : > { %3886 = vmatpush1.bf16.msra.mxu1 %v3885_v14 }
 0x2b9   : > { %1512 = vmatmul.mubr.f32.vlgmr.msra.gmra.mrb[0].mxu0 %v424_v15 }
 0x2ba   : > { %2606 = vmatmul.mubr.f32.vlgmr.msra.gmra.mrb[0].mxu1 %v424_v15 }
 0x38c   : > { %v1513_v26 = vpop.f32.mrb[0].mxu0 }
 0x38d   : > { %v3887_v27 = vadd.f32 %v1513_v26, %v943_v22  ;;  %v2607_v28 = vpop.f32.mrb[0].mxu1  ;;  %v1515_v29 = vpop.f32.mrb[1].mxu0 }
 0x38e   : > { %v3889_v30 = vadd.f32 %v2607_v28, %v2037_v23  ;;  %v3888_v31 = vadd.f32 %v1515_v29, %v947_v24  ;;  %v2609_v32 = vpop.f32.mrb[1].mxu1 }
 0x38f   : > { %1518 = vst [vmem:[%s396_s27] sm:$0xff] %v3887_v27  ;;  %v3890_v33 = vadd.f32 %v2609_v32, %v2041_v25 }
 0x390   : > { %2612 = vst [vmem:[%s403_s25] sm:$0xff] %v3889_v30  ;;  %1519 = vst [vmem:[%s396_s27 + $0x8] sm:$0xff] %v3888_v31 }
 0x391   : > { %2613 = vst [vmem:[%s403_s25 + $0x8] sm:$0xff] %v3890_v33 }
 0x392   : > { %4160 = shalt.err (!%p4157_p2)
}
 0x393   : > { %s4161_s3 = scalar_lea.hbm %s5610_s20, 256  ;;  %s4165_s29 = scalar_lea.hbm %s5687_s5, 1024 }
 0x394   : > { %p4162_p0 = scmp.ne.s32.totalorder %s5610_s20, %s4161_s3  ;;  %p4166_p10 = scmp.lt.u32.totalorder %s5610_s20, %s5687_s5 }
 0x395   : > { %p4167_p13 = scmp.lt.u32.totalorder %s4165_s29, %s4161_s3  ;;  %p4169_p12 = scmp.lt.u32.totalorder %s4161_s3, %s5610_s20 }
 0x396   : > { %p4163_p6 = pnand %p4162_p0, %p5729_p8 }
 0x397   : > { %p4168_p5 = por %p4167_p13, %p4166_p10 }
 0x398   : > { %p4164_p11 = pneg %p4163_p6 }
 0x399   : > { %p4170_p1 = por %p4169_p12, %p4168_p5 }
 0x39b   : > { %p4171_p3 = pnand %p4170_p1, %p4164_p11 }
 0x39d   : > { %4174 = shalt.err (!%p4171_p3)
}
 0x39e   : > { %3931 = dma.vmem_to_hbm [thread:$0]  (%p5729_p8), %s5612_s23, 256, %s5610_s20, %s2615_s14  }
 0x39f   : > { %s2620_s25 = scalar_lea.sflag [#allocation13], %s4558_s7  ;;  %s4175_s9 = scalar_lea.vmem %s5619_s15, 256 }
 0x3a0   : > { %p4176_p4 = scmp.ne.s32.totalorder %s5619_s15, %s4175_s9  ;;  %s4264_s11 = smov [#allocation12]  }
 0x3a1   : > { %s4179_s30 = sshll.u32 %s4264_s11, 4  ;;  %s4180_s30 = int_to_ptr.vmem [resolvable:$false] %s4179_s30 }
 0x3a2   : > { %p4177_p9 = pnand %p4176_p4, %p5729_p8  ;;  %s4181_s13 = scalar_lea.vmem %s4180_s30, 512 }
 0x3a3   : > { %p4182_p2 = scmp.lt.s32.totalorder %s5619_s15, %s4180_s30  ;;  %p4183_p0 = scmp.lt.s32.totalorder %s4181_s13, %s4175_s9 }
 0x3a4   : > { %p4178_p7 = pneg %p4177_p9 }
 0x3a5   : > { %p4184_p6 = por %p4183_p0, %p4182_p2 }
 0x3a7   : > { %p4185_p11 = pnand %p4184_p6, %p4178_p7 }
 0x3a9   : > { %4188 = shalt.err (!%p4185_p11)
}
 0x3aa   : > { %s4189_s7 = scalar_lea.hbm %s5617_s17, 256  ;;  %s4193_s14 = scalar_lea.hbm %s5688_s6, 1024 }
 0x3ab   : > { %p4190_p10 = scmp.ne.s32.totalorder %s5617_s17, %s4189_s7  ;;  %p4194_p12 = scmp.lt.u32.totalorder %s5617_s17, %s5688_s6 }
 0x3ac   : > { %p4195_p1 = scmp.lt.u32.totalorder %s4193_s14, %s4189_s7  ;;  %p4197_p4 = scmp.lt.u32.totalorder %s4189_s7, %s5617_s17 }
 0x3ad   : > { %p4191_p13 = pnand %p4190_p10, %p5729_p8 }
 0x3ae   : > { %p4196_p3 = por %p4195_p1, %p4194_p12 }
 0x3af   : > { %p4192_p5 = pneg %p4191_p13 }
 0x3b0   : > { %p4198_p9 = por %p4197_p4, %p4196_p3 }
 0x3b2   : > { %p4199_p7 = pnand %p4198_p9, %p4192_p5 }
 0x3b4   : > { %4202 = shalt.err (!%p4199_p7)
}
 0x3b5   : > { %3932 = dma.vmem_to_hbm [thread:$0]  (%p5729_p8), %s5619_s15, 256, %s5617_s17, %s2620_s25  }
 0x3b6 PF: > { %p3962_p2 = scmp.ge.s32.totalorder %s4253_s24, 2  ;;  %s2660_s18 = sand.u32 1, %s4241_s21  }
 0x3b7   : > { %p5730_p0 = scmp.ne.s32.totalorder %s5716_s19, 0  ;;  %s2661_s12 = scalar_lea.sflag [#allocation4], %s2660_s18 }
 0x3b9   : > { %p3953_p6 = pnand %p3962_p2, %p5730_p0 }
 0x3bb   : > { %4232 = dma.done.wait (!%p3953_p6), %s2661_s12, 256  }
 0x3bc   : > { %4234 = vsyncadd (!%p3953_p6), %s2661_s12, 4294967040  ;;  %s2670_s3 = scalar_lea.sflag [#allocation13], %s2660_s18 }
 0x3bd   : > { %4236 = dma.done.wait (!%p3953_p6), %s2670_s3, 256  }
 0x3be   : > { %4238 = vsyncadd (!%p3953_p6), %s2670_s3, 4294967040  ;;  %s5731_s24 = sld [smem:[#allocation20_spill]]  ;;  %s5732_s16 = sld [smem:[#allocation19_spill]] }
 0x3bf   : > { %s5733_s23 = sld [smem:[#allocation21_spill]]  ;;  %s5734_s21 = smov %s4245_s22 }
 0x3c4   : > { %p27_p8 = scmp.ge.s32.totalorder %s5731_s24, 6   ;;  %s5735_s22 = smov %s5732_s16 }
 0x3c6   :  { %29 = sbr.rel (!%p27_p8) target bundleno = 13 (0xd), region = 142 }
 0x3cd   :  { %2675 = vsyncpa [#allocation3], 1 }
 0x3ce   :  { %2677 = vsyncpa [#allocation3 + $0x1], 1 }
 0x3cf   :  { %2678 = vsyncpa [#allocation6], 1 }
 0x3d0   :  { %2680 = vsyncpa [#allocation6 + $0x1], 1 }
 0x3d1   :  { %2681 = vsyncpa [#allocation9], 1 }
 0x3d2   :  { %2683 = vsyncpa [#allocation9 + $0x1], 1 }
 0x3d3   :  { %2684 = vsyncpa [#allocation4], 1 }
 0x3d4   :  { %2686 = vsyncpa [#allocation4 + $0x1], 1 }
 0x3d5   :  { %2687 = vsyncpa [#allocation13], 1 }
 0x3d6   :  { %2689 = vsyncpa [#allocation13 + $0x1], 1 }

</bundles_post_ra>
